<compile_context>
chip_gen: v5e
topology: v5e:2x2
jax: 0.10.0
libtpu: 0.0.40
codegen_flags: <defaults>
</compile_context>

<pallas_src>
import functools

import numpy as np
import jax
import jax.numpy as jnp
from jax.experimental import pallas as pl
from jax.experimental.pallas import tpu as pltpu


# ------------------------------ kernel helpers ------------------------------ #
def _silu(v):
    return v * (1.0 / (1.0 + jnp.exp(-v)))


# --------------------------------- kernel ----------------------------------- #
def resnet_block_kernel(x_ref, tproj_ref, masks_ref,
                        gmat1_ref, gn1g_ref, gn1b_ref, w1_ref, b1_ref,
                        gmat2_ref, gn2g_ref, gn2b_ref, w2_ref, b2_ref,
                        o_ref, *, H, W, eps, skip_rescale):
    HW = H * W
    # Flat lane shifts for the 9 taps of a zero-padded 3x3 conv (trace-time
    # Python constants; matching validity masks are precomputed inputs).
    shifts = [dy * W + dx for dy in (-1, 0, 1) for dx in (-1, 0, 1)]
    masks = masks_ref[...]                               # (9, HW) f32

    def conv3x3(h, w_ref, b_ref):
        # Per-tap accumulating matmuls: (C_out, C_in) @ (C_in, HW), f32 acc.
        acc = None
        for t, d in enumerate(shifts):
            if d == 0:                                   # centre tap: no roll/mask
                piece = h
            else:
                rolled = pltpu.roll(h, shift=(-d) % HW, axis=1)
                piece = rolled * masks[t:t + 1, :]       # zero-pad wrapped taps
            contrib = jnp.dot(w_ref[t],                  # bf16 (C_out, C_in)
                              piece.astype(jnp.bfloat16),
                              preferred_element_type=jnp.float32)
            acc = contrib if acc is None else acc + contrib
        return acc + b_ref[...]                          # bias (C_out, 1)

    def group_norm(h, gmat_ref, gamma_ref, beta_ref):
        # Lane-reduce over HW first, then group-average the tiny (C,1) stats
        # with a (C,C) matvec (instead of (C,C)@(C,HW) matmuls).
        ch_mean = jnp.mean(h, axis=1, keepdims=True)                       # (C,1)
        mean = jnp.dot(gmat_ref[...], ch_mean,
                       preferred_element_type=jnp.float32)                 # (C,1)
        d = h - mean                                     # needed for output anyway
        ch_var = jnp.mean(d * d, axis=1, keepdims=True)                    # (C,1)
        var = jnp.dot(gmat_ref[...], ch_var,
                      preferred_element_type=jnp.float32)                  # (C,1)
        inv = jax.lax.rsqrt(var + eps)
        return d * (inv * gamma_ref[...]) + beta_ref[...]

    # GroupNorm -> SiLU -> conv3x3
    h = _silu(group_norm(x_ref[0].astype(jnp.float32),
                         gmat1_ref, gn1g_ref, gn1b_ref))
    h = conv3x3(h, w1_ref, b1_ref)                       # (C_out, HW)

    # + temb projection (precomputed per-channel bias, (C_out, 1))
    h = h + tproj_ref[0]

    # GroupNorm -> SiLU -> dropout(identity, eval mode) -> conv3x3
    h = _silu(group_norm(h, gmat2_ref, gn2g_ref, gn2b_ref))
    # TODO(synk): training-mode dropout omitted (deterministic eval forward).
    h = conv3x3(h, w2_ref, b2_ref)

    # Residual: re-read x here so no f32 copy stays live across both convs.
    out = x_ref[0].astype(jnp.float32) + h               # out_ch == C
    if skip_rescale:
        out = out * np.float32(1.0 / np.sqrt(2.0))
    o_ref[0] = out.astype(o_ref.dtype)


# -------------------------------- wrapper ------------------------------------ #
def _group_avg_matrix(channels, groups):
    assert channels % groups == 0
    cg = channels // groups
    gid = np.arange(channels) // cg
    m = (gid[:, None] == gid[None, :]).astype(np.float32) / np.float32(cg)
    return jnp.asarray(m)


def _tap_masks(H, W):
    HW = H * W
    row = np.arange(HW) // W
    col = np.arange(HW) % W
    masks = np.zeros((9, HW), np.float32)
    t = 0
    for dy in (-1, 0, 1):
        for dx in (-1, 0, 1):
            valid = ((row + dy >= 0) & (row + dy < H) &
                     (col + dx >= 0) & (col + dx < W))
            masks[t] = valid.astype(np.float32)
            t += 1
    return jnp.asarray(masks)


def _conv_weight_taps(w):
    # (O, I, 3, 3) -> bf16 (9, O, I); tap index t = (dy+1)*3 + (dx+1).
    o, i = int(w.shape[0]), int(w.shape[1])
    return jnp.transpose(w, (2, 3, 0, 1)).reshape(9, o, i).astype(jnp.bfloat16)


def resnet_block_biggan_pallas(x, temb, params, *, skip_rescale=True, eps=1e-5):
    # TODO(synk): up/down (FIR upfirdn / nearest / avg-pool) branches and the
    # out_ch != C conv1x1-skip branch are not implemented in this kernel.
    B, C, H, W = x.shape
    HW = H * W
    out_ch = C
    G1 = min(C // 4, 32)
    G2 = min(out_ch // 4, 32)

    col = lambda v: v.reshape(-1, 1).astype(jnp.float32)

    # temb path hoisted to a tiny XLA GEMM: silu(temb) @ W_t^T + b_t -> (B, C_out, 1)
    tproj = (jax.nn.silu(temb.astype(jnp.float32))
             @ params["w_temb"].astype(jnp.float32).T
             + params["b_temb"].astype(jnp.float32))[:, :, None]

    args = (
        x.reshape(B, C, HW),                       # native dtype, lane-dense HW
        tproj,
        _tap_masks(H, W),
        _group_avg_matrix(C, G1), col(params["gn1_g"]), col(params["gn1_b"]),
        _conv_weight_taps(params["w1"]), col(params["b1"]),
        _group_avg_matrix(out_ch, G2), col(params["gn2_g"]), col(params["gn2_b"]),
        _conv_weight_taps(params["w2"]), col(params["b2"]),
    )

    kernel = functools.partial(resnet_block_kernel, H=H, W=W, eps=eps,
                               skip_rescale=skip_rescale)

    # VMEM budget: double-buffered x/out blocks + constants + headroom for the
    # in-kernel f32 temporaries; clamped under v7x's 64 MiB physical VMEM.
    per_sample = C * HW * 4
    const_bytes = (9 * HW * 4 + (C * C + out_ch * out_ch) * 4
                   + 9 * (out_ch * C + out_ch * out_ch) * 2
                   + 16 * max(C, out_ch) * 4)
    vmem_limit = int(min(max(10 * per_sample + const_bytes + (4 << 20), 16 << 20),
                         56 << 20))

    const2 = lambda b: (0, 0)
    const3 = lambda b: (0, 0, 0)
    out = pl.pallas_call(
        kernel,
        out_shape=jax.ShapeDtypeStruct((B, out_ch, HW), x.dtype),
        grid_spec=pltpu.PrefetchScalarGridSpec(
            num_scalar_prefetch=0,
            grid=(B,),
            in_specs=[
                pl.BlockSpec((1, C, HW), lambda b: (b, 0, 0)),        # x
                pl.BlockSpec((1, out_ch, 1), lambda b: (b, 0, 0)),    # temb proj
                pl.BlockSpec((9, HW), const2),                        # tap masks
                pl.BlockSpec((C, C), const2),                         # gmat1
                pl.BlockSpec((C, 1), const2),                         # gn1 gamma
                pl.BlockSpec((C, 1), const2),                         # gn1 beta
                pl.BlockSpec((9, out_ch, C), const3),                 # w1 taps (bf16)
                pl.BlockSpec((out_ch, 1), const2),                    # b1
                pl.BlockSpec((out_ch, out_ch), const2),               # gmat2
                pl.BlockSpec((out_ch, 1), const2),                    # gn2 gamma
                pl.BlockSpec((out_ch, 1), const2),                    # gn2 beta
                pl.BlockSpec((9, out_ch, out_ch), const3),            # w2 taps (bf16)
                pl.BlockSpec((out_ch, 1), const2),                    # b2
            ],
            out_specs=pl.BlockSpec((1, out_ch, HW), lambda b: (b, 0, 0)),
        ),
        # TODO(synk): if B == 1 on v7x, add a second "parallel" grid axis so
        # both TensorCores get work.
        compiler_params=pltpu.CompilerParams(
            dimension_semantics=("parallel",),
            vmem_limit_bytes=vmem_limit),
    )(*args)

    return out.reshape(B, out_ch, H, W)


# ---------------------------- pure-JAX reference ----------------------------- #
def resnet_block_biggan_reference(x, temb, params, *, skip_rescale=True, eps=1e-5):
    B, C, H, W = x.shape
    out_ch = C
    act = jax.nn.silu

    def group_norm(t, gamma, beta, groups):
        b = t.shape[0]
        tg = t.reshape(b, groups, -1)
        mu = tg.mean(axis=-1, keepdims=True)
        var = ((tg - mu) ** 2).mean(axis=-1, keepdims=True)
        tn = ((tg - mu) / jnp.sqrt(var + eps)).reshape(t.shape)
        return tn * gamma[None, :, None, None] + beta[None, :, None, None]

    def conv3x3(t, w, b):
        y = jax.lax.conv_general_dilated(
            t.astype(jnp.float32), w.astype(jnp.float32),
            window_strides=(1, 1), padding=((1, 1), (1, 1)),
            dimension_numbers=("NCHW", "OIHW", "NCHW"))
        return y + b[None, :, None, None]

    h = act(group_norm(x, params["gn1_g"], params["gn1_b"], min(C // 4, 32)))
    h = conv3x3(h, params["w1"], params["b1"])
    h = h + (act(temb) @ params["w_temb"].T + params["b_temb"])[:, :, None, None]
    h = act(group_norm(h, params["gn2_g"], params["gn2_b"], min(out_ch // 4, 32)))
    # dropout: identity (eval mode)
    h = conv3x3(h, params["w2"], params["b2"])
    out = x + h
    if skip_rescale:
        out = out / np.sqrt(2.0)
    return out


# ----------------------------------- main ------------------------------------ #
if __name__ == "__main__":
    B, C, H, W = 2, 32, 16, 16         # out_ch == C; H*W = 256 (lane-dense)
    TEMB = 32

    key = jax.random.PRNGKey(0)
    ks = jax.random.split(key, 12)
    s_conv = 1.0 / np.sqrt(C * 9)
    s_lin = 1.0 / np.sqrt(TEMB)
    params = {
        "gn1_g": 1.0 + 0.1 * jax.random.normal(ks[0], (C,), jnp.float32),
        "gn1_b": 0.1 * jax.random.normal(ks[1], (C,), jnp.float32),
        "w1": jax.random.uniform(ks[2], (C, C, 3, 3), jnp.float32, -s_conv, s_conv),
        "b1": jax.random.uniform(ks[3], (C,), jnp.float32, -s_conv, s_conv),
        "w_temb": jax.random.uniform(ks[4], (C, TEMB), jnp.float32, -s_lin, s_lin),
        "b_temb": jax.random.uniform(ks[5], (C,), jnp.float32, -s_lin, s_lin),
        "gn2_g": 1.0 + 0.1 * jax.random.normal(ks[6], (C,), jnp.float32),
        "gn2_b": 0.1 * jax.random.normal(ks[7], (C,), jnp.float32),
        "w2": jax.random.uniform(ks[8], (C, C, 3, 3), jnp.float32, -s_conv, s_conv),
        "b2": jax.random.uniform(ks[9], (C,), jnp.float32, -s_conv, s_conv),
    }
    x = jax.random.normal(ks[10], (B, C, H, W), jnp.float32)
    temb = jax.random.normal(ks[11], (B, TEMB), jnp.float32)

    out = resnet_block_biggan_pallas(x, temb, params, skip_rescale=True)
    out = jax.block_until_ready(out)

    ref = resnet_block_biggan_reference(x, temb, params, skip_rescale=True)
    np.testing.assert_allclose(np.asarray(out), np.asarray(ref),
                               atol=2e-2, rtol=2e-2)

    print("KERNEL_OK")
</pallas_src>

<mosaic_0001>
module attributes {stable_mosaic.version = 11 : i64} {
  func.func @resnet_block_kernel(%arg0: i32, %arg1: memref<1x32x256xf32, #tpu.memory_space<vmem>>, %arg2: memref<1x32x1xf32, #tpu.memory_space<vmem>>, %arg3: memref<9x256xf32, #tpu.memory_space<vmem>>, %arg4: memref<32x32xf32, #tpu.memory_space<vmem>>, %arg5: memref<32x1xf32, #tpu.memory_space<vmem>>, %arg6: memref<32x1xf32, #tpu.memory_space<vmem>>, %arg7: memref<9x32x32xbf16, #tpu.memory_space<vmem>>, %arg8: memref<32x1xf32, #tpu.memory_space<vmem>>, %arg9: memref<32x32xf32, #tpu.memory_space<vmem>>, %arg10: memref<32x1xf32, #tpu.memory_space<vmem>>, %arg11: memref<32x1xf32, #tpu.memory_space<vmem>>, %arg12: memref<9x32x32xbf16, #tpu.memory_space<vmem>>, %arg13: memref<32x1xf32, #tpu.memory_space<vmem>>, %arg14: memref<1x32x256xf32, #tpu.memory_space<vmem>>) attributes {dimension_semantics = [#tpu.dimension_semantics<parallel>], iteration_bounds = array<i64: 2>, scalar_prefetch = 0 : i64, scratch_operands = 0 : i64, tpu.core_type = #tpu.core_type<tc>, window_params = [{transform_indices = @transform_0, window_bounds = array<i64: 1, 32, 256>}, {transform_indices = @transform_1, window_bounds = array<i64: 1, 32, 1>}, {pipeline_mode = #tpu.pipeline_mode<synchronous>, transform_indices = @transform_2, window_bounds = array<i64: 9, 256>}, {pipeline_mode = #tpu.pipeline_mode<synchronous>, transform_indices = @transform_3, window_bounds = array<i64: 32, 32>}, {pipeline_mode = #tpu.pipeline_mode<synchronous>, transform_indices = @transform_4, window_bounds = array<i64: 32, 1>}, {pipeline_mode = #tpu.pipeline_mode<synchronous>, transform_indices = @transform_5, window_bounds = array<i64: 32, 1>}, {pipeline_mode = #tpu.pipeline_mode<synchronous>, transform_indices = @transform_6, window_bounds = array<i64: 9, 32, 32>}, {pipeline_mode = #tpu.pipeline_mode<synchronous>, transform_indices = @transform_7, window_bounds = array<i64: 32, 1>}, {pipeline_mode = #tpu.pipeline_mode<synchronous>, transform_indices = @transform_8, window_bounds = array<i64: 32, 32>}, {pipeline_mode = #tpu.pipeline_mode<synchronous>, transform_indices = @transform_9, window_bounds = array<i64: 32, 1>}, {pipeline_mode = #tpu.pipeline_mode<synchronous>, transform_indices = @transform_10, window_bounds = array<i64: 32, 1>}, {pipeline_mode = #tpu.pipeline_mode<synchronous>, transform_indices = @transform_11, window_bounds = array<i64: 9, 32, 32>}, {pipeline_mode = #tpu.pipeline_mode<synchronous>, transform_indices = @transform_12, window_bounds = array<i64: 32, 1>}, {transform_indices = @transform_13, window_bounds = array<i64: 1, 32, 256>}]} {
    %c0 = arith.constant 0 : index
    %c0_0 = arith.constant 0 : index
    %0 = vector.load %arg3[%c0, %c0_0] : memref<9x256xf32, #tpu.memory_space<vmem>>, vector<9x256xf32>
    %c0_1 = arith.constant 0 : index
    %c0_2 = arith.constant 0 : index
    %c0_3 = arith.constant 0 : index
    %1 = vector.load %arg1[%c0_1, %c0_2, %c0_3] : memref<1x32x256xf32, #tpu.memory_space<vmem>>, vector<1x32x256xf32>
    %2 = vector.shape_cast %1 : vector<1x32x256xf32> to vector<32x256xf32>
    %cst = arith.constant dense<0.000000e+00> : vector<32xf32>
    %3 = vector.multi_reduction <add>, %2, %cst [1] : vector<32x256xf32> to vector<32xf32>
    %4 = vector.shape_cast %3 : vector<32xf32> to vector<32x1xf32>
    %cst_4 = arith.constant 2.560000e+02 : f32
    %5 = vector.broadcast %cst_4 : f32 to vector<32x1xf32>
    %6 = arith.divf %4, %5 : vector<32x1xf32>
    %c0_5 = arith.constant 0 : index
    %c0_6 = arith.constant 0 : index
    %7 = vector.load %arg4[%c0_5, %c0_6] : memref<32x32xf32, #tpu.memory_space<vmem>>, vector<32x32xf32>
    %cst_7 = arith.constant dense<0.000000e+00> : vector<32x1xf32>
    %8 = tpu.matmul %7, %6, %cst_7 {dimension_numbers = #tpu.dot_dimension_numbers<[1], [0], [0], [1], [0, 0, 1, 1], [], []>} : vector<32x32xf32>, vector<32x1xf32>, vector<32x1xf32> -> vector<32x1xf32>
    %9 = vector.broadcast %8 : vector<32x1xf32> to vector<32x256xf32>
    %10 = arith.subf %2, %9 : vector<32x256xf32>
    %11 = arith.mulf %10, %10 : vector<32x256xf32>
    %cst_8 = arith.constant dense<0.000000e+00> : vector<32xf32>
    %12 = vector.multi_reduction <add>, %11, %cst_8 [1] : vector<32x256xf32> to vector<32xf32>
    %13 = vector.shape_cast %12 : vector<32xf32> to vector<32x1xf32>
    %cst_9 = arith.constant 2.560000e+02 : f32
    %14 = vector.broadcast %cst_9 : f32 to vector<32x1xf32>
    %15 = arith.divf %13, %14 : vector<32x1xf32>
    %c0_10 = arith.constant 0 : index
    %c0_11 = arith.constant 0 : index
    %16 = vector.load %arg4[%c0_10, %c0_11] : memref<32x32xf32, #tpu.memory_space<vmem>>, vector<32x32xf32>
    %cst_12 = arith.constant dense<0.000000e+00> : vector<32x1xf32>
    %17 = tpu.matmul %16, %15, %cst_12 {dimension_numbers = #tpu.dot_dimension_numbers<[1], [0], [0], [1], [0, 0, 1, 1], [], []>} : vector<32x32xf32>, vector<32x1xf32>, vector<32x1xf32> -> vector<32x1xf32>
    %cst_13 = arith.constant 9.99999974E-6 : f32
    %18 = vector.broadcast %cst_13 : f32 to vector<32x1xf32>
    %19 = arith.addf %17, %18 : vector<32x1xf32>
    %20 = math.rsqrt %19 : vector<32x1xf32>
    %c0_14 = arith.constant 0 : index
    %c0_15 = arith.constant 0 : index
    %21 = vector.load %arg5[%c0_14, %c0_15] : memref<32x1xf32, #tpu.memory_space<vmem>>, vector<32x1xf32>
    %22 = arith.mulf %20, %21 : vector<32x1xf32>
    %23 = vector.broadcast %22 : vector<32x1xf32> to vector<32x256xf32>
    %24 = arith.mulf %10, %23 : vector<32x256xf32>
    %c0_16 = arith.constant 0 : index
    %c0_17 = arith.constant 0 : index
    %25 = vector.load %arg6[%c0_16, %c0_17] : memref<32x1xf32, #tpu.memory_space<vmem>>, vector<32x1xf32>
    %26 = vector.broadcast %25 : vector<32x1xf32> to vector<32x256xf32>
    %27 = arith.addf %24, %26 : vector<32x256xf32>
    %cst_18 = arith.constant 0.000000e+00 : f32
    %28 = vector.broadcast %cst_18 : f32 to vector<32x256xf32>
    %29 = arith.subf %28, %27 : vector<32x256xf32>
    %30 = math.exp %29 : vector<32x256xf32>
    %cst_19 = arith.constant 1.000000e+00 : f32
    %31 = vector.broadcast %cst_19 : f32 to vector<32x256xf32>
    %32 = arith.addf %31, %30 : vector<32x256xf32>
    %cst_20 = arith.constant 1.000000e+00 : f32
    %33 = vector.broadcast %cst_20 : f32 to vector<32x256xf32>
    %34 = arith.divf %33, %32 : vector<32x256xf32>
    %35 = arith.mulf %27, %34 : vector<32x256xf32>
    %c17_i32 = arith.constant 17 : i32
    %36 = tpu.dynamic_rotate %35 by %c17_i32 dim 1 : vector<32x256xf32>, i32 -> vector<32x256xf32>
    %37 = vector.extract_strided_slice %0 {offsets = [0, 0], sizes = [1, 256], strides = [1, 1]} : vector<9x256xf32> to vector<1x256xf32>
    %38 = vector.broadcast %37 : vector<1x256xf32> to vector<32x256xf32>
    %39 = arith.mulf %36, %38 : vector<32x256xf32>
    %c0_21 = arith.constant 0 : index
    %c0_22 = arith.constant 0 : index
    %c0_23 = arith.constant 0 : index
    %40 = vector.load %arg7[%c0_21, %c0_22, %c0_23] : memref<9x32x32xbf16, #tpu.memory_space<vmem>>, vector<1x32x32xbf16>
    %41 = vector.shape_cast %40 : vector<1x32x32xbf16> to vector<32x32xbf16>
    %42 = arith.truncf %39 : vector<32x256xf32> to vector<32x256xbf16>
    %cst_24 = arith.constant dense<0.000000e+00> : vector<32x256xf32>
    %43 = tpu.matmul %41, %42, %cst_24 {dimension_numbers = #tpu.dot_dimension_numbers<[1], [0], [0], [1], [0, 0, 1, 1], [], []>} : vector<32x32xbf16>, vector<32x256xbf16>, vector<32x256xf32> -> vector<32x256xf32>
    %c16_i32 = arith.constant 16 : i32
    %44 = tpu.dynamic_rotate %35 by %c16_i32 dim 1 : vector<32x256xf32>, i32 -> vector<32x256xf32>
    %45 = vector.extract_strided_slice %0 {offsets = [1, 0], sizes = [1, 256], strides = [1, 1]} : vector<9x256xf32> to vector<1x256xf32>
    %46 = vector.broadcast %45 : vector<1x256xf32> to vector<32x256xf32>
    %47 = arith.mulf %44, %46 : vector<32x256xf32>
    %c1 = arith.constant 1 : index
    %c0_25 = arith.constant 0 : index
    %c0_26 = arith.constant 0 : index
    %48 = vector.load %arg7[%c1, %c0_25, %c0_26] : memref<9x32x32xbf16, #tpu.memory_space<vmem>>, vector<1x32x32xbf16>
    %49 = vector.shape_cast %48 : vector<1x32x32xbf16> to vector<32x32xbf16>
    %50 = arith.truncf %47 : vector<32x256xf32> to vector<32x256xbf16>
    %cst_27 = arith.constant dense<0.000000e+00> : vector<32x256xf32>
    %51 = tpu.matmul %49, %50, %cst_27 {dimension_numbers = #tpu.dot_dimension_numbers<[1], [0], [0], [1], [0, 0, 1, 1], [], []>} : vector<32x32xbf16>, vector<32x256xbf16>, vector<32x256xf32> -> vector<32x256xf32>
    %52 = arith.addf %43, %51 : vector<32x256xf32>
    %c15_i32 = arith.constant 15 : i32
    %53 = tpu.dynamic_rotate %35 by %c15_i32 dim 1 : vector<32x256xf32>, i32 -> vector<32x256xf32>
    %54 = vector.extract_strided_slice %0 {offsets = [2, 0], sizes = [1, 256], strides = [1, 1]} : vector<9x256xf32> to vector<1x256xf32>
    %55 = vector.broadcast %54 : vector<1x256xf32> to vector<32x256xf32>
    %56 = arith.mulf %53, %55 : vector<32x256xf32>
    %c2 = arith.constant 2 : index
    %c0_28 = arith.constant 0 : index
    %c0_29 = arith.constant 0 : index
    %57 = vector.load %arg7[%c2, %c0_28, %c0_29] : memref<9x32x32xbf16, #tpu.memory_space<vmem>>, vector<1x32x32xbf16>
    %58 = vector.shape_cast %57 : vector<1x32x32xbf16> to vector<32x32xbf16>
    %59 = arith.truncf %56 : vector<32x256xf32> to vector<32x256xbf16>
    %cst_30 = arith.constant dense<0.000000e+00> : vector<32x256xf32>
    %60 = tpu.matmul %58, %59, %cst_30 {dimension_numbers = #tpu.dot_dimension_numbers<[1], [0], [0], [1], [0, 0, 1, 1], [], []>} : vector<32x32xbf16>, vector<32x256xbf16>, vector<32x256xf32> -> vector<32x256xf32>
    %61 = arith.addf %52, %60 : vector<32x256xf32>
    %c1_i32 = arith.constant 1 : i32
    %62 = tpu.dynamic_rotate %35 by %c1_i32 dim 1 : vector<32x256xf32>, i32 -> vector<32x256xf32>
    %63 = vector.extract_strided_slice %0 {offsets = [3, 0], sizes = [1, 256], strides = [1, 1]} : vector<9x256xf32> to vector<1x256xf32>
    %64 = vector.broadcast %63 : vector<1x256xf32> to vector<32x256xf32>
    %65 = arith.mulf %62, %64 : vector<32x256xf32>
    %c3 = arith.constant 3 : index
    %c0_31 = arith.constant 0 : index
    %c0_32 = arith.constant 0 : index
    %66 = vector.load %arg7[%c3, %c0_31, %c0_32] : memref<9x32x32xbf16, #tpu.memory_space<vmem>>, vector<1x32x32xbf16>
    %67 = vector.shape_cast %66 : vector<1x32x32xbf16> to vector<32x32xbf16>
    %68 = arith.truncf %65 : vector<32x256xf32> to vector<32x256xbf16>
    %cst_33 = arith.constant dense<0.000000e+00> : vector<32x256xf32>
    %69 = tpu.matmul %67, %68, %cst_33 {dimension_numbers = #tpu.dot_dimension_numbers<[1], [0], [0], [1], [0, 0, 1, 1], [], []>} : vector<32x32xbf16>, vector<32x256xbf16>, vector<32x256xf32> -> vector<32x256xf32>
    %70 = arith.addf %61, %69 : vector<32x256xf32>
    %c4 = arith.constant 4 : index
    %c0_34 = arith.constant 0 : index
    %c0_35 = arith.constant 0 : index
    %71 = vector.load %arg7[%c4, %c0_34, %c0_35] : memref<9x32x32xbf16, #tpu.memory_space<vmem>>, vector<1x32x32xbf16>
    %72 = vector.shape_cast %71 : vector<1x32x32xbf16> to vector<32x32xbf16>
    %73 = arith.truncf %35 : vector<32x256xf32> to vector<32x256xbf16>
    %cst_36 = arith.constant dense<0.000000e+00> : vector<32x256xf32>
    %74 = tpu.matmul %72, %73, %cst_36 {dimension_numbers = #tpu.dot_dimension_numbers<[1], [0], [0], [1], [0, 0, 1, 1], [], []>} : vector<32x32xbf16>, vector<32x256xbf16>, vector<32x256xf32> -> vector<32x256xf32>
    %75 = arith.addf %70, %74 : vector<32x256xf32>
    %c255_i32 = arith.constant 255 : i32
    %76 = tpu.dynamic_rotate %35 by %c255_i32 dim 1 : vector<32x256xf32>, i32 -> vector<32x256xf32>
    %77 = vector.extract_strided_slice %0 {offsets = [5, 0], sizes = [1, 256], strides = [1, 1]} : vector<9x256xf32> to vector<1x256xf32>
    %78 = vector.broadcast %77 : vector<1x256xf32> to vector<32x256xf32>
    %79 = arith.mulf %76, %78 : vector<32x256xf32>
    %c5 = arith.constant 5 : index
    %c0_37 = arith.constant 0 : index
    %c0_38 = arith.constant 0 : index
    %80 = vector.load %arg7[%c5, %c0_37, %c0_38] : memref<9x32x32xbf16, #tpu.memory_space<vmem>>, vector<1x32x32xbf16>
    %81 = vector.shape_cast %80 : vector<1x32x32xbf16> to vector<32x32xbf16>
    %82 = arith.truncf %79 : vector<32x256xf32> to vector<32x256xbf16>
    %cst_39 = arith.constant dense<0.000000e+00> : vector<32x256xf32>
    %83 = tpu.matmul %81, %82, %cst_39 {dimension_numbers = #tpu.dot_dimension_numbers<[1], [0], [0], [1], [0, 0, 1, 1], [], []>} : vector<32x32xbf16>, vector<32x256xbf16>, vector<32x256xf32> -> vector<32x256xf32>
    %84 = arith.addf %75, %83 : vector<32x256xf32>
    %c241_i32 = arith.constant 241 : i32
    %85 = tpu.dynamic_rotate %35 by %c241_i32 dim 1 : vector<32x256xf32>, i32 -> vector<32x256xf32>
    %86 = vector.extract_strided_slice %0 {offsets = [6, 0], sizes = [1, 256], strides = [1, 1]} : vector<9x256xf32> to vector<1x256xf32>
    %87 = vector.broadcast %86 : vector<1x256xf32> to vector<32x256xf32>
    %88 = arith.mulf %85, %87 : vector<32x256xf32>
    %c6 = arith.constant 6 : index
    %c0_40 = arith.constant 0 : index
    %c0_41 = arith.constant 0 : index
    %89 = vector.load %arg7[%c6, %c0_40, %c0_41] : memref<9x32x32xbf16, #tpu.memory_space<vmem>>, vector<1x32x32xbf16>
    %90 = vector.shape_cast %89 : vector<1x32x32xbf16> to vector<32x32xbf16>
    %91 = arith.truncf %88 : vector<32x256xf32> to vector<32x256xbf16>
    %cst_42 = arith.constant dense<0.000000e+00> : vector<32x256xf32>
    %92 = tpu.matmul %90, %91, %cst_42 {dimension_numbers = #tpu.dot_dimension_numbers<[1], [0], [0], [1], [0, 0, 1, 1], [], []>} : vector<32x32xbf16>, vector<32x256xbf16>, vector<32x256xf32> -> vector<32x256xf32>
    %93 = arith.addf %84, %92 : vector<32x256xf32>
    %c240_i32 = arith.constant 240 : i32
    %94 = tpu.dynamic_rotate %35 by %c240_i32 dim 1 : vector<32x256xf32>, i32 -> vector<32x256xf32>
    %95 = vector.extract_strided_slice %0 {offsets = [7, 0], sizes = [1, 256], strides = [1, 1]} : vector<9x256xf32> to vector<1x256xf32>
    %96 = vector.broadcast %95 : vector<1x256xf32> to vector<32x256xf32>
    %97 = arith.mulf %94, %96 : vector<32x256xf32>
    %c7 = arith.constant 7 : index
    %c0_43 = arith.constant 0 : index
    %c0_44 = arith.constant 0 : index
    %98 = vector.load %arg7[%c7, %c0_43, %c0_44] : memref<9x32x32xbf16, #tpu.memory_space<vmem>>, vector<1x32x32xbf16>
    %99 = vector.shape_cast %98 : vector<1x32x32xbf16> to vector<32x32xbf16>
    %100 = arith.truncf %97 : vector<32x256xf32> to vector<32x256xbf16>
    %cst_45 = arith.constant dense<0.000000e+00> : vector<32x256xf32>
    %101 = tpu.matmul %99, %100, %cst_45 {dimension_numbers = #tpu.dot_dimension_numbers<[1], [0], [0], [1], [0, 0, 1, 1], [], []>} : vector<32x32xbf16>, vector<32x256xbf16>, vector<32x256xf32> -> vector<32x256xf32>
    %102 = arith.addf %93, %101 : vector<32x256xf32>
    %c239_i32 = arith.constant 239 : i32
    %103 = tpu.dynamic_rotate %35 by %c239_i32 dim 1 : vector<32x256xf32>, i32 -> vector<32x256xf32>
    %104 = vector.extract_strided_slice %0 {offsets = [8, 0], sizes = [1, 256], strides = [1, 1]} : vector<9x256xf32> to vector<1x256xf32>
    %105 = vector.broadcast %104 : vector<1x256xf32> to vector<32x256xf32>
    %106 = arith.mulf %103, %105 : vector<32x256xf32>
    %c8 = arith.constant 8 : index
    %c0_46 = arith.constant 0 : index
    %c0_47 = arith.constant 0 : index
    %107 = vector.load %arg7[%c8, %c0_46, %c0_47] : memref<9x32x32xbf16, #tpu.memory_space<vmem>>, vector<1x32x32xbf16>
    %108 = vector.shape_cast %107 : vector<1x32x32xbf16> to vector<32x32xbf16>
    %109 = arith.truncf %106 : vector<32x256xf32> to vector<32x256xbf16>
    %cst_48 = arith.constant dense<0.000000e+00> : vector<32x256xf32>
    %110 = tpu.matmul %108, %109, %cst_48 {dimension_numbers = #tpu.dot_dimension_numbers<[1], [0], [0], [1], [0, 0, 1, 1], [], []>} : vector<32x32xbf16>, vector<32x256xbf16>, vector<32x256xf32> -> vector<32x256xf32>
    %111 = arith.addf %102, %110 : vector<32x256xf32>
    %c0_49 = arith.constant 0 : index
    %c0_50 = arith.constant 0 : index
    %112 = vector.load %arg8[%c0_49, %c0_50] : memref<32x1xf32, #tpu.memory_space<vmem>>, vector<32x1xf32>
    %113 = vector.broadcast %112 : vector<32x1xf32> to vector<32x256xf32>
    %114 = arith.addf %111, %113 : vector<32x256xf32>
    %c0_51 = arith.constant 0 : index
    %c0_52 = arith.constant 0 : index
    %c0_53 = arith.constant 0 : index
    %115 = vector.load %arg2[%c0_51, %c0_52, %c0_53] : memref<1x32x1xf32, #tpu.memory_space<vmem>>, vector<1x32x1xf32>
    %116 = vector.shape_cast %115 : vector<1x32x1xf32> to vector<32x1xf32>
    %117 = vector.broadcast %116 : vector<32x1xf32> to vector<32x256xf32>
    %118 = arith.addf %114, %117 : vector<32x256xf32>
    %cst_54 = arith.constant dense<0.000000e+00> : vector<32xf32>
    %119 = vector.multi_reduction <add>, %118, %cst_54 [1] : vector<32x256xf32> to vector<32xf32>
    %120 = vector.shape_cast %119 : vector<32xf32> to vector<32x1xf32>
    %cst_55 = arith.constant 2.560000e+02 : f32
    %121 = vector.broadcast %cst_55 : f32 to vector<32x1xf32>
    %122 = arith.divf %120, %121 : vector<32x1xf32>
    %c0_56 = arith.constant 0 : index
    %c0_57 = arith.constant 0 : index
    %123 = vector.load %arg9[%c0_56, %c0_57] : memref<32x32xf32, #tpu.memory_space<vmem>>, vector<32x32xf32>
    %cst_58 = arith.constant dense<0.000000e+00> : vector<32x1xf32>
    %124 = tpu.matmul %123, %122, %cst_58 {dimension_numbers = #tpu.dot_dimension_numbers<[1], [0], [0], [1], [0, 0, 1, 1], [], []>} : vector<32x32xf32>, vector<32x1xf32>, vector<32x1xf32> -> vector<32x1xf32>
    %125 = vector.broadcast %124 : vector<32x1xf32> to vector<32x256xf32>
    %126 = arith.subf %118, %125 : vector<32x256xf32>
    %127 = arith.mulf %126, %126 : vector<32x256xf32>
    %cst_59 = arith.constant dense<0.000000e+00> : vector<32xf32>
    %128 = vector.multi_reduction <add>, %127, %cst_59 [1] : vector<32x256xf32> to vector<32xf32>
    %129 = vector.shape_cast %128 : vector<32xf32> to vector<32x1xf32>
    %cst_60 = arith.constant 2.560000e+02 : f32
    %130 = vector.broadcast %cst_60 : f32 to vector<32x1xf32>
    %131 = arith.divf %129, %130 : vector<32x1xf32>
    %c0_61 = arith.constant 0 : index
    %c0_62 = arith.constant 0 : index
    %132 = vector.load %arg9[%c0_61, %c0_62] : memref<32x32xf32, #tpu.memory_space<vmem>>, vector<32x32xf32>
    %cst_63 = arith.constant dense<0.000000e+00> : vector<32x1xf32>
    %133 = tpu.matmul %132, %131, %cst_63 {dimension_numbers = #tpu.dot_dimension_numbers<[1], [0], [0], [1], [0, 0, 1, 1], [], []>} : vector<32x32xf32>, vector<32x1xf32>, vector<32x1xf32> -> vector<32x1xf32>
    %cst_64 = arith.constant 9.99999974E-6 : f32
    %134 = vector.broadcast %cst_64 : f32 to vector<32x1xf32>
    %135 = arith.addf %133, %134 : vector<32x1xf32>
    %136 = math.rsqrt %135 : vector<32x1xf32>
    %c0_65 = arith.constant 0 : index
    %c0_66 = arith.constant 0 : index
    %137 = vector.load %arg10[%c0_65, %c0_66] : memref<32x1xf32, #tpu.memory_space<vmem>>, vector<32x1xf32>
    %138 = arith.mulf %136, %137 : vector<32x1xf32>
    %139 = vector.broadcast %138 : vector<32x1xf32> to vector<32x256xf32>
    %140 = arith.mulf %126, %139 : vector<32x256xf32>
    %c0_67 = arith.constant 0 : index
    %c0_68 = arith.constant 0 : index
    %141 = vector.load %arg11[%c0_67, %c0_68] : memref<32x1xf32, #tpu.memory_space<vmem>>, vector<32x1xf32>
    %142 = vector.broadcast %141 : vector<32x1xf32> to vector<32x256xf32>
    %143 = arith.addf %140, %142 : vector<32x256xf32>
    %cst_69 = arith.constant 0.000000e+00 : f32
    %144 = vector.broadcast %cst_69 : f32 to vector<32x256xf32>
    %145 = arith.subf %144, %143 : vector<32x256xf32>
    %146 = math.exp %145 : vector<32x256xf32>
    %cst_70 = arith.constant 1.000000e+00 : f32
    %147 = vector.broadcast %cst_70 : f32 to vector<32x256xf32>
    %148 = arith.addf %147, %146 : vector<32x256xf32>
    %cst_71 = arith.constant 1.000000e+00 : f32
    %149 = vector.broadcast %cst_71 : f32 to vector<32x256xf32>
    %150 = arith.divf %149, %148 : vector<32x256xf32>
    %151 = arith.mulf %143, %150 : vector<32x256xf32>
    %c17_i32_72 = arith.constant 17 : i32
    %152 = tpu.dynamic_rotate %151 by %c17_i32_72 dim 1 : vector<32x256xf32>, i32 -> vector<32x256xf32>
    %153 = vector.extract_strided_slice %0 {offsets = [0, 0], sizes = [1, 256], strides = [1, 1]} : vector<9x256xf32> to vector<1x256xf32>
    %154 = vector.broadcast %153 : vector<1x256xf32> to vector<32x256xf32>
    %155 = arith.mulf %152, %154 : vector<32x256xf32>
    %c0_73 = arith.constant 0 : index
    %c0_74 = arith.constant 0 : index
    %c0_75 = arith.constant 0 : index
    %156 = vector.load %arg12[%c0_73, %c0_74, %c0_75] : memref<9x32x32xbf16, #tpu.memory_space<vmem>>, vector<1x32x32xbf16>
    %157 = vector.shape_cast %156 : vector<1x32x32xbf16> to vector<32x32xbf16>
    %158 = arith.truncf %155 : vector<32x256xf32> to vector<32x256xbf16>
    %cst_76 = arith.constant dense<0.000000e+00> : vector<32x256xf32>
    %159 = tpu.matmul %157, %158, %cst_76 {dimension_numbers = #tpu.dot_dimension_numbers<[1], [0], [0], [1], [0, 0, 1, 1], [], []>} : vector<32x32xbf16>, vector<32x256xbf16>, vector<32x256xf32> -> vector<32x256xf32>
    %c16_i32_77 = arith.constant 16 : i32
    %160 = tpu.dynamic_rotate %151 by %c16_i32_77 dim 1 : vector<32x256xf32>, i32 -> vector<32x256xf32>
    %161 = vector.extract_strided_slice %0 {offsets = [1, 0], sizes = [1, 256], strides = [1, 1]} : vector<9x256xf32> to vector<1x256xf32>
    %162 = vector.broadcast %161 : vector<1x256xf32> to vector<32x256xf32>
    %163 = arith.mulf %160, %162 : vector<32x256xf32>
    %c1_78 = arith.constant 1 : index
    %c0_79 = arith.constant 0 : index
    %c0_80 = arith.constant 0 : index
    %164 = vector.load %arg12[%c1_78, %c0_79, %c0_80] : memref<9x32x32xbf16, #tpu.memory_space<vmem>>, vector<1x32x32xbf16>
    %165 = vector.shape_cast %164 : vector<1x32x32xbf16> to vector<32x32xbf16>
    %166 = arith.truncf %163 : vector<32x256xf32> to vector<32x256xbf16>
    %cst_81 = arith.constant dense<0.000000e+00> : vector<32x256xf32>
    %167 = tpu.matmul %165, %166, %cst_81 {dimension_numbers = #tpu.dot_dimension_numbers<[1], [0], [0], [1], [0, 0, 1, 1], [], []>} : vector<32x32xbf16>, vector<32x256xbf16>, vector<32x256xf32> -> vector<32x256xf32>
    %168 = arith.addf %159, %167 : vector<32x256xf32>
    %c15_i32_82 = arith.constant 15 : i32
    %169 = tpu.dynamic_rotate %151 by %c15_i32_82 dim 1 : vector<32x256xf32>, i32 -> vector<32x256xf32>
    %170 = vector.extract_strided_slice %0 {offsets = [2, 0], sizes = [1, 256], strides = [1, 1]} : vector<9x256xf32> to vector<1x256xf32>
    %171 = vector.broadcast %170 : vector<1x256xf32> to vector<32x256xf32>
    %172 = arith.mulf %169, %171 : vector<32x256xf32>
    %c2_83 = arith.constant 2 : index
    %c0_84 = arith.constant 0 : index
    %c0_85 = arith.constant 0 : index
    %173 = vector.load %arg12[%c2_83, %c0_84, %c0_85] : memref<9x32x32xbf16, #tpu.memory_space<vmem>>, vector<1x32x32xbf16>
    %174 = vector.shape_cast %173 : vector<1x32x32xbf16> to vector<32x32xbf16>
    %175 = arith.truncf %172 : vector<32x256xf32> to vector<32x256xbf16>
    %cst_86 = arith.constant dense<0.000000e+00> : vector<32x256xf32>
    %176 = tpu.matmul %174, %175, %cst_86 {dimension_numbers = #tpu.dot_dimension_numbers<[1], [0], [0], [1], [0, 0, 1, 1], [], []>} : vector<32x32xbf16>, vector<32x256xbf16>, vector<32x256xf32> -> vector<32x256xf32>
    %177 = arith.addf %168, %176 : vector<32x256xf32>
    %c1_i32_87 = arith.constant 1 : i32
    %178 = tpu.dynamic_rotate %151 by %c1_i32_87 dim 1 : vector<32x256xf32>, i32 -> vector<32x256xf32>
    %179 = vector.extract_strided_slice %0 {offsets = [3, 0], sizes = [1, 256], strides = [1, 1]} : vector<9x256xf32> to vector<1x256xf32>
    %180 = vector.broadcast %179 : vector<1x256xf32> to vector<32x256xf32>
    %181 = arith.mulf %178, %180 : vector<32x256xf32>
    %c3_88 = arith.constant 3 : index
    %c0_89 = arith.constant 0 : index
    %c0_90 = arith.constant 0 : index
    %182 = vector.load %arg12[%c3_88, %c0_89, %c0_90] : memref<9x32x32xbf16, #tpu.memory_space<vmem>>, vector<1x32x32xbf16>
    %183 = vector.shape_cast %182 : vector<1x32x32xbf16> to vector<32x32xbf16>
    %184 = arith.truncf %181 : vector<32x256xf32> to vector<32x256xbf16>
    %cst_91 = arith.constant dense<0.000000e+00> : vector<32x256xf32>
    %185 = tpu.matmul %183, %184, %cst_91 {dimension_numbers = #tpu.dot_dimension_numbers<[1], [0], [0], [1], [0, 0, 1, 1], [], []>} : vector<32x32xbf16>, vector<32x256xbf16>, vector<32x256xf32> -> vector<32x256xf32>
    %186 = arith.addf %177, %185 : vector<32x256xf32>
    %c4_92 = arith.constant 4 : index
    %c0_93 = arith.constant 0 : index
    %c0_94 = arith.constant 0 : index
    %187 = vector.load %arg12[%c4_92, %c0_93, %c0_94] : memref<9x32x32xbf16, #tpu.memory_space<vmem>>, vector<1x32x32xbf16>
    %188 = vector.shape_cast %187 : vector<1x32x32xbf16> to vector<32x32xbf16>
    %189 = arith.truncf %151 : vector<32x256xf32> to vector<32x256xbf16>
    %cst_95 = arith.constant dense<0.000000e+00> : vector<32x256xf32>
    %190 = tpu.matmul %188, %189, %cst_95 {dimension_numbers = #tpu.dot_dimension_numbers<[1], [0], [0], [1], [0, 0, 1, 1], [], []>} : vector<32x32xbf16>, vector<32x256xbf16>, vector<32x256xf32> -> vector<32x256xf32>
    %191 = arith.addf %186, %190 : vector<32x256xf32>
    %c255_i32_96 = arith.constant 255 : i32
    %192 = tpu.dynamic_rotate %151 by %c255_i32_96 dim 1 : vector<32x256xf32>, i32 -> vector<32x256xf32>
    %193 = vector.extract_strided_slice %0 {offsets = [5, 0], sizes = [1, 256], strides = [1, 1]} : vector<9x256xf32> to vector<1x256xf32>
    %194 = vector.broadcast %193 : vector<1x256xf32> to vector<32x256xf32>
    %195 = arith.mulf %192, %194 : vector<32x256xf32>
    %c5_97 = arith.constant 5 : index
    %c0_98 = arith.constant 0 : index
    %c0_99 = arith.constant 0 : index
    %196 = vector.load %arg12[%c5_97, %c0_98, %c0_99] : memref<9x32x32xbf16, #tpu.memory_space<vmem>>, vector<1x32x32xbf16>
    %197 = vector.shape_cast %196 : vector<1x32x32xbf16> to vector<32x32xbf16>
    %198 = arith.truncf %195 : vector<32x256xf32> to vector<32x256xbf16>
    %cst_100 = arith.constant dense<0.000000e+00> : vector<32x256xf32>
    %199 = tpu.matmul %197, %198, %cst_100 {dimension_numbers = #tpu.dot_dimension_numbers<[1], [0], [0], [1], [0, 0, 1, 1], [], []>} : vector<32x32xbf16>, vector<32x256xbf16>, vector<32x256xf32> -> vector<32x256xf32>
    %200 = arith.addf %191, %199 : vector<32x256xf32>
    %c241_i32_101 = arith.constant 241 : i32
    %201 = tpu.dynamic_rotate %151 by %c241_i32_101 dim 1 : vector<32x256xf32>, i32 -> vector<32x256xf32>
    %202 = vector.extract_strided_slice %0 {offsets = [6, 0], sizes = [1, 256], strides = [1, 1]} : vector<9x256xf32> to vector<1x256xf32>
    %203 = vector.broadcast %202 : vector<1x256xf32> to vector<32x256xf32>
    %204 = arith.mulf %201, %203 : vector<32x256xf32>
    %c6_102 = arith.constant 6 : index
    %c0_103 = arith.constant 0 : index
    %c0_104 = arith.constant 0 : index
    %205 = vector.load %arg12[%c6_102, %c0_103, %c0_104] : memref<9x32x32xbf16, #tpu.memory_space<vmem>>, vector<1x32x32xbf16>
    %206 = vector.shape_cast %205 : vector<1x32x32xbf16> to vector<32x32xbf16>
    %207 = arith.truncf %204 : vector<32x256xf32> to vector<32x256xbf16>
    %cst_105 = arith.constant dense<0.000000e+00> : vector<32x256xf32>
    %208 = tpu.matmul %206, %207, %cst_105 {dimension_numbers = #tpu.dot_dimension_numbers<[1], [0], [0], [1], [0, 0, 1, 1], [], []>} : vector<32x32xbf16>, vector<32x256xbf16>, vector<32x256xf32> -> vector<32x256xf32>
    %209 = arith.addf %200, %208 : vector<32x256xf32>
    %c240_i32_106 = arith.constant 240 : i32
    %210 = tpu.dynamic_rotate %151 by %c240_i32_106 dim 1 : vector<32x256xf32>, i32 -> vector<32x256xf32>
    %211 = vector.extract_strided_slice %0 {offsets = [7, 0], sizes = [1, 256], strides = [1, 1]} : vector<9x256xf32> to vector<1x256xf32>
    %212 = vector.broadcast %211 : vector<1x256xf32> to vector<32x256xf32>
    %213 = arith.mulf %210, %212 : vector<32x256xf32>
    %c7_107 = arith.constant 7 : index
    %c0_108 = arith.constant 0 : index
    %c0_109 = arith.constant 0 : index
    %214 = vector.load %arg12[%c7_107, %c0_108, %c0_109] : memref<9x32x32xbf16, #tpu.memory_space<vmem>>, vector<1x32x32xbf16>
    %215 = vector.shape_cast %214 : vector<1x32x32xbf16> to vector<32x32xbf16>
    %216 = arith.truncf %213 : vector<32x256xf32> to vector<32x256xbf16>
    %cst_110 = arith.constant dense<0.000000e+00> : vector<32x256xf32>
    %217 = tpu.matmul %215, %216, %cst_110 {dimension_numbers = #tpu.dot_dimension_numbers<[1], [0], [0], [1], [0, 0, 1, 1], [], []>} : vector<32x32xbf16>, vector<32x256xbf16>, vector<32x256xf32> -> vector<32x256xf32>
    %218 = arith.addf %209, %217 : vector<32x256xf32>
    %c239_i32_111 = arith.constant 239 : i32
    %219 = tpu.dynamic_rotate %151 by %c239_i32_111 dim 1 : vector<32x256xf32>, i32 -> vector<32x256xf32>
    %220 = vector.extract_strided_slice %0 {offsets = [8, 0], sizes = [1, 256], strides = [1, 1]} : vector<9x256xf32> to vector<1x256xf32>
    %221 = vector.broadcast %220 : vector<1x256xf32> to vector<32x256xf32>
    %222 = arith.mulf %219, %221 : vector<32x256xf32>
    %c8_112 = arith.constant 8 : index
    %c0_113 = arith.constant 0 : index
    %c0_114 = arith.constant 0 : index
    %223 = vector.load %arg12[%c8_112, %c0_113, %c0_114] : memref<9x32x32xbf16, #tpu.memory_space<vmem>>, vector<1x32x32xbf16>
    %224 = vector.shape_cast %223 : vector<1x32x32xbf16> to vector<32x32xbf16>
    %225 = arith.truncf %222 : vector<32x256xf32> to vector<32x256xbf16>
    %cst_115 = arith.constant dense<0.000000e+00> : vector<32x256xf32>
    %226 = tpu.matmul %224, %225, %cst_115 {dimension_numbers = #tpu.dot_dimension_numbers<[1], [0], [0], [1], [0, 0, 1, 1], [], []>} : vector<32x32xbf16>, vector<32x256xbf16>, vector<32x256xf32> -> vector<32x256xf32>
    %227 = arith.addf %218, %226 : vector<32x256xf32>
    %c0_116 = arith.constant 0 : index
    %c0_117 = arith.constant 0 : index
    %228 = vector.load %arg13[%c0_116, %c0_117] : memref<32x1xf32, #tpu.memory_space<vmem>>, vector<32x1xf32>
    %229 = vector.broadcast %228 : vector<32x1xf32> to vector<32x256xf32>
    %230 = arith.addf %227, %229 : vector<32x256xf32>
    %c0_118 = arith.constant 0 : index
    %c0_119 = arith.constant 0 : index
    %c0_120 = arith.constant 0 : index
    %231 = vector.load %arg1[%c0_118, %c0_119, %c0_120] : memref<1x32x256xf32, #tpu.memory_space<vmem>>, vector<1x32x256xf32>
    %232 = vector.shape_cast %231 : vector<1x32x256xf32> to vector<32x256xf32>
    %233 = arith.addf %232, %230 : vector<32x256xf32>
    %cst_121 = arith.constant 0.707106769 : f32
    %234 = vector.broadcast %cst_121 : f32 to vector<32x256xf32>
    %235 = arith.mulf %233, %234 : vector<32x256xf32>
    %c0_122 = arith.constant 0 : index
    %c0_123 = arith.constant 0 : index
    %c0_124 = arith.constant 0 : index
    %236 = vector.load %arg14[%c0_122, %c0_123, %c0_124] : memref<1x32x256xf32, #tpu.memory_space<vmem>>, vector<1x32x256xf32>
    %237 = vector.shape_cast %236 : vector<1x32x256xf32> to vector<32x256xf32>
    %238 = vector.shape_cast %235 : vector<32x256xf32> to vector<1x32x256xf32>
    tpu.vector_store %arg14[%c0_122, %c0_123, %c0_124], %238 {strides = array<i32>} : memref<1x32x256xf32, #tpu.memory_space<vmem>>, vector<1x32x256xf32>,
    return
  }
  func.func @transform_0(%arg0: i32) -> (i32, i32, i32) {
    %c0_i32 = arith.constant 0 : i32
    %c0_i32_0 = arith.constant 0 : i32
    %c0_i32_1 = arith.constant 0 : i32
    return %arg0, %c0_i32, %c0_i32_0 : i32, i32, i32
  }
  func.func @transform_1(%arg0: i32) -> (i32, i32, i32) {
    %c0_i32 = arith.constant 0 : i32
    %c0_i32_0 = arith.constant 0 : i32
    %c0_i32_1 = arith.constant 0 : i32
    return %arg0, %c0_i32, %c0_i32_0 : i32, i32, i32
  }
  func.func @transform_2(%arg0: i32) -> (i32, i32) {
    %c0_i32 = arith.constant 0 : i32
    %c0_i32_0 = arith.constant 0 : i32
    %c0_i32_1 = arith.constant 0 : i32
    return %c0_i32, %c0_i32_0 : i32, i32
  }
  func.func @transform_3(%arg0: i32) -> (i32, i32) {
    %c0_i32 = arith.constant 0 : i32
    %c0_i32_0 = arith.constant 0 : i32
    %c0_i32_1 = arith.constant 0 : i32
    return %c0_i32, %c0_i32_0 : i32, i32
  }
  func.func @transform_4(%arg0: i32) -> (i32, i32) {
    %c0_i32 = arith.constant 0 : i32
    %c0_i32_0 = arith.constant 0 : i32
    %c0_i32_1 = arith.constant 0 : i32
    return %c0_i32, %c0_i32_0 : i32, i32
  }
  func.func @transform_5(%arg0: i32) -> (i32, i32) {
    %c0_i32 = arith.constant 0 : i32
    %c0_i32_0 = arith.constant 0 : i32
    %c0_i32_1 = arith.constant 0 : i32
    return %c0_i32, %c0_i32_0 : i32, i32
  }
  func.func @transform_6(%arg0: i32) -> (i32, i32, i32) {
    %c0_i32 = arith.constant 0 : i32
    %c0_i32_0 = arith.constant 0 : i32
    %c0_i32_1 = arith.constant 0 : i32
    %c0_i32_2 = arith.constant 0 : i32
    return %c0_i32, %c0_i32_0, %c0_i32_1 : i32, i32, i32
  }
  func.func @transform_7(%arg0: i32) -> (i32, i32) {
    %c0_i32 = arith.constant 0 : i32
    %c0_i32_0 = arith.constant 0 : i32
    %c0_i32_1 = arith.constant 0 : i32
    return %c0_i32, %c0_i32_0 : i32, i32
  }
  func.func @transform_8(%arg0: i32) -> (i32, i32) {
    %c0_i32 = arith.constant 0 : i32
    %c0_i32_0 = arith.constant 0 : i32
    %c0_i32_1 = arith.constant 0 : i32
    return %c0_i32, %c0_i32_0 : i32, i32
  }
  func.func @transform_9(%arg0: i32) -> (i32, i32) {
    %c0_i32 = arith.constant 0 : i32
    %c0_i32_0 = arith.constant 0 : i32
    %c0_i32_1 = arith.constant 0 : i32
    return %c0_i32, %c0_i32_0 : i32, i32
  }
  func.func @transform_10(%arg0: i32) -> (i32, i32) {
    %c0_i32 = arith.constant 0 : i32
    %c0_i32_0 = arith.constant 0 : i32
    %c0_i32_1 = arith.constant 0 : i32
    return %c0_i32, %c0_i32_0 : i32, i32
  }
  func.func @transform_11(%arg0: i32) -> (i32, i32, i32) {
    %c0_i32 = arith.constant 0 : i32
    %c0_i32_0 = arith.constant 0 : i32
    %c0_i32_1 = arith.constant 0 : i32
    %c0_i32_2 = arith.constant 0 : i32
    return %c0_i32, %c0_i32_0, %c0_i32_1 : i32, i32, i32
  }
  func.func @transform_12(%arg0: i32) -> (i32, i32) {
    %c0_i32 = arith.constant 0 : i32
    %c0_i32_0 = arith.constant 0 : i32
    %c0_i32_1 = arith.constant 0 : i32
    return %c0_i32, %c0_i32_0 : i32, i32
  }
  func.func @transform_13(%arg0: i32) -> (i32, i32, i32) {
    %c0_i32 = arith.constant 0 : i32
    %c0_i32_0 = arith.constant 0 : i32
    %c0_i32_1 = arith.constant 0 : i32
    return %arg0, %c0_i32, %c0_i32_0 : i32, i32, i32
  }
}

</mosaic_0001>

<bundles_post_ra>
// kernel: tpu_custom_call.1
= control target key start
LH: loop header
LB: loop body
LE: loop exit
PB: predicated region body
PF: predicated region fallthrough
CT: control target
= control target key end

     0   :  { %s5800_s0 = inlined_call_operand.hbm [shape: f32[2,32,256], index: 0, kind: input, shape index: {}]   ;;  %s5801_s1 = inlined_call_operand.vmem [shape: f32[2,32,1], index: 1, kind: input, shape index: {}]   ;;  %s5802_s2 = inlined_call_operand.vmem [shape: f32[9,256], index: 2, kind: input, shape index: {}]   ;;  %s5803_s3 = inlined_call_operand.vmem [shape: f32[32,32], index: 3, kind: input, shape index: {}]   ;;  %s5804_s4 = inlined_call_operand.vmem [shape: f32[32,1], index: 4, kind: input, shape index: {}]   ;;  %s5805_s5 = inlined_call_operand.vmem [shape: f32[32,1], index: 5, kind: input, shape index: {}]   ;;  %s5806_s6 = inlined_call_operand.hbm [shape: bf16[9,32,32], index: 6, kind: input, shape index: {}]   ;;  %s5807_s7 = inlined_call_operand.vmem [shape: f32[32,1], index: 7, kind: input, shape index: {}]   ;;  %s5808_s8 = inlined_call_operand.vmem [shape: f32[32,32], index: 8, kind: input, shape index: {}]   ;;  %s5809_s9 = inlined_call_operand.vmem [shape: f32[32,1], index: 9, kind: input, shape index: {}]   ;;  %s5810_s10 = inlined_call_operand.vmem [shape: f32[32,1], index: 10, kind: input, shape index: {}]   ;;  %s5811_s11 = inlined_call_operand.hbm [shape: bf16[9,32,32], index: 11, kind: input, shape index: {}]   ;;  %s5812_s12 = inlined_call_operand.vmem [shape: f32[32,1], index: 12, kind: input, shape index: {}]   ;;  %s5813_s13 = inlined_call_operand.hbm [shape: f32[2,32,256], index: 13, kind: output, shape index: {}]  }
   0x1   :  { %5854 = sst [smem:[#allocation30_spill]] %s5806_s6 }
   0x2   :  { %5855 = sst [smem:[#allocation31_spill]] %s5811_s11 }
   0x3   :  { %18 = vsyncpa [#allocation3], 0 }
   0x4   :  { %20 = vsyncpa [#allocation3 + $0x1], 0 }
   0x5   :  { %21 = vsyncpa [#allocation6], 0 }
   0x6   :  { %22 = vsyncpa [#allocation4], 0 }
   0x7   :  { %24 = vsyncpa [#allocation4 + $0x1], 0  ;;  %s4096_s25 = smov 0   ;;  %s4098_s26 = smov 0  }
   0x8   :  { %s4100_s27 = smov 0   ;;  %s4102_s28 = smov 0  }
   0x9 LB: > { %5856 = sst [smem:[#allocation12_spill]] %s3995_s25  ;;  %s4117_s29 = sadd.s32 4294967295, %s4007_s28   ;;  %s4007_s28 = sphi %s4102_s28, %s5936_s28   ;;  %s4003_s27 = sphi %s4100_s27, %s5938_s27   ;;  %s3999_s26 = sphi %s4098_s26, %s5940_s26   ;;  %s3995_s25 = sphi %s4096_s25, %s5939_s25  }
   0xa   : > { %5857 = sst [smem:[#allocation13_spill]] %s4003_s27  ;;  %s3377_s30 = sadd.s32 4294967294, %s4007_s28  }
   0xb   : > { %p50_p0 = scmp.ne.s32.totalorder %s3999_s26, %s3995_s25  ;;  %p51_p1 = scmp.eq.s32.totalorder %s4117_s29, 0 }
   0xc   : > { %p331_p2 = scmp.eq.s32.totalorder %s4117_s29, 1  ;;  %p337_p3 = scmp.eq.s32.totalorder %s3377_s30, 1 }
   0xd   : > { %p4126_p4 = por %p51_p1, %p50_p0  ;;  %p3378_p5 = scmp.ge.s32.totalorder %s4007_s28, 1 }
   0xe   : > { %p4131_p6 = por %p337_p3, %p50_p0  ;;  %p344_p7 = scmp.lt.s32.totalorder %s4007_s28, 3 }
   0xf   : > { %s5861_s6 = sld [smem:[#allocation30_spill]]  ;;  %s4009_s20 = smov [#allocation5]  }
  0x10   : > { %s5859_s15 = scalar_select %p4131_p6, 1, 0 }
  0x11   : > { %p4139_p8 = pnand %p3378_p5, %p344_p7  ;;  %s369_s21 = sshll.u32 %s4009_s20, 4  ;;  %s370_s21 = int_to_ptr.vmem [resolvable:$true] %s369_s21 }
  0x12   : > { %5860 = sst [smem:[#allocation14_spill]] %s5859_s15  ;;  %s4010_s30 = smov 64  }
  0x13   : > { %p3680_p9 = pneg %p4139_p8  ;;  %s5863_s11 = sld [smem:[#allocation31_spill]] }
  0x14   : > { %s4011_s16 = smov 4   ;;  %s4012_s17 = smov [#allocation7]  }
  0x15   : > { %s367_s18 = sshll.u32 %s5861_s6, 4  ;;  %p3681_p10 = pnand %p3680_p9, %p51_p1  ;;  %s368_s18 = int_to_ptr.hbm [resolvable:$true] %s367_s18 }
  0x16   : > { %s395_s20 = sshll.u32 %s4012_s17, 4  ;;  %s4152_s6 = sadd.s32 1, %s4007_s28   ;;  %s396_s20 = int_to_ptr.vmem [resolvable:$true] %s395_s20 }
  0x17   : > { %3683 = dma.hbm_to_vmem [thread:$0]  (!%p3681_p10), %s368_s18, 2304, %s370_s21, [#allocation6], %s4010_s30, %s4010_s30, %s4011_s16  }
  0x18   : > { %5864 = sst [smem:[#allocation15_spill]] %s4152_s6  ;;  %s37_s15 = sadd.s32 1, %s4003_s27 }
  0x19   : > { %s393_s24 = sshll.u32 %s5863_s11, 4  ;;  %s34_s25 = ssub.s32 %s4007_s28, %s4152_s6  ;;  %s394_s24 = int_to_ptr.hbm [resolvable:$true] %s393_s24 }
  0x1a   : > { %3686 = dma.hbm_to_vmem [thread:$0]  (!%p3681_p10), %s394_s24, 2304, %s396_s20, [#allocation6], %s4010_s30, %s4010_s30, %s4011_s16  }
  0x1b   : > { %p44_p12 = scmp.ne.s32.totalorder %s4003_s27, %s3999_s26  ;;  %p35_p13 = scmp.eq.s32.totalorder %s34_s25, 0 }
  0x1c   : > { %p45_p0 = scmp.eq.s32.totalorder %s4007_s28, 0  ;;  %p3697_p5 = scmp.lt.s32.totalorder %s4007_s28, 2 }
  0x1d   : > { %p4162_p3 = por %p331_p2, %p44_p12  ;;  %s412_s21 = sand.u32 1, %s4003_s27  }
  0x1e   : > { %s4168_s18 = scalar_select %p35_p13, %s4003_s27, %s37_s15  }
  0x1f   : > { %p46_p7 = por %p45_p0, %p44_p12  ;;  %s3382_s23 = sshll.u32 %s412_s21, 6 }
  0x20   : > { %5866 = sst [smem:[#allocation16_spill]] %s4168_s18  ;;  %s3629_s24 = sshll.u32 %s4007_s28, 6 }
  0x21   : > { %s421_s17 = scalar_lea.hbm %s5800_s0, %s3629_s24  ;;  %s416_s20 = scalar_lea.vmem [#allocation2], %s3382_s23 }
  0x22   : > { %s424_s11 = sshll.u32 %s416_s20, 4  ;;  %s422_s25 = sshll.u32 %s421_s17, 4  ;;  %s425_s11 = int_to_ptr.vmem [resolvable:$true] %s424_s11  ;;  %s423_s25 = int_to_ptr.hbm [resolvable:$true] %s422_s25 }
  0x23   : > { %p4175_p2 = pnand %p3697_p5, %p46_p7  ;;  %s413_s15 = scalar_lea.sflag [#allocation3], %s412_s21 }
  0x24   : > { %s3907_s18 = sshra.s32 %s423_s25, 4  ;;  %s3914_s30 = scalar_lea.hbm %s5800_s0, 128  ;;  %s3908_s18 = int_to_ptr.hbm [resolvable:$true] %s3907_s18 }
  0x25   : > { %s3909_s27 = scalar_lea.hbm %s3908_s18, 64  ;;  %p3911_p10 = pneg %p4175_p2 }
  0x26   : > { %p3910_p9 = scmp.ne.s32.totalorder %s3908_s18, %s3909_s27  ;;  %p3915_p0 = scmp.lt.s32.totalorder %s3908_s18, %s5800_s0 }
  0x27   : > { %p3916_p5 = scmp.lt.s32.totalorder %s3914_s30, %s3909_s27 }
  0x28   : > { %p3912_p12 = pnand %p3911_p10, %p3910_p9 }
  0x29   : > { %p3917_p7 = por %p3916_p5, %p3915_p0 }
  0x2a   : > { %p3913_p13 = pneg %p3912_p12 }
  0x2c   : > { %p3918_p11 = pnand %p3917_p7, %p3913_p13 }
  0x2e   : > { %3921 = shalt.err (!%p3918_p11)
}
  0x2f   : > { %s4013_s21 = smov 256   ;;  %s4014_s20 = smov 16  }
  0x30   : > { %3690 = dma.hbm_to_vmem [thread:$0]  (!%p4175_p2), %s423_s25, 1024, %s425_s11, %s413_s15, %s4013_s21, %s4013_s21, %s4014_s20  }
  0x31   : > { %444 = sbr.rel (%p4139_p8) target bundleno = 2661 (0xa65), region = 72 }
  0x36   : > { %s4192_s24 = sand.u32 1, %s3999_s26  }
  0x37   : > { %s5819_s18 = sshll.u32 %s4192_s24, 6  ;;  %s447_s27 = scalar_lea.sflag [#allocation3], %s4192_s24 }
  0x38   : > { %s4198_s23 = scalar_lea.vmem [#allocation2], %s5819_s18 }
  0x39   : > { %3982 = dma.done.wait (%p4126_p4), %s447_s27, 1024  }
  0x3a   : > { %3984 = vsyncadd (%p4126_p4), %s447_s27, 4294966272 }
  0x3b   : > { %3986 = dma.done.wait (%p51_p1), [#allocation6], 4608  }
  0x3c   : > { %3988 = vsyncadd (%p51_p1), [#allocation6], 4294962688  ;;  %v525_v0 = vld [vmem:[%s4198_s23 + $0x30] sm:$0xff]  ;;  %v526_v1 = vld [vmem:[%s4198_s23 + $0x38] sm:$0xff]  ;;  %v4015_v12 = vmov 256.0   ;;  %v4016_v25 = vmov 0  }
  0x3d   : > { %v4211_v2 = vld [vmem:[%s4198_s23 + $0x10] sm:$0xff]  ;;  %v536_v3 = vadd.f32 %v526_v1, %v525_v0  ;;  %v4214_v4 = vld [vmem:[%s4198_s23 + $0x18] sm:$0xff]  ;;  %v4219_v6 = vld [vmem:[%s4198_s23 + $0x20] sm:$0xff]  ;;  %3755 = vrcp.f32 %v4015_v12  ;;  %3752 = vset.pattern.permute.xlu1 %v4016_v25  ;;  %3751 = vset.pattern.permute.xlu0 %v4016_v25  ;;  %vm554_vm1 = vcmask 261120   ;;  %s4017_s6 = smov 16   ;;  %s4018_s11 = smov 15  }
  0x3e   : > { %v530_v5 = vadd.f32 %v4214_v4, %v4211_v2  ;;  %v4222_v7 = vld [vmem:[%s4198_s23 + $0x28] sm:$0xff]  ;;  %v519_v8 = vld [vmem:[%s4198_s23] sm:$0xff]  ;;  %3750 = vset.pattern.permute.xlu2 %v4016_v25  ;;  %v552_v30 = vld [vmem:[%s5803_s3 + $0x10] sm:$0xff]  ;;  %s4019_s14 = smov 17   ;;  %s4020_s19 = smov 1  }
  0x3f   : > { %537 = vadd.xlane.f32.xlu0 %v536_v3  ;;  %v520_v9 = vld [vmem:[%s4198_s23 + $0x8] sm:$0xff]  ;;  %v533_v10 = vadd.f32 %v4222_v7, %v4219_v6  ;;  %v550_v28 = vld [vmem:[%s5803_s3] sm:$0xff]  ;;  %v553_v31 = vld [vmem:[%s5803_s3 + $0x18] sm:$0xff]  ;;  %s5820_s25 = smov 113   ;;  %s5822_s15 = smov 127  }
  0x40   : > { %531 = vadd.xlane.f32.xlu1 %v530_v5  ;;  %v527_v11 = vadd.f32 %v520_v9, %v519_v8  ;;  %v551_v29 = vld [vmem:[%s5803_s3 + $0x8] sm:$0xff]  ;;  %v755_v60 = vld [vmem:[%s5805_s5 + $0x10] sm:$0xff]  ;;  %v756_v61 = vld [vmem:[%s5805_s5 + $0x18] sm:$0xff]  ;;  %s4023_s30 = smov 111   ;;  %s4024_s16 = smov 112  }
  0x41   : > { %p509_p1 = scmp.lt.s32.totalorder %s4117_s29, 1  ;;  %s3258_s21 = scalar_lea.sflag [#allocation4], %s4192_s24 }
  0x43   : > { %v3756_v13 = vpop.eup %3755  ;;  %s510_s17 = scalar_select %p509_p1, %s4117_s29, 1 }
  0x44   : > { %v540_v14 = vmul.f32 256.0, %v3756_v13  ;;  %vm544_vm0 = vweird.f32 %v3756_v13 }
  0x45   : > { %s3630_s27 = sshll.u32 %s510_s17, 5 }
  0x46   : > { %v541_v15 = vsub.f32 1.0, %v540_v14 }
  0x47   : > { %534 = vadd.xlane.f32.xlu0 %v533_v10 }
  0x48   : > { %528 = vadd.xlane.f32.xlu1 %v527_v11  ;;  %v542_v16 = vmul.f32 %v3756_v13, %v541_v15 }
  0x4a   : > { %v543_v17 = vadd.f32 %v3756_v13, %v542_v16 }
  0x4c   : > { %v4228_v18 = vsel %vm544_vm0, %v3756_v13, %v543_v17 }
  0xb2   : > { %v538_v19 = vpop.xlane.xlu0 %537 }
  0xb3   : > { %v549_v20 = vmul.f32 %v4228_v18, %v538_v19  ;;  %v532_v21 = vpop.xlane.xlu1 %531 }
  0xb4   : > { %v547_v26 = vmul.f32 %v4228_v18, %v532_v21  ;;  %v717_v21 = vld [vmem:[%s5804_s4] sm:$0xff] }
  0xb5   : > { %579 = vmatpush.msra.mxu0 %v549_v20 }
  0xba   : > { %v535_v22 = vpop.xlane.xlu0 %534 }
  0xbb   : > { %v548_v23 = vmul.f32 %v4228_v18, %v535_v22  ;;  %v529_v24 = vpop.xlane.xlu1 %528 }
  0xbc   : > { %v546_v27 = vmul.f32 %v4228_v18, %v529_v24 }
  0xbd   : > { %580 = vmatpush.msra.mxu0 %v548_v23 }
  0xbf   : > { %581 = vmatpush.msra.mxu0 %v547_v26 }
  0xc1   : > { %582 = vmatpush.msra.mxu0 %v546_v27 }
  0xc2   : > { %3392 = vmatmul.msk.f32.vlgmr.msra.gmra.mxu0 %vm554_vm1, %v550_v28 }
  0xca   : > { %3393 = vmatmul.msk.f32.gmra.mxu0 %vm554_vm1, %v551_v29 }
  0xd2   : > { %3394 = vmatmul.msk.f32.gmra.mxu0 %vm554_vm1, %v552_v30 }
  0xda   : > { %3395 = vmatmul.msk.f32.gmra.mxu0 %vm554_vm1, %v553_v31 }
 0x13f   : > { %v584_v32 = vpop.f32.mrf.mxu0 }
 0x140   : > { %598 = vperm.xlu1 %3752, %v584_v32   ;;  %v718_v32 = vld [vmem:[%s5804_s4 + $0x8] sm:$0xff] }
 0x147   : > { %v587_v33 = vpop.f32.mrf.mxu0 }
 0x148   : > { %603 = vperm.xlu0 %3751, %v587_v33  }
 0x14f   : > { %v590_v34 = vpop.f32.mrf.mxu0 }
 0x157   : > { %v593_v35 = vpop.f32.mrf.mxu0 }
 0x158   : > { %613 = vperm.xlu2 %3750, %v593_v35  }
 0x160   : > { %608 = vperm.xlu2 %3750, %v590_v34  }
 0x1b2   : > { %v614_v36 = vpop.permute.xlu2 %613  ;;  %v599_v37 = vpop.permute.xlu1 %598 }
 0x1b3   : > { %v4250_v38 = vsub.f32 %v525_v0, %v614_v36  ;;  %v4252_v39 = vsub.f32 %v526_v1, %v614_v36  ;;  %v4258_v42 = vsub.f32 %v519_v8, %v599_v37  ;;  %v4260_v43 = vsub.f32 %v520_v9, %v599_v37 }
 0x1b5   : > { %v630_v40 = vmul.f32 %v4250_v38, %v4250_v38  ;;  %v631_v41 = vmul.f32 %v4252_v39, %v4252_v39  ;;  %v624_v47 = vmul.f32 %v4258_v42, %v4258_v42  ;;  %v625_v48 = vmul.f32 %v4260_v43, %v4260_v43 }
 0x1b7   : > { %v641_v44 = vadd.f32 %v631_v41, %v630_v40  ;;  %v632_v58 = vadd.f32 %v625_v48, %v624_v47 }
 0x1b9   : > { %642 = vadd.xlane.f32.xlu2 %v641_v44 }
 0x1ba   : > { %v604_v45 = vpop.permute.xlu0 %603  ;;  %v609_v46 = vpop.permute.xlu2 %608 }
 0x1bb   : > { %v4267_v49 = vsub.f32 %v4211_v2, %v604_v45  ;;  %v4270_v50 = vsub.f32 %v4214_v4, %v604_v45  ;;  %v4273_v51 = vsub.f32 %v4219_v6, %v609_v46  ;;  %v4276_v52 = vsub.f32 %v4222_v7, %v609_v46  ;;  %v719_v45 = vld [vmem:[%s5804_s4 + $0x10] sm:$0xff] }
 0x1bd   : > { %v626_v53 = vmul.f32 %v4267_v49, %v4267_v49  ;;  %v627_v54 = vmul.f32 %v4270_v50, %v4270_v50  ;;  %v628_v55 = vmul.f32 %v4273_v51, %v4273_v51  ;;  %v629_v56 = vmul.f32 %v4276_v52, %v4276_v52 }
 0x1bf   : > { %v635_v57 = vadd.f32 %v627_v54, %v626_v53  ;;  %v638_v59 = vadd.f32 %v629_v56, %v628_v55  ;;  %v720_v56 = vld [vmem:[%s5804_s4 + $0x18] sm:$0xff] }
 0x1c1   : > { %636 = vadd.xlane.f32.xlu0 %v635_v57  ;;  %633 = vadd.xlane.f32.xlu2 %v632_v58  ;;  %v754_v58 = vld [vmem:[%s5805_s5 + $0x8] sm:$0xff] }
 0x1c2   : > { %639 = vadd.xlane.f32.xlu1 %v638_v59 }
 0x1d9   : > { %769 = vperm.xlu2 %3750, %v755_v60   ;;  %v753_v60 = vld [vmem:[%s5805_s5] sm:$0xff] }
 0x1e1   : > { %774 = vperm.xlu2 %3750, %v756_v61  }
 0x22c   : > { %v643_v62 = vpop.xlane.xlu2 %642 }
 0x22d   : > { %v647_v63 = vmul.f32 %v643_v62, %v4228_v18 }
 0x22f   : > { %660 = vmatpush.msra.mxu1 %v647_v63 }
 0x234   : > { %v637_v0 = vpop.xlane.xlu0 %636  ;;  %v634_v3 = vpop.xlane.xlu2 %633 }
 0x235   : > { %v640_v1 = vpop.xlane.xlu1 %639  ;;  %v645_v4 = vmul.f32 %v637_v0, %v4228_v18  ;;  %v644_v5 = vmul.f32 %v634_v3, %v4228_v18 }
 0x236   : > { %v646_v2 = vmul.f32 %v640_v1, %v4228_v18 }
 0x238   : > { %661 = vmatpush.msra.mxu1 %v646_v2 }
 0x23a   : > { %662 = vmatpush.msra.mxu1 %v645_v4 }
 0x23c   : > { %663 = vmatpush.msra.mxu1 %v644_v5  ;;  %v770_v61 = vpop.permute.xlu2 %769 }
 0x23d   : > { %3396 = vmatmul.msk.f32.vlgmr.msra.gmra.mxu1 %vm554_vm1, %v550_v28 }
 0x244   : > { %v4318_v62 = vpop.permute.xlu2 %774 }
 0x245   : > { %3397 = vmatmul.msk.f32.gmra.mxu1 %vm554_vm1, %v551_v29 }
 0x24d   : > { %3398 = vmatmul.msk.f32.gmra.mxu1 %vm554_vm1, %v552_v30 }
 0x255   : > { %3399 = vmatmul.msk.f32.gmra.mxu1 %vm554_vm1, %v553_v31 }
 0x2ba   : > { %v665_v6 = vpop.f32.mrf.mxu1 }
 0x2bb   : > { %v666_v7 = vadd.f32 1e-05, %v665_v6 }
 0x2bd   : > { %3757 = vrsqrt.f32 %v666_v7  ;;  %vm683_vm3 = vweird.f32 %v666_v7 }
 0x2c2   : > { %v668_v8 = vpop.f32.mrf.mxu1 }
 0x2c3   : > { %v3758_v9 = vpop.eup %3757  ;;  %v669_v10 = vadd.f32 1e-05, %v668_v8 }
 0x2c4   : > { %v678_v11 = vmul.f32 %v3758_v9, %v666_v7  ;;  %vm684_vm2 = vweird.f32 %v3758_v9 }
 0x2c5   : > { %3759 = vrsqrt.f32 %v669_v10  ;;  %vm685_vm4 = vmor %vm683_vm3, %vm684_vm2  ;;  %vm693_vm6 = vweird.f32 %v669_v10 }
 0x2c6   : > { %v679_v12 = vmul.f32 %v3758_v9, %v678_v11 }
 0x2c8   : > { %v680_v13 = vmul.f32 0.5, %v679_v12 }
 0x2ca   : > { %v681_v14 = vsub.f32 1.5, %v680_v13  ;;  %v671_v15 = vpop.f32.mrf.mxu1 }
 0x2cb   : > { %v3760_v16 = vpop.eup %3759  ;;  %v672_v17 = vadd.f32 1e-05, %v671_v15 }
 0x2cc   : > { %v688_v19 = vmul.f32 %v3760_v16, %v669_v10  ;;  %v682_v20 = vmul.f32 %v3758_v9, %v681_v14  ;;  %vm694_vm5 = vweird.f32 %v3760_v16 }
 0x2cd   : > { %3761 = vrsqrt.f32 %v672_v17  ;;  %vm695_vm7 = vmor %vm693_vm6, %vm694_vm5  ;;  %vm703_vm9 = vweird.f32 %v672_v17 }
 0x2ce   : > { %v689_v22 = vmul.f32 %v3760_v16, %v688_v19  ;;  %v686_v23 = vsel %vm685_vm4, %v3758_v9, %v682_v20 }
 0x2cf   : > { %v721_v24 = vmul.f32 %v717_v21, %v686_v23 }
 0x2d0   : > { %v690_v25 = vmul.f32 0.5, %v689_v22 }
 0x2d1   : > { %727 = vperm.xlu0 %3751, %v721_v24  }
 0x2d2   : > { %v691_v26 = vsub.f32 1.5, %v690_v25  ;;  %v674_v27 = vpop.f32.mrf.mxu1 }
 0x2d3   : > { %v3762_v28 = vpop.eup %3761  ;;  %v675_v29 = vadd.f32 1e-05, %v674_v27 }
 0x2d4   : > { %v698_v30 = vmul.f32 %v3762_v28, %v672_v17  ;;  %v692_v31 = vmul.f32 %v3760_v16, %v691_v26  ;;  %vm704_vm8 = vweird.f32 %v3762_v28 }
 0x2d5   : > { %3763 = vrsqrt.f32 %v675_v29  ;;  %vm705_vm10 = vmor %vm703_vm9, %vm704_vm8  ;;  %vm713_vm12 = vweird.f32 %v675_v29 }
 0x2d6   : > { %v699_v33 = vmul.f32 %v3762_v28, %v698_v30  ;;  %v696_v34 = vsel %vm695_vm7, %v3760_v16, %v692_v31 }
 0x2d7   : > { %v722_v35 = vmul.f32 %v718_v32, %v696_v34 }
 0x2d8   : > { %v700_v36 = vmul.f32 0.5, %v699_v33 }
 0x2d9   : > { %732 = vperm.xlu2 %3750, %v722_v35  }
 0x2da   : > { %v701_v37 = vsub.f32 1.5, %v700_v36 }
 0x2db   : > { %v3764_v40 = vpop.eup %3763 }
 0x2dc   : > { %v708_v41 = vmul.f32 %v3764_v40, %v675_v29  ;;  %v702_v44 = vmul.f32 %v3762_v28, %v701_v37  ;;  %vm714_vm11 = vweird.f32 %v3764_v40 }
 0x2dd   : > { %vm715_vm13 = vmor %vm713_vm12, %vm714_vm11 }
 0x2de   : > { %v709_v46 = vmul.f32 %v3764_v40, %v708_v41  ;;  %v706_v47 = vsel %vm705_vm10, %v3762_v28, %v702_v44 }
 0x2df   : > { %v723_v48 = vmul.f32 %v719_v45, %v706_v47 }
 0x2e0   : > { %v710_v53 = vmul.f32 0.5, %v709_v46 }
 0x2e1   : > { %737 = vperm.xlu2 %3750, %v723_v48  }
 0x2e2   : > { %v711_v54 = vsub.f32 1.5, %v710_v53 }
 0x2e4   : > { %v712_v55 = vmul.f32 %v3764_v40, %v711_v54 }
 0x2e6   : > { %v716_v57 = vsel %vm715_vm13, %v3764_v40, %v712_v55 }
 0x2e7   : > { %v724_v59 = vmul.f32 %v720_v56, %v716_v57 }
 0x2e9   : > { %742 = vperm.xlu1 %3752, %v724_v59   ;;  %764 = vperm.xlu2 %3750, %v754_v58  }
 0x2f1   : > { %759 = vperm.xlu1 %3752, %v753_v60  }
 0x333   : > { %v733_v63 = vpop.permute.xlu2 %732 }
 0x334   : > { %v747_v7 = vmul.f32 %v733_v63, %v4267_v49  ;;  %v748_v16 = vmul.f32 %v733_v63, %v4270_v50 }
 0x33b   : > { %v738_v0 = vpop.permute.xlu2 %737 }
 0x33c   : > { %v749_v1 = vmul.f32 %v738_v0, %v4273_v51  ;;  %v750_v2 = vmul.f32 %v738_v0, %v4276_v52 }
 0x33e   : > { %v4322_v3 = vadd.f32 %v770_v61, %v749_v1  ;;  %v4324_v4 = vadd.f32 %v770_v61, %v750_v2 }
 0x340   : > { %v789_v5 = vsub.f32 0.0, %v4322_v3  ;;  %v790_v6 = vsub.f32 0.0, %v4324_v4 }
 0x342   : > { %v803_v8 = vmul.f32 1.442695, %v790_v6  ;;  %v801_v10 = vmul.f32 1.442695, %v789_v5 }
 0x343   : > { %v765_v9 = vpop.permute.xlu2 %764  ;;  %v728_v33 = vpop.permute.xlu0 %727 }
 0x344   : > { %v779_v11 = vadd.f32 %v765_v9, %v747_v7  ;;  %3765 = vpow2.f32 %v803_v8  ;;  %v4332_v49 = vadd.f32 %v765_v9, %v748_v16  ;;  %v745_v40 = vmul.f32 %v728_v33, %v4258_v42 }
 0x345   : > { %3767 = vpow2.f32 %v801_v10  ;;  %v746_v41 = vmul.f32 %v728_v33, %v4260_v43 }
 0x346   : > { %v787_v12 = vsub.f32 0.0, %v779_v11  ;;  %v788_v22 = vsub.f32 0.0, %v4332_v49 }
 0x348   : > { %v797_v51 = vmul.f32 1.442695, %v787_v12  ;;  %v799_v27 = vmul.f32 1.442695, %v788_v22 }
 0x34a   : > { %3769 = vpow2.f32 %v797_v51  ;;  %v3766_v52 = vpop.eup %3765 }
 0x34b   : > { %v814_v13 = vadd.f32 1.0, %v3766_v52  ;;  %v3768_v14 = vpop.eup %3767 }
 0x34c   : > { %v4330_v17 = vadd.f32 1.0, %v3768_v14 }
 0x34d   : > { %3771 = vrcp.f32 %v814_v13  ;;  %vm897_vm4 = vweird.f32 %v814_v13  ;;  %v903_v48 = vand.u32 2147483648, %v814_v13  ;;  %v901_v55 = vand.u32 2147483647, %v814_v13 }
 0x34e   : > { %vm882_vm8 = vweird.f32 %v4330_v17  ;;  %v888_v8 = vand.u32 2147483648, %v4330_v17  ;;  %v886_v10 = vand.u32 2147483647, %v4330_v17 }
 0x34f   : > { %v904_v61 = vor.u32 1.1754944e-38, %v903_v48  ;;  %vm902_vm6 = vcmp.eq.f32.partialorder %v901_v55, 8.507059e+37 }
 0x350   : > { %v3770_v15 = vpop.eup %3769  ;;  %v889_v52 = vor.u32 1.1754944e-38, %v888_v8  ;;  %vm887_vm10 = vcmp.eq.f32.partialorder %v886_v10, 8.507059e+37 }
 0x351   : > { %v811_v19 = vadd.f32 1.0, %v3770_v15 }
 0x353   : > { %3773 = vrcp.f32 %v811_v19  ;;  %v3772_v20 = vpop.eup %3771  ;;  %v856_v29 = vand.u32 2147483647, %v811_v19  ;;  %v858_v30 = vand.u32 2147483648, %v811_v19  ;;  %vm852_vm15 = vweird.f32 %v811_v19 }
 0x354   : > { %3775 = vrcp.f32 %v4330_v17  ;;  %v893_v21 = vmul.f32 %v3772_v20, %v814_v13  ;;  %vm898_vm0 = vweird.f32 %v3772_v20 }
 0x355   : > { %3777 = vpow2.f32 %v799_v27  ;;  %v859_v44 = vor.u32 1.1754944e-38, %v858_v30  ;;  %vm857_vm3 = vcmp.eq.f32.partialorder %v856_v29, 8.507059e+37  ;;  %vm899_vm5 = vmor %vm897_vm4, %vm898_vm0 }
 0x356   : > { %v894_v24 = vsub.f32 1.0, %v893_v21 }
 0x358   : > { %v895_v32 = vmul.f32 %v3772_v20, %v894_v24 }
 0x359   : > { %v3774_v23 = vpop.eup %3773 }
 0x35a   : > { %v848_v25 = vmul.f32 %v3774_v23, %v811_v19  ;;  %v4336_v26 = vpop.eup %3775  ;;  %vm853_vm14 = vweird.f32 %v3774_v23  ;;  %v896_v46 = vadd.f32 %v3772_v20, %v895_v32 }
 0x35b   : > { %v743_v28 = vpop.permute.xlu1 %742  ;;  %v878_v31 = vmul.f32 %v4336_v26, %v4330_v17  ;;  %vm854_vm2 = vmor %vm852_vm15, %vm853_vm14  ;;  %v3778_v56 = vpop.eup %3777  ;;  %vm883_vm7 = vweird.f32 %v4336_v26 }
 0x35c   : > { %v849_v50 = vsub.f32 1.0, %v848_v25  ;;  %v751_v35 = vmul.f32 %v743_v28, %v4250_v38  ;;  %v752_v37 = vmul.f32 %v743_v28, %v4252_v39  ;;  %v900_v59 = vsel %vm899_vm5, %v3772_v20, %v896_v46  ;;  %vm884_vm9 = vmor %vm882_vm8, %vm883_vm7 }
 0x35d   : > { %v879_v45 = vsub.f32 1.0, %v878_v31  ;;  %v4363_v0 = vadd.f32 1.0, %v3778_v56  ;;  %v905_v5 = vsel %vm902_vm6, %v904_v61, %v900_v59 }
 0x35e   : > { %v850_v34 = vmul.f32 %v3774_v23, %v849_v50  ;;  %v4345_v38 = vadd.f32 %v4318_v62, %v751_v35  ;;  %v4350_v42 = vadd.f32 %v4318_v62, %v752_v37 }
 0x35f   : > { %v880_v58 = vmul.f32 %v4336_v26, %v879_v45  ;;  %vm867_vm5 = vweird.f32 %v4363_v0  ;;  %v871_v56 = vand.u32 2147483647, %v4363_v0 }
 0x360   : > { %v851_v36 = vadd.f32 %v3774_v23, %v850_v34  ;;  %v791_v62 = vsub.f32 0.0, %v4345_v38  ;;  %v792_v1 = vsub.f32 0.0, %v4350_v42 }
 0x361   : > { %v881_v7 = vadd.f32 %v4336_v26, %v880_v58  ;;  %vm872_vm7 = vcmp.eq.f32.partialorder %v871_v56, 8.507059e+37 }
 0x362   : > { %v855_v47 = vsel %vm854_vm2, %v3774_v23, %v851_v36  ;;  %v805_v9 = vmul.f32 1.442695, %v791_v62  ;;  %v807_v12 = vmul.f32 1.442695, %v792_v1 }
 0x363   : > { %v860_v53 = vsel %vm857_vm3, %v859_v44, %v855_v47  ;;  %v760_v54 = vpop.permute.xlu1 %759  ;;  %v885_v51 = vsel %vm884_vm9, %v4336_v26, %v881_v7 }
 0x364   : > { %v4347_v39 = vmul.f32 %v860_v53, %v779_v11  ;;  %v4352_v43 = vadd.f32 %v760_v54, %v745_v40  ;;  %v4355_v57 = vadd.f32 %v760_v54, %v746_v41  ;;  %v4372_v11 = vmul.f32 %v905_v5, %v4324_v4 }
 0x365   : > { %v890_v15 = vsel %vm887_vm10, %v889_v52, %v885_v51  ;;  %v873_v53 = vand.u32 2147483648, %v4363_v0 }
 0x366   : > { %v785_v60 = vsub.f32 0.0, %v4352_v43  ;;  %992 = vrot.lane.b32.xlu2 %v4347_v39, %s4017_s6  ;;  %v786_v63 = vsub.f32 0.0, %v4355_v57  ;;  %v4381_v19 = vmul.f32 %v890_v15, %v4322_v3 }
 0x368   : > { %v793_v2 = vmul.f32 1.442695, %v785_v60  ;;  %v795_v6 = vmul.f32 1.442695, %v786_v63 }
 0x36a   : > { %3779 = vpow2.f32 %v793_v2 }
 0x36b   : > { %3781 = vpow2.f32 %v795_v6 }
 0x36c   : > { %3783 = vrcp.f32 %v4363_v0 }
 0x36d   : > { %3785 = vpow2.f32 %v805_v9 }
 0x36e   : > { %1002 = vrot.lane.b32.xlu2 %v4372_v11, %s4017_s6  ;;  %3787 = vpow2.f32 %v807_v12 }
 0x370   : > { %v3780_v13 = vpop.eup %3779 }
 0x371   : > { %v3782_v14 = vpop.eup %3781  ;;  %v809_v16 = vadd.f32 1.0, %v3780_v13 }
 0x372   : > { %v4378_v17 = vpop.eup %3783  ;;  %v810_v4 = vadd.f32 1.0, %v3782_v14 }
 0x373   : > { %3789 = vrcp.f32 %v809_v16  ;;  %v3786_v20 = vpop.eup %3785  ;;  %v863_v21 = vmul.f32 %v4378_v17, %v4363_v0  ;;  %v828_v30 = vand.u32 2147483648, %v809_v16  ;;  %v826_v33 = vand.u32 2147483647, %v809_v16 }
 0x374   : > { %3791 = vrcp.f32 %v810_v4  ;;  %v3788_v22 = vpop.eup %3787  ;;  %v4387_v23 = vadd.f32 1.0, %v3786_v20  ;;  %v843_v34 = vand.u32 2147483648, %v810_v4  ;;  %v841_v36 = vand.u32 2147483647, %v810_v4 }
 0x375   : > { %v864_v25 = vsub.f32 1.0, %v863_v21  ;;  %v4389_v26 = vadd.f32 1.0, %v3788_v22  ;;  %vm822_vm13 = vweird.f32 %v809_v16  ;;  %vm868_vm14 = vweird.f32 %v4378_v17 }
 0x376   : > { %1146 = vrot.lane.b32.xlu2 %v4381_v19, %s4018_s11  ;;  %3793 = vrcp.f32 %v4387_v23  ;;  %v829_v40 = vor.u32 1.1754944e-38, %v828_v30  ;;  %vm837_vm0 = vweird.f32 %v810_v4  ;;  %vm827_vm2 = vcmp.eq.f32.partialorder %v826_v33, 8.507059e+37  ;;  %vm869_vm6 = vmor %vm867_vm5, %vm868_vm14 }
 0x377   : > { %v865_v29 = vmul.f32 %v4378_v17, %v864_v25  ;;  %3795 = vrcp.f32 %v4389_v26  ;;  %v844_v47 = vor.u32 1.1754944e-38, %v843_v34  ;;  %vm842_vm4 = vcmp.eq.f32.partialorder %v841_v36, 8.507059e+37  ;;  %v4574_v36 = vld [vmem:[%s5802_s2 + $0x8] sm:$0xff] }
 0x378   : > { %vm912_vm10 = vweird.f32 %v4387_v23  ;;  %v933_v9 = vand.u32 2147483648, %v4389_v26  ;;  %v916_v10 = vand.u32 2147483647, %v4387_v23  ;;  %v931_v12 = vand.u32 2147483647, %v4389_v26 }
 0x379   : > { %v3790_v24 = vpop.eup %3789  ;;  %v866_v45 = vadd.f32 %v4378_v17, %v865_v29  ;;  %v961_v30 = vlaneseq }
 0x37a   : > { %v3792_v27 = vpop.eup %3791  ;;  %v818_v28 = vmul.f32 %v3790_v24, %v809_v16  ;;  %vm823_vm11 = vweird.f32 %v3790_v24  ;;  %v934_v14 = vor.u32 1.1754944e-38, %v933_v9  ;;  %vm917_vm14 = vcmp.eq.f32.partialorder %v916_v10, 8.507059e+37 }
 0x37b   : > { %v833_v3 = vmul.f32 %v3792_v27, %v810_v4  ;;  %vm838_vm12 = vweird.f32 %v3792_v27  ;;  %vm824_vm15 = vmor %vm822_vm13, %vm823_vm11  ;;  %v870_v61 = vsel %vm869_vm6, %v4378_v17, %v866_v45  ;;  %v4561_v33 = vand.u32 127, %v961_v30 }
 0x37c   : > { %v819_v50 = vsub.f32 1.0, %v818_v28  ;;  %v3794_v44 = vpop.eup %3793  ;;  %vm839_vm3 = vmor %vm837_vm0, %vm838_vm12  ;;  %vm927_vm12 = vweird.f32 %v4389_v26 }
 0x37d   : > { %v834_v31 = vsub.f32 1.0, %v833_v3  ;;  %v3796_v48 = vpop.eup %3795  ;;  %v908_v62 = vmul.f32 %v3794_v44, %v4387_v23  ;;  %vm913_vm8 = vweird.f32 %v3794_v44  ;;  %vm1006_vm0 = vcmp.lt.s32.totalorder %v4561_v33, 16 }
 0x37e   : > { %v820_v32 = vmul.f32 %v3790_v24, %v819_v50  ;;  %957 = vrot.lane.b32.xlu2 %v4372_v11, %s4019_s14  ;;  %v923_v63 = vmul.f32 %v3796_v48, %v4389_v26  ;;  %vm928_vm9 = vweird.f32 %v3796_v48  ;;  %vm914_vm11 = vmor %vm912_vm10, %vm913_vm8  ;;  %v1851_v50 = vld [vmem:[%s5807_s7 + $0x10] sm:$0xff]  ;;  %vm5852_vm5 = vcmp.lt.s32.totalorder %v4561_v33, 113 }
 0x37f   : > { %v835_v35 = vmul.f32 %v3792_v27, %v834_v31  ;;  %vm929_vm13 = vmor %vm927_vm12, %vm928_vm9  ;;  %vm5853_vm6 = vcmp.lt.s32.totalorder %v4561_v33, 127  ;;  %vm5851_vm8 = vcmp.lt.s32.totalorder %v4561_v33, 111 }
 0x380   : > { %v821_v37 = vadd.f32 %v3790_v24, %v820_v32  ;;  %v924_v1 = vsub.f32 1.0, %v923_v63 }
 0x381   : > { %v836_v41 = vadd.f32 %v3792_v27, %v835_v35  ;;  %v4569_v35 = vld [vmem:[%s5802_s2] sm:$0xff] }
 0x382   : > { %v825_v46 = vsel %vm824_vm15, %v3790_v24, %v821_v37  ;;  %v925_v6 = vmul.f32 %v3796_v48, %v924_v1  ;;  %vm932_vm15 = vcmp.eq.f32.partialorder %v931_v12, 8.507059e+37 }
 0x383   : > { %v830_v54 = vsel %vm827_vm2, %v829_v40, %v825_v46  ;;  %v840_v55 = vsel %vm839_vm3, %v3792_v27, %v836_v41  ;;  %v4586_v46 = vperm.slane %v4569_v35, 1  ;;  %vm1158_vm2 = vcmp.lt.s32.totalorder %v4561_v33, 15 }
 0x384   : > { %v845_v58 = vsel %vm842_vm4, %v844_v47, %v840_v55  ;;  %v4402_v59 = vmul.f32 %v830_v54, %v4352_v43  ;;  %v874_v43 = vor.u32 1.1754944e-38, %v873_v53  ;;  %v926_v8 = vadd.f32 %v3796_v48, %v925_v6 }
 0x385   : > { %v4407_v60 = vmul.f32 %v845_v58, %v4355_v57  ;;  %v909_v57 = vsub.f32 1.0, %v908_v62  ;;  %v4589_v47 = vperm.slane %v4574_v36, 1  ;;  %vm963_vm3 = vcmp.lt.s32.totalorder %v4561_v33, 17 }
 0x386   : > { %990 = vrot.lane.b32.xlu0 %v4402_v59, %s4017_s6  ;;  %1144 = vrot.lane.b32.xlu2 %v4347_v39, %s4018_s11  ;;  %v875_v0 = vsel %vm872_vm7, %v874_v43, %v870_v61  ;;  %v930_v52 = vsel %vm929_vm13, %v3796_v48, %v926_v8  ;;  %vm1264_vm4 = vcmp.lt.s32.totalorder %v4561_v33, 1  ;;  %vm5850_vm7 = vcmp.lt.s32.totalorder %v4561_v33, 112 }
 0x387   : > { %998 = vrot.lane.b32.xlu1 %v4407_v60, %s4017_s6  ;;  %v4419_v2 = vmul.f32 %v875_v0, %v4332_v49  ;;  %v910_v5 = vmul.f32 %v3794_v44, %v909_v57  ;;  %v918_v49 = vand.u32 2147483648, %v4387_v23  ;;  %v935_v16 = vsel %vm932_vm15, %v934_v14, %v930_v52  ;;  %5868 = vst [vmem:[#allocation17_spill] sm:$0xff] %v4589_v47  ;;  %v3633_v52 = vld [vmem:[#allocation5 + $0x10] sm:$0xff] }
 0x388   : > { %v4443_v4 = vmul.f32 %v935_v16, %v4350_v42 }
 0x389   : > { %v911_v7 = vadd.f32 %v3794_v44, %v910_v5  ;;  %v919_v13 = vor.u32 1.1754944e-38, %v918_v49 }
 0x38b   : > { %v915_v51 = vsel %vm914_vm11, %v3794_v44, %v911_v7 }
 0x38c   : > { %v920_v15 = vsel %vm917_vm14, %v919_v13, %v915_v51 }
 0x38d   : > { %v4440_v17 = vmul.f32 %v920_v15, %v4345_v38  ;;  %v1852_v15 = vld [vmem:[%s5807_s7 + $0x18] sm:$0xff] }
 0x38e   : > { %1000 = vrot.lane.b32.xlu0 %v4419_v2, %s4017_s6  ;;  %945 = vrot.lane.b32.xlu2 %v4402_v59, %s4019_s14 }
 0x38f   : > { %994 = vrot.lane.b32.xlu1 %v4381_v19, %s4017_s6 }
 0x396   : > { %1154 = vrot.lane.b32.xlu0 %v4372_v11, %s4018_s11  ;;  %955 = vrot.lane.b32.xlu2 %v4419_v2, %s4019_s14 }
 0x397   : > { %949 = vrot.lane.b32.xlu1 %v4381_v19, %s4019_s14 }
 0x39e   : > { %996 = vrot.lane.b32.xlu0 %v4440_v17, %s4017_s6  ;;  %1156 = vrot.lane.b32.xlu2 %v4443_v4, %s4018_s11 }
 0x39f   : > { %1150 = vrot.lane.b32.xlu1 %v4407_v60, %s4018_s11 }
 0x3a6   : > { %1142 = vrot.lane.b32.xlu0 %v4402_v59, %s4018_s11  ;;  %1260 = vrot.lane.b32.xlu2 %v4372_v11, %s4020_s19 }
 0x3a7   : > { %1004 = vrot.lane.b32.xlu1 %v4443_v4, %s4017_s6 }
 0x3ae   : > { %1152 = vrot.lane.b32.xlu0 %v4419_v2, %s4018_s11  ;;  %1250 = vrot.lane.b32.xlu2 %v4347_v39, %s4020_s19 }
 0x3af   : > { %947 = vrot.lane.b32.xlu1 %v4347_v39, %s4019_s14 }
 0x3b6   : > { %953 = vrot.lane.b32.xlu0 %v4407_v60, %s4019_s14  ;;  %1535 = vrot.lane.b32.xlu2 %v4381_v19, %s5820_s25 }
 0x3b7   : > { %1252 = vrot.lane.b32.xlu1 %v4381_v19, %s4020_s19 }
 0x3be   : > { %951 = vrot.lane.b32.xlu0 %v4440_v17, %s4019_s14  ;;  %1437 = vrot.lane.b32.xlu2 %v4372_v11, %s5822_s15 }
 0x3bf   : > { %1148 = vrot.lane.b32.xlu1 %v4440_v17, %s4018_s11 }
 0x3c0   : > { %v4487_v38 = vpop.permute.xlu2 %992 }
 0x3c6   : > { %1248 = vrot.lane.b32.xlu0 %v4402_v59, %s4020_s19  ;;  %1533 = vrot.lane.b32.xlu2 %v4347_v39, %s5820_s25 }
 0x3c7   : > { %959 = vrot.lane.b32.xlu1 %v4443_v4, %s4019_s14 }
 0x3c8   : > { %v1003_v42 = vpop.permute.xlu2 %1002 }
 0x3ce   : > { %1258 = vrot.lane.b32.xlu0 %v4419_v2, %s4020_s19  ;;  %1425 = vrot.lane.b32.xlu2 %v4402_v59, %s5822_s15 }
 0x3cf   : > { %1256 = vrot.lane.b32.xlu1 %v4407_v60, %s4020_s19 }
 0x3d0   : > { %v4501_v20 = vpop.permute.xlu2 %1146 }
 0x3d6   : > { %1543 = vrot.lane.b32.xlu0 %v4372_v11, %s5820_s25  ;;  %1435 = vrot.lane.b32.xlu2 %v4419_v2, %s5822_s15 }
 0x3d7   : > { %1429 = vrot.lane.b32.xlu1 %v4381_v19, %s5822_s15 }
 0x3d8   : > { %v4515_v21 = vpop.permute.xlu2 %957 }
 0x3de   : > { %1254 = vrot.lane.b32.xlu0 %v4440_v17, %s4020_s19  ;;  %1545 = vrot.lane.b32.xlu2 %v4443_v4, %s5820_s25 }
 0x3df   : > { %1539 = vrot.lane.b32.xlu1 %v4407_v60, %s5820_s25 }
 0x3e0   : > { %v4523_v24 = vpop.permute.xlu2 %1144 }
 0x3e6   : > { %1531 = vrot.lane.b32.xlu0 %v4402_v59, %s5820_s25  ;;  %1755 = vrot.lane.b32.xlu2 %v4372_v11, %s4023_s30 }
 0x3e7   : > { %1262 = vrot.lane.b32.xlu1 %v4443_v4, %s4020_s19 }
 0x3e8   : > { %v4531_v27 = vpop.permute.xlu2 %945 }
 0x3ee   : > { %1541 = vrot.lane.b32.xlu0 %v4419_v2, %s5820_s25  ;;  %1743 = vrot.lane.b32.xlu2 %v4402_v59, %s4023_s30 }
 0x3ef   : > { %1427 = vrot.lane.b32.xlu1 %v4347_v39, %s5822_s15 }
 0x3f0   : > { %v4548_v29 = vpop.permute.xlu2 %955 }
 0x3f6   : > { %1433 = vrot.lane.b32.xlu0 %v4407_v60, %s5822_s15  ;;  %1753 = vrot.lane.b32.xlu2 %v4419_v2, %s4023_s30 }
 0x3f7   : > { %1747 = vrot.lane.b32.xlu1 %v4381_v19, %s4023_s30 }
 0x3f8   : > { %v991_v22 = vpop.permute.xlu0 %990  ;;  %v1157_v37 = vpop.permute.xlu2 %1156 }
 0x3f9   : > { %v999_v23 = vpop.permute.xlu1 %998 }
 0x3fa   : > { %v1011_v43 = vsel %vm1006_vm0, %v999_v23, %v991_v22  ;;  %v1007_v0 = vsel %vm1006_vm0, %v991_v22, %v999_v23  ;;  %v4644_v22 = vperm.slane %v4574_v36, 2 }
 0x3fb   : > { %v1017_v7 = vmul.f32 %v4586_v46, %v1011_v43  ;;  %v1018_v49 = vmul.f32 %v4589_v47, %v1007_v0  ;;  %v4692_v43 = vperm.slane %v4574_v36, 0 }
 0x3fc   : > { %5870 = vst [vmem:[#allocation19_spill] sm:$0xff] %v4644_v22 }
 0x3fd   : > { %5872 = vst [vmem:[#allocation21_spill] sm:$0xff] %v4692_v43 }
 0x3fe   : > { %1431 = vrot.lane.b32.xlu0 %v4440_v17, %s5822_s15  ;;  %1643 = vrot.lane.b32.xlu2 %v4440_v17, %s4024_s16 }
 0x3ff   : > { %1537 = vrot.lane.b32.xlu1 %v4440_v17, %s5820_s25  ;;  %s5886_s25 = smov 113  }
 0x400   : > { %v1001_v25 = vpop.permute.xlu0 %1000  ;;  %v4620_v12 = vpop.permute.xlu2 %1260 }
 0x401   : > { %v995_v26 = vpop.permute.xlu1 %994  ;;  %v1008_v48 = vsel %vm1006_vm0, %v4487_v38, %v1001_v25  ;;  %v1012_v53 = vsel %vm1006_vm0, %v1001_v25, %v4487_v38  ;;  %v4637_v38 = vperm.slane %v4569_v35, 2 }
 0x402   : > { %v1013_v41 = vsel %vm1006_vm0, %v1003_v42, %v995_v26  ;;  %v1009_v44 = vsel %vm1006_vm0, %v995_v26, %v1003_v42  ;;  %v1019_v5 = vmul.f32 %v4586_v46, %v1012_v53  ;;  %v1020_v6 = vmul.f32 %v4589_v47, %v1008_v48 }
 0x403   : > { %v1021_v58 = vmul.f32 %v4586_v46, %v1013_v41  ;;  %v1022_v62 = vmul.f32 %v4589_v47, %v1009_v44  ;;  %5869 = vst [vmem:[#allocation18_spill] sm:$0xff] %v4637_v38  ;;  %v4675_v53 = vperm.slane %v4569_v35, 0 }
 0x404   : > { %v1030_v10 = vpack.c.bf16 %v1019_v5, %v1017_v7  ;;  %v1031_v51 = vpack.c.bf16 %v1020_v6, %v1018_v49  ;;  %v1361_v6 = vpack.c.bf16 %v4440_v17, %v4381_v19  ;;  %v1362_v7 = vpack.c.bf16 %v4443_v4, %v4372_v11 }
 0x405   : > { %5871 = vst [vmem:[#allocation20_spill] sm:$0xff] %v4675_v53 }
 0x406   : > { %1641 = vrot.lane.b32.xlu0 %v4381_v19, %s4024_s16  ;;  %1645 = vrot.lane.b32.xlu2 %v4407_v60, %s4024_s16 }
 0x407   : > { %1439 = vrot.lane.b32.xlu1 %v4443_v4, %s5822_s15  ;;  %s4557_s15 = scalar_lea.vmem %s5801_s1, %s3630_s27 }
 0x408   : > { %v4540_v28 = vpop.permute.xlu0 %1154  ;;  %v1883_v34 = vld [vmem:[%s4557_s15 + $0x10] sm:$0xff]  ;;  %v1881_v56 = vld [vmem:[%s4557_s15] sm:$0xff]  ;;  %v4634_v16 = vpop.permute.xlu2 %1250 }
 0x409   : > { %v4542_v3 = vpop.permute.xlu1 %949  ;;  %v1165_v42 = vsel %vm1158_vm2, %v4540_v28, %v4501_v20  ;;  %v1161_v23 = vsel %vm1158_vm2, %v4501_v20, %v4540_v28 }
 0x40a   : > { %v1173_v41 = vmul.f32 %v4637_v38, %v1165_v42  ;;  %v1174_v48 = vmul.f32 %v4644_v22, %v1161_v23 }
 0x40e   : > { %1751 = vrot.lane.b32.xlu0 %v4407_v60, %s4023_s30  ;;  %1865 = vperm.xlu2 %3750, %v1851_v50  }
 0x40f   : > { %1649 = vrot.lane.b32.xlu1 %v4372_v11, %s4024_s16 }
 0x410   : > { %v997_v31 = vpop.permute.xlu0 %996 }
 0x411   : > { %v4559_v32 = vpop.permute.xlu1 %1150 }
 0x416   : > { %1749 = vrot.lane.b32.xlu0 %v4440_v17, %s4023_s30  ;;  %1897 = vperm.xlu2 %3750, %v1883_v34   ;;  %v3634_v34 = vld [vmem:[#allocation5 + $0x18] sm:$0xff] }
 0x417   : > { %1745 = vrot.lane.b32.xlu1 %v4347_v39, %s4023_s30 }
 0x418   : > { %v4579_v40 = vpop.permute.xlu0 %1142 }
 0x419   : > { %v1005_v45 = vpop.permute.xlu1 %1004 }
 0x41a   : > { %v1010_v54 = vsel %vm1006_vm0, %v997_v31, %v1005_v45  ;;  %v1014_v55 = vsel %vm1006_vm0, %v1005_v45, %v997_v31  ;;  %v1850_v45 = vld [vmem:[%s5807_s7 + $0x8] sm:$0xff] }
 0x41b   : > { %v1023_v61 = vmul.f32 %v4586_v46, %v1014_v55  ;;  %v1024_v63 = vmul.f32 %v4589_v47, %v1010_v54  ;;  %v1884_v54 = vld [vmem:[%s4557_s15 + $0x18] sm:$0xff] }
 0x41d   : > { %v1032_v57 = vpack.c.bf16 %v1023_v61, %v1021_v58  ;;  %v1033_v1 = vpack.c.bf16 %v1024_v63, %v1022_v62  ;;  %v970_v61 = vsel %vm963_vm3, %v4515_v21, %v4542_v3  ;;  %v4687_v62 = vpop.permute.xlu2 %1535 }
 0x41e   : > { %1651 = vrot.lane.b32.xlu0 %v4443_v4, %s4024_s16  ;;  %1887 = vperm.xlu2 %3750, %v1881_v56  }
 0x41f   : > { %1637 = vrot.lane.b32.xlu1 %v4402_v59, %s4024_s16  ;;  %1056 = vmatpush.bf16.msra.mxu2 %v1032_v57 }
 0x420   : > { %1075 = vmatpush.bf16.msra.mxu3 %v1033_v1  ;;  %v1153_v8 = vpop.permute.xlu0 %1152 }
 0x421   : > { %v4618_v9 = vpop.permute.xlu1 %947  ;;  %v1164_v50 = vsel %vm1158_vm2, %v1153_v8, %v4523_v24  ;;  %v1160_v20 = vsel %vm1158_vm2, %v4523_v24, %v1153_v8  ;;  %v1159_v24 = vsel %vm1158_vm2, %v4579_v40, %v4559_v32  ;;  %v978_v8 = vmul.f32 %v4675_v53, %v970_v61 }
 0x422   : > { %v1171_v55 = vmul.f32 %v4637_v38, %v1164_v50  ;;  %v1172_v63 = vmul.f32 %v4644_v22, %v1160_v20  ;;  %v1170_v57 = vmul.f32 %v4644_v22, %v1159_v24  ;;  %v4757_v24 = vperm.slane %v4569_v35, 3 }
 0x423   : > { %1057 = vmatpush.bf16.msra.mxu2 %v1030_v10 }
 0x424   : > { %1076 = vmatpush.bf16.msra.mxu3 %v1031_v51  ;;  %v1183_v10 = vpack.c.bf16 %v1172_v63, %v1170_v57  ;;  %5873 = vst [vmem:[#allocation22_spill] sm:$0xff] %v4757_v24 }
 0x425   : > { %v4740_v50 = vpop.permute.xlu2 %1437 }
 0x426   : > { %3408 = vmatmul.msk.bf16.vlgmr.msra.gmra.mxu2 %vm554_vm1, %v3633_v52  ;;  %1639 = vrot.lane.b32.xlu0 %v4347_v39, %s4024_s16 }
 0x427   : > { %3410 = vmatmul.msk.bf16.vlgmr.msra.gmra.mxu3 %vm554_vm1, %v3633_v52  ;;  %1757 = vrot.lane.b32.xlu1 %v4443_v4, %s4023_s30  ;;  %v1882_v4 = vld [vmem:[%s4557_s15 + $0x8] sm:$0xff]  ;;  %v965_v52 = vsel %vm963_vm3, %v4618_v9, %v4548_v29  ;;  %s5885_s15 = smov 127  }
 0x428   : > { %v954_v13 = vpop.permute.xlu0 %953 }
 0x429   : > { %v4628_v14 = vpop.permute.xlu1 %1252  ;;  %v964_v19 = vsel %vm963_vm3, %v4531_v27, %v954_v13 }
 0x42e   : > { %1870 = vperm.xlu0 %3751, %v1852_v15   ;;  %v969_v15 = vsel %vm963_vm3, %v4548_v29, %v4618_v9  ;;  %v1359_v29 = vpack.c.bf16 %v4347_v39, %v4402_v59  ;;  %v1360_v9 = vpack.c.bf16 %v4419_v2, %v4407_v60  ;;  %v1534_v60 = vpop.permute.xlu2 %1533 }
 0x42f   : > { %1647 = vrot.lane.b32.xlu1 %v4419_v2, %s4024_s16 }
 0x430   : > { %v952_v25 = vpop.permute.xlu0 %951 }
 0x431   : > { %v1149_v26 = vpop.permute.xlu1 %1148 }
 0x432   : > { %v1162_v30 = vsel %vm1158_vm2, %v1149_v26, %v1157_v37  ;;  %v1166_v31 = vsel %vm1158_vm2, %v1157_v37, %v1149_v26  ;;  %v1163_v37 = vsel %vm1158_vm2, %v4559_v32, %v4579_v40  ;;  %v966_v40 = vsel %vm963_vm3, %v4542_v3, %v4515_v21 }
 0x433   : > { %v1175_v28 = vmul.f32 %v4637_v38, %v1166_v31  ;;  %v1176_v44 = vmul.f32 %v4644_v22, %v1162_v30  ;;  %v1169_v32 = vmul.f32 %v4637_v38, %v1163_v37  ;;  %v968_v21 = vsel %vm963_vm3, %v954_v13, %v4531_v27  ;;  %v1849_v27 = vld [vmem:[%s5807_s7] sm:$0xff]  ;;  %v3636_v37 = vld [vmem:[#allocation5 + $0x28] sm:$0xff] }
 0x434   : > { %v979_v51 = vmul.f32 %v4692_v43, %v966_v40  ;;  %v974_v13 = vmul.f32 %v4675_v53, %v968_v21  ;;  %v976_v26 = vmul.f32 %v4675_v53, %v969_v15  ;;  %v977_v30 = vmul.f32 %v4692_v43, %v965_v52  ;;  %v3637_v52 = vld [vmem:[#allocation5 + $0x30] sm:$0xff]  ;;  %v3639_v15 = vld [vmem:[#allocation5 + $0x40] sm:$0xff] }
 0x435   : > { %v1184_v56 = vpack.c.bf16 %v1175_v28, %v1173_v41  ;;  %v1185_v58 = vpack.c.bf16 %v1176_v44, %v1174_v48  ;;  %v1182_v5 = vpack.c.bf16 %v1171_v55, %v1169_v32  ;;  %v3631_v28 = vld [vmem:[#allocation5] sm:$0xff]  ;;  %v3632_v48 = vld [vmem:[#allocation5 + $0x8] sm:$0xff]  ;;  %v4760_v55 = vperm.slane %v4574_v36, 3 }
 0x436   : > { %3409 = vmatmul.msk.bf16.gmra.mxu2 %vm554_vm1, %v3634_v34  ;;  %1860 = vperm.xlu0 %3751, %v1850_v45   ;;  %v986_v41 = vpack.c.bf16 %v976_v26, %v974_v13  ;;  %v3635_v44 = vld [vmem:[#allocation5 + $0x20] sm:$0xff] }
 0x437   : > { %3411 = vmatmul.msk.bf16.gmra.mxu3 %vm554_vm1, %v3634_v34  ;;  %1902 = vperm.xlu1 %3752, %v1884_v54   ;;  %v4751_v54 = vpop.permute.xlu2 %1425  ;;  %5874 = vst [vmem:[#allocation23_spill] sm:$0xff] %v4760_v55 }
 0x438   : > { %1208 = vmatpush.bf16.msrb.mxu2 %v1184_v56  ;;  %1227 = vmatpush.bf16.msrb.mxu3 %v1185_v58  ;;  %v4700_v0 = vpop.permute.xlu0 %1248  ;;  %v1267_v56 = vsel %vm1264_vm4, %v4628_v14, %v4620_v12  ;;  %v1271_v58 = vsel %vm1264_vm4, %v4620_v12, %v4628_v14 }
 0x439   : > { %v960_v1 = vpop.permute.xlu1 %959 }
 0x43a   : > { %v967_v3 = vsel %vm963_vm3, %v952_v25, %v960_v1  ;;  %v971_v49 = vsel %vm963_vm3, %v960_v1, %v952_v25  ;;  %v975_v25 = vmul.f32 %v4692_v43, %v964_v19 }
 0x43b   : > { %v980_v17 = vmul.f32 %v4675_v53, %v971_v49  ;;  %v981_v11 = vmul.f32 %v4692_v43, %v967_v3 }
 0x43c   : > { %1209 = vmatpush.bf16.msrb.mxu2 %v1182_v5  ;;  %1228 = vmatpush.bf16.msrb.mxu3 %v1183_v10  ;;  %v987_v20 = vpack.c.bf16 %v977_v30, %v975_v25  ;;  %v1279_v5 = vmul.f32 %v4757_v24, %v1271_v58  ;;  %v4811_v25 = vperm.slane %v4574_v36, 6 }
 0x43d   : > { %v988_v42 = vpack.c.bf16 %v980_v17, %v978_v8  ;;  %v989_v23 = vpack.c.bf16 %v981_v11, %v979_v51 }
 0x43e   : > { %1892 = vperm.xlu0 %3751, %v1882_v4   ;;  %5876 = vst [vmem:[#allocation25_spill] sm:$0xff] %v4811_v25 }
 0x43f   : > { %1855 = vperm.xlu1 %3752, %v1849_v27   ;;  %1110 = vmatpush.bf16.msrb.mxu0 %v988_v42  ;;  %v4796_v19 = vpop.permute.xlu2 %1435 }
 0x440   : > { %1385 = vmatpush.bf16.msra.mxu2 %v1361_v6  ;;  %1404 = vmatpush.bf16.msra.mxu3 %v1362_v7  ;;  %v1259_v31 = vpop.permute.xlu0 %1258  ;;  %v1280_v6 = vmul.f32 %v4760_v55, %v1267_v56 }
 0x441   : > { %1129 = vmatpush.bf16.msrb.mxu1 %v989_v23  ;;  %v1257_v34 = vpop.permute.xlu1 %1256  ;;  %v1266_v63 = vsel %vm1264_vm4, %v4634_v16, %v1259_v31  ;;  %v1270_v32 = vsel %vm1264_vm4, %v1259_v31, %v4634_v16  ;;  %v4808_v23 = vperm.slane %v4569_v35, 6 }
 0x442   : > { %v1265_v57 = vsel %vm1264_vm4, %v4700_v0, %v1257_v34  ;;  %v1269_v1 = vsel %vm1264_vm4, %v1257_v34, %v4700_v0  ;;  %v1277_v8 = vmul.f32 %v4757_v24, %v1270_v32  ;;  %v1278_v21 = vmul.f32 %v4760_v55, %v1266_v63 }
 0x443   : > { %1111 = vmatpush.bf16.msrb.mxu0 %v986_v41  ;;  %v1275_v0 = vmul.f32 %v4757_v24, %v1269_v1  ;;  %v1276_v3 = vmul.f32 %v4760_v55, %v1265_v57  ;;  %5875 = vst [vmem:[#allocation24_spill] sm:$0xff] %v4808_v23  ;;  %v4845_v57 = vperm.slane %v4569_v35, 5  ;;  %v4848_v1 = vperm.slane %v4574_v36, 5 }
 0x444   : > { %1386 = vmatpush.bf16.msra.mxu2 %v1359_v29  ;;  %1405 = vmatpush.bf16.msra.mxu3 %v1360_v9 }
 0x445   : > { %1130 = vmatpush.bf16.msrb.mxu1 %v987_v20  ;;  %v1288_v4 = vpack.c.bf16 %v1277_v8, %v1275_v0  ;;  %v1289_v51 = vpack.c.bf16 %v1278_v21, %v1276_v3  ;;  %5877 = vst [vmem:[#allocation26_spill] sm:$0xff] %v4845_v57 }
 0x446   : > { %3420 = vmatmul.msk.bf16.vlgmr.msrb.gmra.mxu0 %vm554_vm1, %v3631_v28  ;;  %3432 = vmatmul.msk.bf16.vlgmr.msrb.gmra.mxu2 %vm554_vm1, %v3635_v44  ;;  %5878 = vst [vmem:[#allocation27_spill] sm:$0xff] %v4848_v1 }
 0x447   : > { %3434 = vmatmul.msk.bf16.vlgmr.msrb.gmra.mxu3 %vm554_vm1, %v3635_v44  ;;  %v1546_v27 = vpop.permute.xlu2 %1545  ;;  %v3638_v44 = vld [vmem:[#allocation5 + $0x38] sm:$0xff] }
 0x448   : > { %3422 = vmatmul.msk.bf16.vlgmr.msrb.gmra.mxu1 %vm554_vm1, %v3631_v28  ;;  %v1544_v39 = vpop.permute.xlu0 %1543 }
 0x449   : > { %v4747_v59 = vpop.permute.xlu1 %1429  ;;  %v1550_v26 = vsel %vm5852_vm5, %v4687_v62, %v1544_v39  ;;  %v1554_v29 = vsel %vm5852_vm5, %v1544_v39, %v4687_v62 }
 0x44a   : > { %v1562_v62 = vmul.f32 %v4808_v23, %v1550_v26  ;;  %v1563_v39 = vmul.f32 %v4811_v25, %v1554_v29 }
 0x44f   : > { %v4819_v31 = vpop.permute.xlu2 %1755 }
 0x450   : > { %v1255_v2 = vpop.permute.xlu0 %1254 }
 0x451   : > { %v4749_v45 = vpop.permute.xlu1 %1539 }
 0x456   : > { %3421 = vmatmul.msk.bf16.gmra.mxu0 %vm554_vm1, %v3632_v48  ;;  %3433 = vmatmul.msk.bf16.gmra.mxu2 %vm554_vm1, %v3636_v37 }
 0x457   : > { %3435 = vmatmul.msk.bf16.gmra.mxu3 %vm554_vm1, %v3636_v37 }
 0x458   : > { %3423 = vmatmul.msk.bf16.gmra.mxu1 %vm554_vm1, %v3632_v48  ;;  %v1532_v61 = vpop.permute.xlu0 %1531 }
 0x459   : > { %v1263_v40 = vpop.permute.xlu1 %1262  ;;  %v1552_v56 = vsel %vm5852_vm5, %v4749_v45, %v1532_v61 }
 0x45a   : > { %v1268_v12 = vsel %vm1264_vm4, %v1255_v2, %v1263_v40  ;;  %v1272_v14 = vsel %vm1264_vm4, %v1263_v40, %v1255_v2  ;;  %v3640_v2 = vld [vmem:[#allocation5 + $0x48] sm:$0xff] }
 0x45b   : > { %v1281_v16 = vmul.f32 %v4757_v24, %v1272_v14  ;;  %v1282_v7 = vmul.f32 %v4760_v55, %v1268_v12  ;;  %v1448_v14 = vsel %vm5853_vm6, %v4740_v50, %v4747_v59 }
 0x45c   : > { %v1457_v3 = vmul.f32 %v4848_v1, %v1448_v14  ;;  %v3753_v14 = vld [vmem:[%s5802_s2 + $0x10] ss:$0 sm:$0xff] }
 0x45d   : > { %v1290_v49 = vpack.c.bf16 %v1281_v16, %v1279_v5  ;;  %v1291_v10 = vpack.c.bf16 %v1282_v7, %v1280_v6 }
 0x45f   : > { %1314 = vmatpush.bf16.msra.mxu0 %v1290_v49  ;;  %1333 = vmatpush.bf16.msra.mxu1 %v1291_v10 }
 0x460   : > { %v1542_v17 = vpop.permute.xlu0 %1541 }
 0x461   : > { %v4798_v11 = vpop.permute.xlu1 %1427  ;;  %v1549_v34 = vsel %vm5852_vm5, %v1534_v60, %v1542_v17  ;;  %v1553_v41 = vsel %vm5852_vm5, %v1542_v17, %v1534_v60  ;;  %v1548_v60 = vsel %vm5852_vm5, %v1532_v61, %v4749_v45  ;;  %v1559_v45 = vmul.f32 %v4811_v25, %v1552_v56  ;;  %v4876_v17 = vpop.permute.xlu2 %1743 }
 0x462   : > { %v1560_v58 = vmul.f32 %v4808_v23, %v1549_v34  ;;  %v1561_v63 = vmul.f32 %v4811_v25, %v1553_v41  ;;  %v1558_v12 = vmul.f32 %v4808_v23, %v1548_v60  ;;  %v1444_v61 = vsel %vm5853_vm6, %v4747_v59, %v4740_v50  ;;  %v3641_v41 = vld [vmem:[#allocation5 + $0x50] sm:$0xff] }
 0x463   : > { %1315 = vmatpush.bf16.msra.mxu0 %v1288_v4  ;;  %1334 = vmatpush.bf16.msra.mxu1 %v1289_v51  ;;  %v1456_v59 = vmul.f32 %v4845_v57, %v1444_v61  ;;  %v1447_v4 = vsel %vm5853_vm6, %v4796_v19, %v4798_v11 }
 0x464   : > { %v1571_v16 = vpack.c.bf16 %v1560_v58, %v1558_v12  ;;  %v1572_v7 = vpack.c.bf16 %v1561_v63, %v1559_v45  ;;  %v1455_v26 = vmul.f32 %v4848_v1, %v1447_v4  ;;  %v3644_v12 = vld [vmem:[#allocation5 + $0x68] sm:$0xff] }
 0x466   : > { %3444 = vmatmul.msk.bf16.vlgmr.msra.gmra.mxu0 %vm554_vm1, %v3637_v52  ;;  %3456 = vmatmul.msk.bf16.vlgmr.msra.gmra.mxu2 %vm554_vm1, %v3639_v15 }
 0x467   : > { %3458 = vmatmul.msk.bf16.vlgmr.msra.gmra.mxu3 %vm554_vm1, %v3639_v15 }
 0x468   : > { %3446 = vmatmul.msk.bf16.vlgmr.msra.gmra.mxu1 %vm554_vm1, %v3637_v52  ;;  %v1434_v13 = vpop.permute.xlu0 %1433 }
 0x469   : > { %v4804_v42 = vpop.permute.xlu1 %1747  ;;  %v1442_v8 = vsel %vm5853_vm6, %v4751_v54, %v1434_v13  ;;  %v1446_v21 = vsel %vm5853_vm6, %v1434_v13, %v4751_v54  ;;  %v1443_v54 = vsel %vm5853_vm6, %v4798_v11, %v4796_v19  ;;  %v3643_v19 = vld [vmem:[#allocation5 + $0x60] sm:$0xff]  ;;  %v1754_v11 = vpop.permute.xlu2 %1753 }
 0x46a   : > { %v1452_v51 = vmul.f32 %v4845_v57, %v1442_v8  ;;  %v1453_v52 = vmul.f32 %v4848_v1, %v1446_v21  ;;  %v1454_v13 = vmul.f32 %v4845_v57, %v1443_v54 }
 0x46c   : > { %v1466_v34 = vpack.c.bf16 %v1455_v26, %v1453_v52 }
 0x470   : > { %v1432_v9 = vpop.permute.xlu0 %1431 }
 0x471   : > { %v1538_v30 = vpop.permute.xlu1 %1537 }
 0x472   : > { %v1551_v20 = vsel %vm5852_vm5, %v1538_v30, %v1546_v27  ;;  %v1555_v28 = vsel %vm5852_vm5, %v1546_v27, %v1538_v30  ;;  %v1465_v30 = vpack.c.bf16 %v1454_v13, %v1452_v51 }
 0x473   : > { %v1564_v48 = vmul.f32 %v4808_v23, %v1551_v20  ;;  %v1565_v37 = vmul.f32 %v4811_v25, %v1555_v28 }
 0x475   : > { %v1573_v32 = vpack.c.bf16 %v1564_v48, %v1562_v62  ;;  %v1574_v40 = vpack.c.bf16 %v1565_v37, %v1563_v39  ;;  %v1644_v48 = vpop.permute.xlu2 %1643 }
 0x476   : > { %3445 = vmatmul.msk.bf16.gmra.mxu0 %vm554_vm1, %v3638_v44  ;;  %3457 = vmatmul.msk.bf16.gmra.mxu2 %vm554_vm1, %v3640_v2 }
 0x477   : > { %3459 = vmatmul.msk.bf16.gmra.mxu3 %vm554_vm1, %v3640_v2  ;;  %1597 = vmatpush.bf16.msrb.mxu2 %v1573_v32  ;;  %v4899_v2 = vperm.slane %v4574_v36, 7 }
 0x478   : > { %3447 = vmatmul.msk.bf16.gmra.mxu1 %vm554_vm1, %v3638_v44  ;;  %1616 = vmatpush.bf16.msrb.mxu3 %v1574_v40  ;;  %v1642_v5 = vpop.permute.xlu0 %1641  ;;  %v4896_v44 = vperm.slane %v4569_v35, 7  ;;  %v3642_v40 = vld [vmem:[#allocation5 + $0x58] sm:$0xff] }
 0x479   : > { %v1440_v6 = vpop.permute.xlu1 %1439  ;;  %5880 = vst [vmem:[#allocation29_spill] sm:$0xff] %v4899_v2 }
 0x47a   : > { %v1445_v0 = vsel %vm5853_vm6, %v1432_v9, %v1440_v6  ;;  %v1449_v50 = vsel %vm5853_vm6, %v1440_v6, %v1432_v9  ;;  %5879 = vst [vmem:[#allocation28_spill] sm:$0xff] %v4896_v44  ;;  %v1762_v6 = vsel %vm5851_vm8, %v4804_v42, %v4819_v31 }
 0x47b   : > { %v1458_v49 = vmul.f32 %v4845_v57, %v1445_v0  ;;  %v1459_v10 = vmul.f32 %v4848_v1, %v1449_v50  ;;  %1598 = vmatpush.bf16.msrb.mxu2 %v1571_v16  ;;  %v1766_v16 = vsel %vm5851_vm8, %v4819_v31, %v4804_v42 }
 0x47c   : > { %1617 = vmatpush.bf16.msrb.mxu3 %v1572_v7 }
 0x47d   : > { %v1467_v15 = vpack.c.bf16 %v1458_v49, %v1456_v59  ;;  %v1468_v27 = vpack.c.bf16 %v1459_v10, %v1457_v3  ;;  %v1774_v59 = vmul.f32 %v3753_v14, %v1762_v6 }
 0x47f   : > { %1491 = vmatpush.bf16.msrb.mxu0 %v1467_v15  ;;  %1510 = vmatpush.bf16.msrb.mxu1 %v1468_v27  ;;  %v1646_v15 = vpop.permute.xlu2 %1645 }
 0x480   : > { %v1752_v29 = vpop.permute.xlu0 %1751 }
 0x481   : > { %v1650_v9 = vpop.permute.xlu1 %1649  ;;  %v1760_v42 = vsel %vm5851_vm8, %v4876_v17, %v1752_v29  ;;  %v1764_v31 = vsel %vm5851_vm8, %v1752_v29, %v4876_v17 }
 0x482   : > { %v1656_v62 = vsel %vm5850_vm7, %v1642_v5, %v1650_v9  ;;  %v1660_v39 = vsel %vm5850_vm7, %v1650_v9, %v1642_v5  ;;  %v3754_v5 = vld [vmem:[%s5802_s2 + $0x18] ss:$0 sm:$0xff]  ;;  %v1770_v27 = vmul.f32 %v3753_v14, %v1760_v42 }
 0x483   : > { %1492 = vmatpush.bf16.msrb.mxu0 %v1465_v30  ;;  %1511 = vmatpush.bf16.msrb.mxu1 %v1466_v34  ;;  %v1668_v35 = vmul.f32 %v4896_v44, %v1656_v62  ;;  %v1669_v36 = vmul.f32 %v4899_v2, %v1660_v39  ;;  %v1775_v3 = vmul.f32 %v3754_v5, %v1766_v16 }
 0x484   : > { %v1771_v13 = vmul.f32 %v3754_v5, %v1764_v31 }
 0x486   : > { %3468 = vmatmul.msk.bf16.vlgmr.msrb.gmra.mxu0 %vm554_vm1, %v3641_v41  ;;  %3480 = vmatmul.msk.bf16.vlgmr.msrb.gmra.mxu2 %vm554_vm1, %v3643_v19 }
 0x487   : > { %3482 = vmatmul.msk.bf16.vlgmr.msrb.gmra.mxu3 %vm554_vm1, %v3643_v19 }
 0x488   : > { %3470 = vmatmul.msk.bf16.vlgmr.msrb.gmra.mxu1 %vm554_vm1, %v3641_v41  ;;  %v1750_v20 = vpop.permute.xlu0 %1749 }
 0x489   : > { %v1746_v28 = vpop.permute.xlu1 %1745 }
 0x48a   : > { %v1761_v8 = vsel %vm5851_vm8, %v1746_v28, %v1754_v11  ;;  %v1765_v21 = vsel %vm5851_vm8, %v1754_v11, %v1746_v28 }
 0x48b   : > { %v1772_v54 = vmul.f32 %v3753_v14, %v1761_v8  ;;  %v1773_v4 = vmul.f32 %v3754_v5, %v1765_v21 }
 0x48d   : > { %v1783_v41 = vpack.c.bf16 %v1772_v54, %v1770_v27  ;;  %v1784_v19 = vpack.c.bf16 %v1773_v4, %v1771_v13 }
 0x490   : > { %v1652_v37 = vpop.permute.xlu0 %1651 }
 0x491   : > { %v1657_v60 = vsel %vm5850_vm7, %v1644_v48, %v1652_v37  ;;  %v1661_v56 = vsel %vm5850_vm7, %v1652_v37, %v1644_v48  ;;  %v1638_v58 = vpop.permute.xlu1 %1637 }
 0x492   : > { %v1670_v63 = vmul.f32 %v4896_v44, %v1657_v60  ;;  %v1671_v32 = vmul.f32 %v4899_v2, %v1661_v56  ;;  %v1654_v26 = vsel %vm5850_vm7, %v1638_v58, %v1646_v15  ;;  %v1658_v9 = vsel %vm5850_vm7, %v1646_v15, %v1638_v58  ;;  %v3645_v60 = vld [vmem:[#allocation5 + $0x70] sm:$0xff] }
 0x493   : > { %v1664_v17 = vmul.f32 %v4896_v44, %v1654_v26  ;;  %v1665_v28 = vmul.f32 %v4899_v2, %v1658_v9 }
 0x494   : > { %v1679_v45 = vpack.c.bf16 %v1670_v63, %v1668_v35  ;;  %v1680_v61 = vpack.c.bf16 %v1671_v32, %v1669_v36  ;;  %v3648_v63 = vld [vmem:[#allocation5 + $0x88] sm:$0xff]  ;;  %v3646_v32 = vld [vmem:[#allocation5 + $0x78] sm:$0xff] }
 0x496   : > { %3469 = vmatmul.msk.bf16.gmra.mxu0 %vm554_vm1, %v3642_v40  ;;  %3481 = vmatmul.msk.bf16.gmra.mxu2 %vm554_vm1, %v3644_v12 }
 0x497   : > { %3483 = vmatmul.msk.bf16.gmra.mxu3 %vm554_vm1, %v3644_v12  ;;  %1703 = vmatpush.bf16.msra.mxu0 %v1679_v45 }
 0x498   : > { %3471 = vmatmul.msk.bf16.gmra.mxu1 %vm554_vm1, %v3642_v40  ;;  %v1640_v30 = vpop.permute.xlu0 %1639 }
 0x499   : > { %1722 = vmatpush.bf16.msra.mxu1 %v1680_v61  ;;  %v1758_v7 = vpop.permute.xlu1 %1757 }
 0x49a   : > { %v1763_v0 = vsel %vm5851_vm8, %v1750_v20, %v1758_v7  ;;  %v1767_v50 = vsel %vm5851_vm8, %v1758_v7, %v1750_v20  ;;  %v3647_v20 = vld [vmem:[#allocation5 + $0x80] sm:$0xff] }
 0x49b   : > { %v1776_v49 = vmul.f32 %v3753_v14, %v1763_v0  ;;  %v1777_v10 = vmul.f32 %v3754_v5, %v1767_v50 }
 0x49d   : > { %v1785_v51 = vpack.c.bf16 %v1776_v49, %v1774_v59  ;;  %v1786_v52 = vpack.c.bf16 %v1777_v10, %v1775_v3 }
 0x49f   : > { %1809 = vmatpush.bf16.msra.mxu2 %v1785_v51  ;;  %1828 = vmatpush.bf16.msra.mxu3 %v1786_v52 }
 0x4a1   : > { %v1648_v34 = vpop.permute.xlu1 %1647 }
 0x4a2   : > { %v1655_v29 = vsel %vm5850_vm7, %v1640_v30, %v1648_v34  ;;  %v1659_v11 = vsel %vm5850_vm7, %v1648_v34, %v1640_v30 }
 0x4a3   : > { %v1666_v62 = vmul.f32 %v4896_v44, %v1655_v29  ;;  %v1667_v39 = vmul.f32 %v4899_v2, %v1659_v11  ;;  %1810 = vmatpush.bf16.msra.mxu2 %v1783_v41  ;;  %1829 = vmatpush.bf16.msra.mxu3 %v1784_v19 }
 0x4a5   : > { %v1677_v48 = vpack.c.bf16 %v1666_v62, %v1664_v17  ;;  %v1678_v37 = vpack.c.bf16 %v1667_v39, %v1665_v28 }
 0x4a6   : > { %3504 = vmatmul.msk.bf16.vlgmr.msra.gmra.mxu2 %vm554_vm1, %v3647_v20 }
 0x4a7   : > { %3506 = vmatmul.msk.bf16.vlgmr.msra.gmra.mxu3 %vm554_vm1, %v3647_v20  ;;  %1704 = vmatpush.bf16.msra.mxu0 %v1677_v48 }
 0x4a8   : > { %1723 = vmatpush.bf16.msra.mxu1 %v1678_v37 }
 0x4a9   : > { %v1059_v56 = vpop.f32.mrf.mxu2 }
 0x4aa   : > { %v1078_v58 = vpop.f32.mrf.mxu3  ;;  %3492 = vmatmul.msk.bf16.vlgmr.msra.gmra.mxu0 %vm554_vm1, %v3645_v60 }
 0x4ab   : > { %3494 = vmatmul.msk.bf16.vlgmr.msra.gmra.mxu1 %vm554_vm1, %v3645_v60 }
 0x4b1   : > { %v4962_v35 = vpop.f32.mrf.mxu2 }
 0x4b2   : > { %v4964_v36 = vpop.f32.mrf.mxu3 }
 0x4b6   : > { %3505 = vmatmul.msk.bf16.gmra.mxu2 %vm554_vm1, %v3648_v63 }
 0x4b7   : > { %3507 = vmatmul.msk.bf16.gmra.mxu3 %vm554_vm1, %v3648_v63 }
 0x4b9   : > { %v1064_v40 = vpop.f32.mrf.mxu2 }
 0x4ba   : > { %v1083_v12 = vpop.f32.mrf.mxu3  ;;  %3493 = vmatmul.msk.bf16.gmra.mxu0 %vm554_vm1, %v3646_v32 }
 0x4bb   : > { %3495 = vmatmul.msk.bf16.gmra.mxu1 %vm554_vm1, %v3646_v32 }
 0x4c1   : > { %v4970_v45 = vpop.f32.mrf.mxu2 }
 0x4c2   : > { %v4972_v61 = vpop.f32.mrf.mxu3 }
 0x4c3   : > { %v1113_v14 = vpop.f32.mrf.mxu0 }
 0x4c4   : > { %v1114_v5 = vadd.f32 %v1113_v14, %v1059_v56 }
 0x4c5   : > { %v1132_v6 = vpop.f32.mrf.mxu1 }
 0x4c6   : > { %v1133_v16 = vadd.f32 %v1132_v6, %v1078_v58 }
 0x4c9   : > { %v1211_v7 = vpop.f32.mrf.mxu2 }
 0x4ca   : > { %v1240_v8 = vadd.f32 %v1211_v7, %v1114_v5  ;;  %v1230_v21 = vpop.f32.mrf.mxu3 }
 0x4cb   : > { %v1241_v0 = vadd.f32 %v1230_v21, %v1133_v16  ;;  %v1115_v50 = vpop.f32.mrf.mxu0 }
 0x4cd   : > { %v1134_v59 = vpop.f32.mrf.mxu1 }
 0x4d1   : > { %v1213_v3 = vpop.f32.mrf.mxu2 }
 0x4d2   : > { %v1232_v49 = vpop.f32.mrf.mxu3 }
 0x4d3   : > { %v1118_v10 = vpop.f32.mrf.mxu0 }
 0x4d4   : > { %v1119_v42 = vadd.f32 %v1118_v10, %v1064_v40 }
 0x4d5   : > { %v1137_v31 = vpop.f32.mrf.mxu1 }
 0x4d6   : > { %v1138_v54 = vadd.f32 %v1137_v31, %v1083_v12 }
 0x4d9   : > { %v1216_v4 = vpop.f32.mrf.mxu2 }
 0x4da   : > { %v1244_v51 = vadd.f32 %v1216_v4, %v1119_v42  ;;  %v1235_v52 = vpop.f32.mrf.mxu3 }
 0x4db   : > { %v4974_v15 = vadd.f32 %v1235_v52, %v1138_v54  ;;  %v4976_v27 = vpop.f32.mrf.mxu0 }
 0x4dd   : > { %v4978_v13 = vpop.f32.mrf.mxu1 }
 0x4e1   : > { %v4980_v26 = vpop.f32.mrf.mxu2 }
 0x4e2   : > { %v4982_v9 = vpop.f32.mrf.mxu3 }
 0x4e3   : > { %v1317_v30 = vpop.f32.mrf.mxu0 }
 0x4e4   : > { %v1346_v34 = vadd.f32 %v1317_v30, %v1240_v8  ;;  %v5006_v30 = vpop.permute.xlu0 %1870 }
 0x4e5   : > { %v1336_v41 = vpop.f32.mrf.mxu1 }
 0x4e6   : > { %v1347_v19 = vadd.f32 %v1336_v41, %v1241_v0 }
 0x4e9   : > { %v1388_v17 = vpop.f32.mrf.mxu2 }
 0x4ea   : > { %v4984_v29 = vadd.f32 %v1388_v17, %v1346_v34  ;;  %v1407_v11 = vpop.f32.mrf.mxu3  ;;  %v1135_v17 = vadd.f32 %v1134_v59, %v4964_v36 }
 0x4eb   : > { %v4986_v20 = vadd.f32 %v1407_v11, %v1347_v19  ;;  %v1319_v28 = vpop.f32.mrf.mxu0  ;;  %v1116_v19 = vadd.f32 %v1115_v50, %v4962_v35 }
 0x4ec   : > { %v1243_v2 = vadd.f32 %v1232_v49, %v1135_v17  ;;  %v1861_v22 = vpop.permute.xlu0 %1860 }
 0x4ed   : > { %v1338_v62 = vpop.f32.mrf.mxu1  ;;  %v1242_v11 = vadd.f32 %v1213_v3, %v1116_v19 }
 0x4ee   : > { %v1349_v1 = vadd.f32 %v1338_v62, %v1243_v2 }
 0x4ef   : > { %v1348_v25 = vadd.f32 %v1319_v28, %v1242_v11 }
 0x4f1   : > { %v1390_v39 = vpop.f32.mrf.mxu2 }
 0x4f2   : > { %v1409_v48 = vpop.f32.mrf.mxu3  ;;  %v1419_v24 = vadd.f32 %v1390_v39, %v1348_v25  ;;  %v1866_v25 = vpop.permute.xlu2 %1865 }
 0x4f3   : > { %v1322_v37 = vpop.f32.mrf.mxu0  ;;  %v1420_v38 = vadd.f32 %v1409_v48, %v1349_v1  ;;  %v1140_v1 = vadd.f32 %v4978_v13, %v4972_v61 }
 0x4f4   : > { %v1350_v59 = vadd.f32 %v1322_v37, %v1244_v51 }
 0x4f5   : > { %v1341_v60 = vpop.f32.mrf.mxu1 }
 0x4f6   : > { %v1351_v28 = vadd.f32 %v1341_v60, %v4974_v15 }
 0x4f9   : > { %v1393_v56 = vpop.f32.mrf.mxu2 }
 0x4fa   : > { %v1412_v58 = vpop.f32.mrf.mxu3  ;;  %v1421_v2 = vadd.f32 %v1393_v56, %v1350_v59  ;;  %v1247_v56 = vadd.f32 %v4982_v9, %v1140_v1  ;;  %v1903_v59 = vpop.permute.xlu1 %1902 }
 0x4fb   : > { %v4988_v63 = vpop.f32.mrf.mxu0  ;;  %v1422_v39 = vadd.f32 %v1412_v58, %v1351_v28 }
 0x4fd   : > { %v4990_v32 = vpop.f32.mrf.mxu1 }
 0x501   : > { %v4992_v40 = vpop.f32.mrf.mxu2 }
 0x502   : > { %v4994_v12 = vpop.f32.mrf.mxu3 }
 0x503   : > { %v4996_v14 = vpop.f32.mrf.mxu0 }
 0x505   : > { %v4998_v5 = vpop.f32.mrf.mxu1 }
 0x509   : > { %v5000_v6 = vpop.f32.mrf.mxu2 }
 0x50a   : > { %v5002_v16 = vpop.f32.mrf.mxu3 }
 0x50b   : > { %v1496_v7 = vpop.f32.mrf.mxu0 }
 0x50c   : > { %v1525_v43 = vadd.f32 %v1496_v7, %v1419_v24  ;;  %v1121_v24 = vadd.f32 %v4976_v27, %v4970_v45 }
 0x50d   : > { %v1515_v8 = vpop.f32.mrf.mxu1 }
 0x50e   : > { %v1526_v53 = vadd.f32 %v1515_v8, %v1420_v38  ;;  %v1246_v15 = vadd.f32 %v4980_v26, %v1121_v24 }
 0x510   : > { %v1352_v45 = vadd.f32 %v4988_v63, %v1246_v15  ;;  %v1898_v63 = vpop.permute.xlu2 %1897 }
 0x511   : > { %v1602_v21 = vpop.f32.mrf.mxu2 }
 0x512   : > { %v1621_v0 = vpop.f32.mrf.mxu3  ;;  %v1631_v35 = vadd.f32 %v1602_v21, %v1525_v43 }
 0x513   : > { %v1499_v10 = vpop.f32.mrf.mxu0  ;;  %v1632_v50 = vadd.f32 %v1621_v0, %v1526_v53  ;;  %v1893_v53 = vpop.permute.xlu0 %1892  ;;  %v1353_v0 = vadd.f32 %v4990_v32, %v1247_v56  ;;  %v1524_v32 = vadd.f32 %v4998_v5, %v4986_v20 }
 0x514   : > { %v1527_v38 = vadd.f32 %v1499_v10, %v1421_v2 }
 0x515   : > { %v1518_v42 = vpop.f32.mrf.mxu1  ;;  %v1424_v9 = vadd.f32 %v4994_v12, %v1353_v0  ;;  %v1932_v0 = vld [vmem:[%s5808_s8 + $0x18] sm:$0xff] }
 0x516   : > { %v1528_v51 = vadd.f32 %v1518_v42, %v1422_v39 }
 0x519   : > { %v1605_v31 = vpop.f32.mrf.mxu2 }
 0x51a   : > { %v1624_v54 = vpop.f32.mrf.mxu3  ;;  %v1633_v37 = vadd.f32 %v1605_v31, %v1527_v38 }
 0x51b   : > { %v1501_v4 = vpop.f32.mrf.mxu0  ;;  %v1634_v58 = vadd.f32 %v1624_v54, %v1528_v51 }
 0x51d   : > { %v5004_v52 = vpop.f32.mrf.mxu1 }
 0x521   : > { %v5008_v34 = vpop.f32.mrf.mxu2 }
 0x522   : > { %v5010_v41 = vpop.f32.mrf.mxu3 }
 0x527   : > { %v5014_v44 = vpop.f32.mrf.mxu0 }
 0x528   : > { %v5016_v23 = vpop.f32.mrf.mxu1 }
 0x529   : > { %v5018_v57 = vpop.f32.mrf.mxu2 }
 0x52a   : > { %v5020_v55 = vpop.f32.mrf.mxu3 }
 0x52f   : > { %v1708_v36 = vpop.f32.mrf.mxu0 }
 0x530   : > { %v1737_v3 = vadd.f32 %v1708_v36, %v1631_v35  ;;  %v1727_v49 = vpop.f32.mrf.mxu1  ;;  %v1523_v35 = vadd.f32 %v4996_v14, %v4984_v29 }
 0x531   : > { %v1738_v19 = vadd.f32 %v1727_v49, %v1632_v50  ;;  %v1814_v17 = vpop.f32.mrf.mxu2  ;;  %v1530_v50 = vadd.f32 %v5004_v52, %v1424_v9  ;;  %v1630_v49 = vadd.f32 %v5002_v16, %v1524_v32 }
 0x532   : > { %v1843_v62 = vadd.f32 %v1814_v17, %v1737_v3  ;;  %v1833_v11 = vpop.f32.mrf.mxu3  ;;  %v1629_v12 = vadd.f32 %v5000_v6, %v1523_v35 }
 0x533   : > { %v1844_v47 = vadd.f32 %v1833_v11, %v1738_v19  ;;  %v1736_v20 = vadd.f32 %v5016_v23, %v1630_v49 }
 0x534   : > { %v1875_v43 = vadd.f32 %v1861_v22, %v1843_v62  ;;  %v1735_v14 = vadd.f32 %v5014_v44, %v1629_v12  ;;  %v1856_v44 = vpop.permute.xlu1 %1855 }
 0x535   : > { %v1876_v48 = vadd.f32 %v1861_v22, %v1844_v47  ;;  %v1423_v22 = vadd.f32 %v4992_v40, %v1352_v45  ;;  %v5061_v45 = vld [vmem:[%s5808_s8] sm:$0xff] }
 0x536   : > { %v5028_v60 = vadd.f32 %v1893_v53, %v1875_v43  ;;  %v1841_v16 = vadd.f32 %v5018_v57, %v1735_v14 }
 0x537   : > { %v1711_v7 = vpop.f32.mrf.mxu0  ;;  %v5031_v8 = vadd.f32 %v1893_v53, %v1876_v48  ;;  %v1529_v31 = vadd.f32 %v1501_v4, %v1423_v22  ;;  %v1636_v4 = vadd.f32 %v5010_v41, %v1530_v50  ;;  %v1842_v41 = vadd.f32 %v5020_v55, %v1736_v20  ;;  %v1888_v53 = vpop.permute.xlu2 %1887 }
 0x538   : > { %v1739_v27 = vadd.f32 %v1711_v7, %v1633_v37  ;;  %v1730_v21 = vpop.f32.mrf.mxu1  ;;  %v1873_v38 = vadd.f32 %v1856_v44, %v1841_v16 }
 0x539   : > { %v1740_v61 = vadd.f32 %v1730_v21, %v1634_v58  ;;  %v1817_v13 = vpop.f32.mrf.mxu2  ;;  %v1916_v47 = vadd.f32 %v5031_v8, %v5028_v60  ;;  %v1635_v40 = vadd.f32 %v5008_v34, %v1529_v31  ;;  %v1874_v23 = vadd.f32 %v1856_v44, %v1842_v41  ;;  %v1931_v21 = vld [vmem:[%s5808_s8 + $0x10] sm:$0xff] }
 0x53a   : > { %v1845_v26 = vadd.f32 %v1817_v13, %v1739_v27  ;;  %v1836_v10 = vpop.f32.mrf.mxu3  ;;  %v1905_v1 = vadd.f32 %v1888_v53, %v1873_v38  ;;  %v1930_v27 = vld [vmem:[%s5808_s8 + $0x8] sm:$0xff] }
 0x53b   : > { %v1846_v42 = vadd.f32 %v1836_v10, %v1740_v61  ;;  %1917 = vadd.xlane.f32.xlu2 %v1916_v47  ;;  %v1906_v51 = vadd.f32 %v1888_v53, %v1874_v23 }
 0x53c   : > { %v1877_v54 = vadd.f32 %v1866_v25, %v1845_v26 }
 0x53d   : > { %v1878_v36 = vadd.f32 %v1866_v25, %v1846_v42  ;;  %v1913_v48 = vadd.f32 %v1906_v51, %v1905_v1 }
 0x53e   : > { %v1909_v3 = vadd.f32 %v1898_v63, %v1877_v54 }
 0x53f   : > { %v1713_v28 = vpop.f32.mrf.mxu0  ;;  %v1910_v19 = vadd.f32 %v1898_v63, %v1878_v36 }
 0x540   : > { %v1741_v17 = vadd.f32 %v1713_v28, %v1635_v40  ;;  %v1732_v29 = vpop.f32.mrf.mxu1  ;;  %v2134_v40 = vld [vmem:[%s5810_s10 + $0x18] sm:$0xff] }
 0x541   : > { %v1742_v5 = vadd.f32 %v1732_v29, %v1636_v4  ;;  %v1819_v52 = vpop.f32.mrf.mxu2  ;;  %v1919_v2 = vadd.f32 %v1910_v19, %v1909_v3 }
 0x542   : > { %v1847_v62 = vadd.f32 %v1819_v52, %v1741_v17  ;;  %v1838_v34 = vpop.f32.mrf.mxu3  ;;  %v2131_v52 = vld [vmem:[%s5810_s10] sm:$0xff] }
 0x543   : > { %v1848_v11 = vadd.f32 %v1838_v34, %v1742_v5  ;;  %1920 = vadd.xlane.f32.xlu0 %v1919_v2  ;;  %v2133_v5 = vld [vmem:[%s5810_s10 + $0x10] sm:$0xff] }
 0x544   : > { %v1879_v6 = vadd.f32 %v5006_v30, %v1847_v62 }
 0x545   : > { %v1880_v25 = vadd.f32 %v5006_v30, %v1848_v11 }
 0x546   : > { %v1911_v39 = vadd.f32 %v1903_v59, %v1879_v6 }
 0x547   : > { %v1912_v24 = vadd.f32 %v1903_v59, %v1880_v25 }
 0x549   : > { %v1922_v43 = vadd.f32 %v1912_v24, %v1911_v39 }
 0x54b   : > { %1923 = vadd.xlane.f32.xlu1 %v1922_v43 }
 0x553   : > { %1914 = vadd.xlane.f32.xlu1 %v1913_v48 }
 0x5ae   : > { %v1918_v56 = vpop.xlane.xlu2 %1917 }
 0x5af   : > { %v1926_v30 = vmul.f32 %v1918_v56, %v4228_v18 }
 0x5b6   : > { %v1921_v15 = vpop.xlane.xlu0 %1920 }
 0x5b7   : > { %v1927_v55 = vmul.f32 %v1921_v15, %v4228_v18 }
 0x5be   : > { %v1924_v37 = vpop.xlane.xlu1 %1923 }
 0x5bf   : > { %v1928_v57 = vmul.f32 %v1924_v37, %v4228_v18  ;;  %v2095_v37 = vld [vmem:[%s5809_s9] sm:$0xff] }
 0x5c1   : > { %1957 = vmatpush.msrb.mxu0 %v1928_v57 }
 0x5c3   : > { %1958 = vmatpush.msrb.mxu0 %v1927_v55 }
 0x5c5   : > { %1959 = vmatpush.msrb.mxu0 %v1926_v30 }
 0x5c6   : > { %v1915_v58 = vpop.xlane.xlu1 %1914 }
 0x5c7   : > { %v1925_v7 = vmul.f32 %v1915_v58, %v4228_v18 }
 0x5c9   : > { %1960 = vmatpush.msrb.mxu0 %v1925_v7 }
 0x5ca   : > { %3508 = vmatmul.msk.f32.vlgmr.msrb.gmra.mxu0 %vm554_vm1, %v5061_v45 }
 0x5d2   : > { %3509 = vmatmul.msk.f32.gmra.mxu0 %vm554_vm1, %v1930_v27 }
 0x5da   : > { %3510 = vmatmul.msk.f32.gmra.mxu0 %vm554_vm1, %v1931_v21 }
 0x5e2   : > { %3511 = vmatmul.msk.f32.gmra.mxu0 %vm554_vm1, %v1932_v0 }
 0x647   : > { %v1962_v61 = vpop.f32.mrf.mxu0 }
 0x64f   : > { %v1965_v13 = vpop.f32.mrf.mxu0 }
 0x650   : > { %1981 = vperm.xlu1 %3752, %v1965_v13  }
 0x657   : > { %v1968_v47 = vpop.f32.mrf.mxu0 }
 0x658   : > { %1986 = vperm.xlu2 %3750, %v1968_v47  }
 0x65f   : > { %v1971_v22 = vpop.f32.mrf.mxu0 }
 0x660   : > { %1991 = vperm.xlu0 %3751, %v1971_v22  }
 0x668   : > { %1976 = vperm.xlu0 %3751, %v1962_v61  }
 0x6b2   : > { %v1987_v26 = vpop.permute.xlu2 %1986 }
 0x6b3   : > { %v5077_v10 = vsub.f32 %v1909_v3, %v1987_v26  ;;  %v5079_v9 = vsub.f32 %v1910_v19, %v1987_v26 }
 0x6b5   : > { %v2006_v42 = vmul.f32 %v5077_v10, %v5077_v10  ;;  %v2007_v31 = vmul.f32 %v5079_v9, %v5079_v9 }
 0x6b7   : > { %v2016_v54 = vadd.f32 %v2007_v31, %v2006_v42  ;;  %v2097_v42 = vld [vmem:[%s5809_s9 + $0x10] sm:$0xff] }
 0x6b9   : > { %2017 = vadd.xlane.f32.xlu0 %v2016_v54 }
 0x6c2   : > { %v1982_v63 = vpop.permute.xlu1 %1981 }
 0x6c3   : > { %v5086_v35 = vsub.f32 %v5028_v60, %v1982_v63  ;;  %v5089_v32 = vsub.f32 %v5031_v8, %v1982_v63 }
 0x6c5   : > { %v2004_v50 = vmul.f32 %v5086_v35, %v5086_v35  ;;  %v2005_v36 = vmul.f32 %v5089_v32, %v5089_v32 }
 0x6c7   : > { %v2013_v59 = vadd.f32 %v2005_v36, %v2004_v50 }
 0x6c9   : > { %2014 = vadd.xlane.f32.xlu1 %v2013_v59 }
 0x6cd   : > { %2152 = vperm.xlu0 %3751, %v2134_v40  }
 0x6d2   : > { %v1992_v3 = vpop.permute.xlu0 %1991 }
 0x6d3   : > { %v5098_v12 = vsub.f32 %v1911_v39, %v1992_v3  ;;  %v5100_v60 = vsub.f32 %v1912_v24, %v1992_v3 }
 0x6d5   : > { %v2008_v8 = vmul.f32 %v5098_v12, %v5098_v12  ;;  %v2009_v49 = vmul.f32 %v5100_v60, %v5100_v60 }
 0x6d7   : > { %v2019_v4 = vadd.f32 %v2009_v49, %v2008_v8  ;;  %v2098_v8 = vld [vmem:[%s5809_s9 + $0x18] sm:$0xff] }
 0x6d9   : > { %2020 = vadd.xlane.f32.xlu2 %v2019_v4  ;;  %v2132_v4 = vld [vmem:[%s5810_s10 + $0x8] sm:$0xff] }
 0x6da   : > { %v1977_v28 = vpop.permute.xlu0 %1976 }
 0x6db   : > { %v5106_v19 = vsub.f32 %v1905_v1, %v1977_v28  ;;  %v5108_v17 = vsub.f32 %v1906_v51, %v1977_v28 }
 0x6dd   : > { %v2002_v29 = vmul.f32 %v5106_v19, %v5106_v19  ;;  %v2003_v14 = vmul.f32 %v5108_v17, %v5108_v17 }
 0x6df   : > { %v2010_v20 = vadd.f32 %v2003_v14, %v2002_v29 }
 0x6e1   : > { %2011 = vadd.xlane.f32.xlu2 %v2010_v20  ;;  %v2096_v20 = vld [vmem:[%s5809_s9 + $0x8] sm:$0xff] }
 0x6f9   : > { %2147 = vperm.xlu2 %3750, %v2133_v5  }
 0x701   : > { %2137 = vperm.xlu2 %3750, %v2131_v52  }
 0x72c   : > { %v2018_v2 = vpop.xlane.xlu0 %2017 }
 0x72d   : > { %v2024_v6 = vmul.f32 %v2018_v2, %v4228_v18 }
 0x73c   : > { %v2015_v11 = vpop.xlane.xlu1 %2014 }
 0x73d   : > { %v2023_v16 = vmul.f32 %v2015_v11, %v4228_v18 }
 0x73f   : > { %v2153_v52 = vpop.permute.xlu0 %2152 }
 0x74c   : > { %v2021_v62 = vpop.xlane.xlu2 %2020 }
 0x74d   : > { %v2025_v34 = vmul.f32 %v2021_v62, %v4228_v18 }
 0x74f   : > { %2038 = vmatpush.msrb.mxu1 %v2025_v34 }
 0x751   : > { %2039 = vmatpush.msrb.mxu1 %v2024_v6 }
 0x753   : > { %2040 = vmatpush.msrb.mxu1 %v2023_v16 }
 0x754   : > { %v2012_v41 = vpop.xlane.xlu2 %2011 }
 0x755   : > { %v2022_v25 = vmul.f32 %v2012_v41, %v4228_v18 }
 0x757   : > { %2041 = vmatpush.msrb.mxu1 %v2022_v25 }
 0x758   : > { %3512 = vmatmul.msk.f32.vlgmr.msrb.gmra.mxu1 %vm554_vm1, %v5061_v45 }
 0x75c   : > { %v2148_v2 = vpop.permute.xlu2 %2147 }
 0x760   : > { %3513 = vmatmul.msk.f32.gmra.mxu1 %vm554_vm1, %v1930_v27 }
 0x764   : > { %v2138_v6 = vpop.permute.xlu2 %2137 }
 0x768   : > { %3514 = vmatmul.msk.f32.gmra.mxu1 %vm554_vm1, %v1931_v21 }
 0x770   : > { %3515 = vmatmul.msk.f32.gmra.mxu1 %vm554_vm1, %v1932_v0 }
 0x7d5   : > { %v2043_v39 = vpop.f32.mrf.mxu1 }
 0x7d6   : > { %v2044_v24 = vadd.f32 1e-05, %v2043_v39 }
 0x7d8   : > { %3797 = vrsqrt.f32 %v2044_v24  ;;  %vm2061_vm10 = vweird.f32 %v2044_v24 }
 0x7dd   : > { %v2046_v44 = vpop.f32.mrf.mxu1 }
 0x7de   : > { %v3798_v38 = vpop.eup %3797  ;;  %v2047_v51 = vadd.f32 1e-05, %v2046_v44 }
 0x7df   : > { %v2056_v23 = vmul.f32 %v3798_v38, %v2044_v24  ;;  %vm2062_vm9 = vweird.f32 %v3798_v38 }
 0x7e0   : > { %vm2063_vm11 = vmor %vm2061_vm10, %vm2062_vm9 }
 0x7e1   : > { %v2057_v43 = vmul.f32 %v3798_v38, %v2056_v23 }
 0x7e3   : > { %v2058_v53 = vmul.f32 0.5, %v2057_v43 }
 0x7e5   : > { %v2059_v1 = vsub.f32 1.5, %v2058_v53  ;;  %v2049_v18 = vpop.f32.mrf.mxu1 }
 0x7e6   : > { %v2050_v48 = vadd.f32 1e-05, %v2049_v18 }
 0x7e7   : > { %v2060_v15 = vmul.f32 %v3798_v38, %v2059_v1 }
 0x7e8   : > { %3799 = vrsqrt.f32 %v2050_v48  ;;  %vm2081_vm13 = vweird.f32 %v2050_v48 }
 0x7e9   : > { %v2064_v57 = vsel %vm2063_vm11, %v3798_v38, %v2060_v15  ;;  %3801 = vrsqrt.f32 %v2047_v51 }
 0x7ea   : > { %v2099_v56 = vmul.f32 %v2095_v37, %v2064_v57 }
 0x7ec   : > { %2105 = vperm.xlu0 %3751, %v2099_v56  }
 0x7ed   : > { %v2052_v55 = vpop.f32.mrf.mxu1 }
 0x7ee   : > { %v3800_v30 = vpop.eup %3799  ;;  %v2053_v58 = vadd.f32 1e-05, %v2052_v55 }
 0x7ef   : > { %v2076_v7 = vmul.f32 %v3800_v30, %v2050_v48  ;;  %v3802_v45 = vpop.eup %3801  ;;  %vm2082_vm12 = vweird.f32 %v3800_v30 }
 0x7f0   : > { %3803 = vrsqrt.f32 %v2053_v58  ;;  %v2066_v21 = vmul.f32 %v3802_v45, %v2047_v51  ;;  %vm2083_vm14 = vmor %vm2081_vm13, %vm2082_vm12  ;;  %vm2091_vm9 = vweird.f32 %v2053_v58  ;;  %vm2072_vm11 = vweird.f32 %v3802_v45 }
 0x7f1   : > { %v2077_v27 = vmul.f32 %v3800_v30, %v2076_v7  ;;  %vm2071_vm12 = vweird.f32 %v2047_v51 }
 0x7f2   : > { %v2067_v47 = vmul.f32 %v3802_v45, %v2066_v21  ;;  %vm2073_vm13 = vmor %vm2071_vm12, %vm2072_vm11 }
 0x7f3   : > { %v2078_v0 = vmul.f32 0.5, %v2077_v27 }
 0x7f4   : > { %v2068_v50 = vmul.f32 0.5, %v2067_v47 }
 0x7f5   : > { %v2079_v61 = vsub.f32 1.5, %v2078_v0 }
 0x7f6   : > { %v3804_v13 = vpop.eup %3803  ;;  %v2069_v40 = vsub.f32 1.5, %v2068_v50 }
 0x7f7   : > { %v2086_v22 = vmul.f32 %v3804_v13, %v2053_v58  ;;  %v2080_v26 = vmul.f32 %v3800_v30, %v2079_v61  ;;  %vm2092_vm15 = vweird.f32 %v3804_v13 }
 0x7f8   : > { %vm2093_vm10 = vmor %vm2091_vm9, %vm2092_vm15  ;;  %v2070_v29 = vmul.f32 %v3802_v45, %v2069_v40 }
 0x7f9   : > { %v2087_v31 = vmul.f32 %v3804_v13, %v2086_v22  ;;  %v2084_v54 = vsel %vm2083_vm14, %v3800_v30, %v2080_v26 }
 0x7fa   : > { %v2101_v63 = vmul.f32 %v2097_v42, %v2084_v54  ;;  %v2074_v14 = vsel %vm2073_vm13, %v3802_v45, %v2070_v29 }
 0x7fb   : > { %v2088_v36 = vmul.f32 0.5, %v2087_v31  ;;  %v2100_v5 = vmul.f32 %v2096_v20, %v2074_v14 }
 0x7fc   : > { %2115 = vperm.xlu0 %3751, %v2101_v63  }
 0x7fd   : > { %v2089_v59 = vsub.f32 1.5, %v2088_v36 }
 0x7ff   : > { %v2090_v3 = vmul.f32 %v3804_v13, %v2089_v59 }
 0x801   : > { %v2094_v49 = vsel %vm2093_vm10, %v3804_v13, %v2090_v3 }
 0x802   : > { %v2102_v28 = vmul.f32 %v2098_v8, %v2094_v49 }
 0x804   : > { %2120 = vperm.xlu1 %3752, %v2102_v28   ;;  %2142 = vperm.xlu0 %3751, %v2132_v4  }
 0x80c   : > { %2110 = vperm.xlu1 %3752, %v2100_v5  }
 0x85e   : > { %v2106_v62 = vpop.permute.xlu0 %2105 }
 0x85f   : > { %v2123_v34 = vmul.f32 %v2106_v62, %v5106_v19  ;;  %v2124_v11 = vmul.f32 %v2106_v62, %v5108_v17 }
 0x861   : > { %v5146_v16 = vadd.f32 %v2138_v6, %v2123_v34  ;;  %v5148_v41 = vadd.f32 %v2138_v6, %v2124_v11 }
 0x863   : > { %v2163_v25 = vsub.f32 0.0, %v5146_v16  ;;  %v2164_v39 = vsub.f32 0.0, %v5148_v41 }
 0x865   : > { %v2171_v24 = vmul.f32 1.442695, %v2163_v25  ;;  %v2173_v44 = vmul.f32 1.442695, %v2164_v39 }
 0x867   : > { %3805 = vpow2.f32 %v2171_v24 }
 0x868   : > { %3807 = vpow2.f32 %v2173_v44 }
 0x86d   : > { %v3806_v38 = vpop.eup %3805 }
 0x86e   : > { %v3808_v23 = vpop.eup %3807  ;;  %v2187_v43 = vadd.f32 1.0, %v3806_v38  ;;  %v2116_v53 = vpop.permute.xlu0 %2115 }
 0x86f   : > { %v2188_v19 = vadd.f32 1.0, %v3808_v23  ;;  %v2127_v17 = vmul.f32 %v2116_v53, %v5077_v10  ;;  %v2128_v1 = vmul.f32 %v2116_v53, %v5079_v9 }
 0x870   : > { %3809 = vrcp.f32 %v2187_v43  ;;  %v2204_v7 = vand.u32 2147483647, %v2187_v43  ;;  %v2206_v27 = vand.u32 2147483648, %v2187_v43  ;;  %vm2200_vm15 = vweird.f32 %v2187_v43 }
 0x871   : > { %3811 = vrcp.f32 %v2188_v19  ;;  %v5154_v18 = vadd.f32 %v2148_v2, %v2127_v17  ;;  %v5157_v15 = vadd.f32 %v2148_v2, %v2128_v1  ;;  %v2219_v0 = vand.u32 2147483647, %v2188_v19 }
 0x872   : > { %v2221_v47 = vand.u32 2147483648, %v2188_v19  ;;  %vm2215_vm10 = vweird.f32 %v2188_v19  ;;  %vm2205_vm12 = vcmp.eq.f32.partialorder %v2204_v7, 8.507059e+37  ;;  %v2207_v54 = vor.u32 1.1754944e-38, %v2206_v27 }
 0x873   : > { %v2167_v51 = vsub.f32 0.0, %v5154_v18  ;;  %v2168_v61 = vsub.f32 0.0, %v5157_v15  ;;  %vm2220_vm7 = vcmp.eq.f32.partialorder %v2219_v0, 8.507059e+37 }
 0x874   : > { %v2222_v40 = vor.u32 1.1754944e-38, %v2221_v47 }
 0x875   : > { %v2179_v37 = vmul.f32 1.442695, %v2167_v51  ;;  %v2181_v50 = vmul.f32 1.442695, %v2168_v61 }
 0x876   : > { %v3810_v48 = vpop.eup %3809  ;;  %v2121_v57 = vpop.permute.xlu1 %2120 }
 0x877   : > { %v3812_v56 = vpop.eup %3811  ;;  %v2196_v55 = vmul.f32 %v3810_v48, %v2187_v43  ;;  %v2130_v30 = vmul.f32 %v2121_v57, %v5100_v60  ;;  %3813 = vpow2.f32 %v2179_v37  ;;  %v2129_v45 = vmul.f32 %v2121_v57, %v5098_v12  ;;  %v2143_v5 = vpop.permute.xlu0 %2142 }
 0x878   : > { %v2211_v58 = vmul.f32 %v3812_v56, %v2188_v19  ;;  %vm2201_vm14 = vweird.f32 %v3810_v48  ;;  %vm2216_vm9 = vweird.f32 %v3812_v56 }
 0x879   : > { %v2197_v10 = vsub.f32 1.0, %v2196_v55  ;;  %v5161_v9 = vadd.f32 %v2153_v52, %v2130_v30  ;;  %v5165_v42 = vadd.f32 %v2153_v52, %v2129_v45  ;;  %vm2202_vm11 = vmor %vm2200_vm15, %vm2201_vm14 }
 0x87a   : > { %v2212_v21 = vsub.f32 1.0, %v2211_v58  ;;  %vm2217_vm13 = vmor %vm2215_vm10, %vm2216_vm9 }
 0x87b   : > { %v2198_v13 = vmul.f32 %v3810_v48, %v2197_v10  ;;  %v2170_v22 = vsub.f32 0.0, %v5161_v9  ;;  %v2169_v14 = vsub.f32 0.0, %v5165_v42 }
 0x87c   : > { %v2213_v60 = vmul.f32 %v3812_v56, %v2212_v21 }
 0x87d   : > { %v2199_v26 = vadd.f32 %v3810_v48, %v2198_v13  ;;  %v2185_v12 = vmul.f32 1.442695, %v2170_v22  ;;  %v3814_v31 = vpop.eup %3813 }
 0x87e   : > { %v2214_v63 = vadd.f32 %v3812_v56, %v2213_v60  ;;  %v2111_v36 = vpop.permute.xlu1 %2110  ;;  %v2191_v3 = vadd.f32 1.0, %v3814_v31 }
 0x87f   : > { %v2203_v59 = vsel %vm2202_vm11, %v3810_v48, %v2199_v26  ;;  %3815 = vpow2.f32 %v2185_v12  ;;  %v2125_v4 = vmul.f32 %v2111_v36, %v5086_v35  ;;  %v2126_v52 = vmul.f32 %v2111_v36, %v5089_v32 }
 0x880   : > { %v2208_v8 = vsel %vm2205_vm12, %v2207_v54, %v2203_v59  ;;  %v2218_v49 = vsel %vm2217_vm13, %v3812_v56, %v2214_v63  ;;  %3817 = vrcp.f32 %v2191_v3  ;;  %v2183_v35 = vmul.f32 1.442695, %v2169_v14 }
 0x881   : > { %v2223_v28 = vsel %vm2220_vm7, %v2222_v40, %v2218_v49  ;;  %v5169_v29 = vmul.f32 %v2208_v8, %v5146_v16  ;;  %3819 = vpow2.f32 %v2181_v50  ;;  %v5178_v2 = vadd.f32 %v2143_v5, %v2125_v4 }
 0x882   : > { %v5173_v20 = vmul.f32 %v2223_v28, %v5148_v41  ;;  %v5182_v62 = vadd.f32 %v2143_v5, %v2126_v52  ;;  %3821 = vpow2.f32 %v2183_v35  ;;  %v2264_v44 = vand.u32 2147483647, %v2191_v3 }
 0x883   : > { %2363 = vrot.lane.b32.xlu2 %v5169_v29, %s4017_s6  ;;  %v2165_v25 = vsub.f32 0.0, %v5178_v2  ;;  %v2266_v38 = vand.u32 2147483648, %v2191_v3  ;;  %vm2260_vm14 = vweird.f32 %v2191_v3 }
 0x884   : > { %2371 = vrot.lane.b32.xlu1 %v5173_v20, %s4017_s6  ;;  %v2166_v32 = vsub.f32 0.0, %v5182_v62  ;;  %vm2265_vm9 = vcmp.eq.f32.partialorder %v2264_v44, 8.507059e+37 }
 0x885   : > { %v3816_v34 = vpop.eup %3815  ;;  %v2175_v43 = vmul.f32 1.442695, %v2165_v25  ;;  %v2267_v1 = vor.u32 1.1754944e-38, %v2266_v38 }
 0x886   : > { %v3818_v11 = vpop.eup %3817  ;;  %v5184_v6 = vadd.f32 1.0, %v3816_v34  ;;  %v2177_v53 = vmul.f32 1.442695, %v2166_v32 }
 0x887   : > { %v3820_v16 = vpop.eup %3819  ;;  %v2256_v41 = vmul.f32 %v3818_v11, %v2191_v3  ;;  %vm2261_vm7 = vweird.f32 %v3818_v11 }
 0x888   : > { %v5188_v24 = vadd.f32 1.0, %v3820_v16  ;;  %3823 = vrcp.f32 %v5184_v6  ;;  %v3822_v17 = vpop.eup %3821  ;;  %vm2262_vm15 = vmor %vm2260_vm14, %vm2261_vm7  ;;  %vm2305_vm11 = vweird.f32 %v5184_v6  ;;  %v2309_v26 = vand.u32 2147483647, %v5184_v6 }
 0x889   : > { %v2257_v39 = vsub.f32 1.0, %v2256_v41  ;;  %3825 = vpow2.f32 %v2175_v43  ;;  %v5195_v56 = vadd.f32 1.0, %v3822_v17  ;;  %v2311_v54 = vand.u32 2147483648, %v5184_v6 }
 0x88a   : > { %3827 = vpow2.f32 %v2177_v53  ;;  %v2281_v22 = vand.u32 2147483648, %v5188_v24  ;;  %vm5223_vm14 = vcmp.eq.f32.partialorder %v2309_v26, 8.507059e+37  ;;  %vm2275_vm6 = vweird.f32 %v5188_v24  ;;  %v5887_v26 = vld [vmem:[#allocation17_spill] sm:$0xff] }
 0x88b   : > { %v2258_v23 = vmul.f32 %v3818_v11, %v2257_v39  ;;  %3829 = vrcp.f32 %v5188_v24  ;;  %v2312_v35 = vor.u32 1.1754944e-38, %v2311_v54 }
 0x88c   : > { %3831 = vrcp.f32 %v5195_v56 }
 0x88d   : > { %v2259_v19 = vadd.f32 %v3818_v11, %v2258_v23  ;;  %v2279_v23 = vand.u32 2147483647, %v5188_v24 }
 0x88e   : > { %v3824_v48 = vpop.eup %3823 }
 0x88f   : > { %v2263_v51 = vsel %vm2262_vm15, %v3818_v11, %v2259_v19  ;;  %v3826_v55 = vpop.eup %3825  ;;  %v2301_v30 = vmul.f32 %v3824_v48, %v5184_v6  ;;  %vm2306_vm12 = vweird.f32 %v3824_v48 }
 0x890   : > { %v2268_v37 = vsel %vm2265_vm9, %v2267_v1, %v2263_v51  ;;  %v3828_v58 = vpop.eup %3827  ;;  %v2189_v10 = vadd.f32 1.0, %v3826_v55  ;;  %vm5219_vm7 = vmor %vm2305_vm11, %vm2306_vm12  ;;  %v2282_v51 = vor.u32 1.1754944e-38, %v2281_v22 }
 0x891   : > { %v5193_v57 = vmul.f32 %v2268_v37, %v5154_v18  ;;  %v5200_v7 = vpop.eup %3829  ;;  %v2190_v45 = vadd.f32 1.0, %v3828_v58  ;;  %v2302_v27 = vsub.f32 1.0, %v2301_v30  ;;  %v2294_v37 = vand.u32 2147483647, %v5195_v56 }
 0x892   : > { %3833 = vrcp.f32 %v2189_v10  ;;  %v2271_v18 = vmul.f32 %v5200_v7, %v5188_v24  ;;  %v5205_v21 = vpop.eup %3831  ;;  %vm2276_vm10 = vweird.f32 %v5200_v7  ;;  %v2236_v59 = vand.u32 2147483648, %v2189_v10 }
 0x893   : > { %2367 = vrot.lane.b32.xlu1 %v5193_v57, %s4017_s6  ;;  %3835 = vrcp.f32 %v2190_v45  ;;  %v2303_v0 = vmul.f32 %v3824_v48, %v2302_v27  ;;  %v2286_v36 = vmul.f32 %v5205_v21, %v5195_v56  ;;  %v2234_v8 = vand.u32 2147483647, %v2189_v10 }
 0x894   : > { %v2272_v13 = vsub.f32 1.0, %v2271_v18  ;;  %v2251_v49 = vand.u32 2147483648, %v2190_v45  ;;  %v2249_v5 = vand.u32 2147483647, %v2190_v45  ;;  %vm2230_vm9 = vweird.f32 %v2189_v10 }
 0x895   : > { %v2304_v31 = vadd.f32 %v3824_v48, %v2303_v0  ;;  %v2237_v6 = vor.u32 1.1754944e-38, %v2236_v59  ;;  %vm2245_vm12 = vweird.f32 %v2190_v45  ;;  %v2287_v41 = vsub.f32 1.0, %v2286_v36 }
 0x896   : > { %v2273_v50 = vmul.f32 %v5200_v7, %v2272_v13  ;;  %vm2235_vm8 = vcmp.eq.f32.partialorder %v2234_v8, 8.507059e+37  ;;  %v2252_v32 = vor.u32 1.1754944e-38, %v2251_v49 }
 0x897   : > { %v2308_v52 = vsel %vm5219_vm7, %v3824_v48, %v2304_v31  ;;  %vm2250_vm7 = vcmp.eq.f32.partialorder %v2249_v5, 8.507059e+37  ;;  %v2288_v24 = vmul.f32 %v5205_v21, %v2287_v41  ;;  %v2296_v48 = vand.u32 2147483648, %v5195_v56 }
 0x898   : > { %v3834_v61 = vpop.eup %3833  ;;  %v2274_v11 = vadd.f32 %v5200_v7, %v2273_v50  ;;  %v2313_v39 = vsel %vm5223_vm14, %v2312_v35, %v2308_v52  ;;  %vm2295_vm14 = vcmp.eq.f32.partialorder %v2294_v37, 8.507059e+37  ;;  %v5888_v37 = vld [vmem:[#allocation20_spill] sm:$0xff] }
 0x899   : > { %v3836_v47 = vpop.eup %3835  ;;  %v2226_v60 = vmul.f32 %v3834_v61, %v2189_v10  ;;  %vm2231_vm13 = vweird.f32 %v3834_v61  ;;  %v5247_v1 = vmul.f32 %v2313_v39, %v5161_v9  ;;  %v2297_v30 = vor.u32 1.1754944e-38, %v2296_v48 }
 0x89a   : > { %v2241_v12 = vmul.f32 %v3836_v47, %v2190_v45  ;;  %vm2246_vm15 = vweird.f32 %v3836_v47  ;;  %vm2232_vm11 = vmor %vm2230_vm9, %vm2231_vm13 }
 0x89b   : > { %2327 = vrot.lane.b32.xlu1 %v5193_v57, %s4019_s14  ;;  %v2227_v63 = vsub.f32 1.0, %v2226_v60  ;;  %vm2247_vm5 = vmor %vm2245_vm12, %vm2246_vm15 }
 0x89c   : > { %v2242_v40 = vsub.f32 1.0, %v2241_v12  ;;  %vm2277_vm13 = vmor %vm2275_vm6, %vm2276_vm10  ;;  %vm2291_vm6 = vweird.f32 %v5205_v21 }
 0x89d   : > { %v2228_v3 = vmul.f32 %v3834_v61, %v2227_v63  ;;  %v2278_v17 = vsel %vm2277_vm13, %v5200_v7, %v2274_v11 }
 0x89e   : > { %v2243_v14 = vmul.f32 %v3836_v47, %v2242_v40 }
 0x89f   : > { %v2229_v34 = vadd.f32 %v3834_v61, %v2228_v3 }
 0x8a0   : > { %v2244_v16 = vadd.f32 %v3836_v47, %v2243_v14 }
 0x8a1   : > { %v2233_v25 = vsel %vm2232_vm11, %v3834_v61, %v2229_v34 }
 0x8a2   : > { %v2238_v44 = vsel %vm2235_vm8, %v2237_v6, %v2233_v25  ;;  %v2248_v38 = vsel %vm2247_vm5, %v3836_v47, %v2244_v16  ;;  %vm2280_vm5 = vcmp.eq.f32.partialorder %v2279_v23, 8.507059e+37  ;;  %vm2290_vm8 = vweird.f32 %v5195_v56  ;;  %v3651_v25 = vld [vmem:[#allocation7 + $0x10] sm:$0xff] }
 0x8a3   : > { %2520 = vrot.lane.b32.xlu1 %v5173_v20, %s4018_s11  ;;  %v2253_v43 = vsel %vm2250_vm7, %v2252_v32, %v2248_v38  ;;  %v5238_v53 = vmul.f32 %v2238_v44, %v5178_v2  ;;  %v2283_v2 = vsel %vm2280_vm5, %v2282_v51, %v2278_v17  ;;  %vm2292_vm10 = vmor %vm2290_vm8, %vm2291_vm6  ;;  %v3203_v38 = vld [vmem:[%s5812_s12 + $0x10] sm:$0xff]  ;;  %vm5904_vm7 = vcmp.lt.s32.totalorder %v4561_v33, 113 }
 0x8a4   : > { %v5243_v19 = vmul.f32 %v2253_v43, %v5182_v62  ;;  %v2289_v62 = vadd.f32 %v5205_v21, %v2288_v24  ;;  %v5259_v9 = vmul.f32 %v2283_v2, %v5157_v15  ;;  %v3652_v24 = vld [vmem:[#allocation7 + $0x18] sm:$0xff]  ;;  %vm5905_vm13 = vmmov %vm5904_vm7 }
 0x8a5   : > { %2365 = vrot.lane.b32.xlu0 %v5238_v53, %s4017_s6  ;;  %vm5906_vm5 = vmmov %vm5904_vm7 }
 0x8a6   : > { %2373 = vrot.lane.b32.xlu2 %v5243_v19, %s4017_s6  ;;  %v2293_v55 = vsel %vm2292_vm10, %v5205_v21, %v2289_v62  ;;  %vm5907_vm6 = vmmov %vm5906_vm5 }
 0x8a7   : > { %v2298_v15 = vsel %vm2295_vm14, %v2297_v30, %v2293_v55  ;;  %v5889_v30 = vld [vmem:[#allocation21_spill] sm:$0xff]  ;;  %vm5908_vm8 = vmmov %vm5906_vm5 }
 0x8a8   : > { %v5272_v58 = vmul.f32 %v2298_v15, %v5165_v42  ;;  %vm5909_vm10 = vmmov %vm5906_vm5 }
 0x8a9   : > { %vm5912_vm14 = vmmov %vm5906_vm5 }
 0x8ab   : > { %2377 = vrot.lane.b32.xlu1 %v5247_v1, %s4017_s6 }
 0x8ad   : > { %2375 = vrot.lane.b32.xlu0 %v5259_v9, %s4017_s6 }
 0x8ae   : > { %2524 = vrot.lane.b32.xlu2 %v5259_v9, %s4018_s11 }
 0x8b3   : > { %2325 = vrot.lane.b32.xlu1 %v5238_v53, %s4019_s14 }
 0x8b5   : > { %2516 = vrot.lane.b32.xlu0 %v5193_v57, %s4018_s11 }
 0x8b6   : > { %2369 = vrot.lane.b32.xlu2 %v5272_v58, %s4017_s6 }
 0x8bb   : > { %2619 = vrot.lane.b32.xlu1 %v5193_v57, %s4020_s19 }
 0x8bd   : > { %2335 = vrot.lane.b32.xlu0 %v5259_v9, %s4019_s14 }
 0x8be   : > { %2512 = vrot.lane.b32.xlu2 %v5169_v29, %s4018_s11 }
 0x8c3   : > { %2518 = vrot.lane.b32.xlu1 %v5272_v58, %s4018_s11 }
 0x8c5   : > { %2514 = vrot.lane.b32.xlu0 %v5238_v53, %s4018_s11 }
 0x8c6   : > { %2522 = vrot.lane.b32.xlu2 %v5243_v19, %s4018_s11 }
 0x8cb   : > { %2337 = vrot.lane.b32.xlu1 %v5247_v1, %s4019_s14 }
 0x8cd   : > { %2323 = vrot.lane.b32.xlu0 %v5169_v29, %s4019_s14 }
 0x8ce   : > { %2331 = vrot.lane.b32.xlu2 %v5173_v20, %s4019_s14 }
 0x8d3   : > { %2623 = vrot.lane.b32.xlu1 %v5173_v20, %s4020_s19 }
 0x8d5   : > { %2333 = vrot.lane.b32.xlu0 %v5243_v19, %s4019_s14 }
 0x8d6   : > { %2329 = vrot.lane.b32.xlu2 %v5272_v58, %s4019_s14 }
 0x8db   : > { %2793 = vrot.lane.b32.xlu1 %v5193_v57, %s5885_s15 }
 0x8dd   : > { %2526 = vrot.lane.b32.xlu0 %v5247_v1, %s4018_s11  ;;  %v2364_v42 = vpop.permute.xlu2 %2363  ;;  %s5932_s11 = sshll.u32 %s4192_s24, 6 }
 0x8de   : > { %2615 = vrot.lane.b32.xlu2 %v5169_v29, %s4020_s19  ;;  %s5738_s14 = scalar_lea.vmem [#allocation8], %s5932_s11  ;;  %s3957_s11 = scalar_lea.hbm %s5813_s13, 128 }
 0x8e3   : > { %2900 = vrot.lane.b32.xlu1 %v5173_v20, %s5886_s25 }
 0x8e5   : > { %2627 = vrot.lane.b32.xlu0 %v5259_v9, %s4020_s19 }
 0x8e6   : > { %2625 = vrot.lane.b32.xlu2 %v5243_v19, %s4020_s19 }
 0x8eb   : > { %2629 = vrot.lane.b32.xlu1 %v5247_v1, %s4020_s19 }
 0x8ed   : > { %2617 = vrot.lane.b32.xlu0 %v5238_v53, %s4020_s19 }
 0x8ee   : > { %2904 = vrot.lane.b32.xlu2 %v5259_v9, %s5886_s25 }
 0x8f3   : > { %2791 = vrot.lane.b32.xlu1 %v5238_v53, %s5885_s15 }
 0x8f5   : > { %2896 = vrot.lane.b32.xlu0 %v5193_v57, %s5886_s25 }
 0x8f6   : > { %2621 = vrot.lane.b32.xlu2 %v5272_v58, %s4020_s19  ;;  %v2372_v56 = vpop.permute.xlu1 %2371  ;;  %s3667_s19 = sshll.u32 %s4117_s29, 6  ;;  %s3270_s29 = sshll.u32 %s5738_s14, 4  ;;  %s3271_s29 = int_to_ptr.vmem [resolvable:$true] %s3270_s29 }
 0x8f7   : > { %v2383_v49 = vsel %vm1006_vm0, %v2372_v56, %v2364_v42  ;;  %v2379_v4 = vsel %vm1006_vm0, %v2364_v42, %v2372_v56  ;;  %s3269_s27 = scalar_lea.hbm %s5813_s13, %s3667_s19 }
 0x8f8   : > { %v2387_v35 = vmul.f32 %v2383_v49, %v4586_v46  ;;  %v2388_v34 = vmul.f32 %v2379_v4, %v5887_v26  ;;  %v3204_v49 = vld [vmem:[%s5812_s12 + $0x18] sm:$0xff]  ;;  %s3272_s17 = sshll.u32 %s3269_s27, 4  ;;  %s3273_s17 = int_to_ptr.hbm [resolvable:$true] %s3272_s17 }
 0x8f9   : > { %s3951_s20 = sshra.s32 %s3273_s17, 4  ;;  %s3952_s20 = int_to_ptr.hbm [resolvable:$true] %s3951_s20 }
 0x8fa   : > { %s3953_s18 = scalar_lea.hbm %s3952_s20, 64  ;;  %p3958_p2 = scmp.lt.s32.totalorder %s3952_s20, %s5813_s13 }
 0x8fb   : > { %3102 = vrot.lane.b32.xlu1 %v5193_v57, %s4023_s30  ;;  %p3954_p4 = scmp.ne.s32.totalorder %s3952_s20, %s3953_s18  ;;  %p3959_p9 = scmp.lt.s32.totalorder %s3957_s11, %s3953_s18 }
 0x8fd   : > { %2801 = vrot.lane.b32.xlu0 %v5259_v9, %s5885_s15  ;;  %p3955_p8 = pnand %p3954_p4, %p4162_p3  ;;  %p3960_p10 = por %p3959_p9, %p3958_p2 }
 0x8fe   : > { %2892 = vrot.lane.b32.xlu2 %v5169_v29, %s5886_s25 }
 0x8ff   : > { %p3956_p11 = pneg %p3955_p8 }
 0x900   : > { %v2374_v10 = vpop.permute.xlu2 %2373 }
 0x901   : > { %p3961_p12 = pnand %p3960_p10, %p3956_p11 }
 0x903   : > { %2898 = vrot.lane.b32.xlu1 %v5272_v58, %s5886_s25 }
 0x905   : > { %v2368_v7 = vpop.permute.xlu1 %2367  ;;  %2894 = vrot.lane.b32.xlu0 %v5238_v53, %s5886_s25 }
 0x906   : > { %2902 = vrot.lane.b32.xlu2 %v5243_v19, %s5886_s25 }
 0x908   : > { %v5340_v45 = vpop.permute.xlu2 %2524 }
 0x90b   : > { %2803 = vrot.lane.b32.xlu1 %v5247_v1, %s5885_s15 }
 0x90d   : > { %v5342_v27 = vpop.permute.xlu1 %2327  ;;  %2789 = vrot.lane.b32.xlu0 %v5169_v29, %s5885_s15 }
 0x90e   : > { %2797 = vrot.lane.b32.xlu2 %v5173_v20, %s5885_s15 }
 0x910   : > { %v2370_v18 = vpop.permute.xlu2 %2369 }
 0x913   : > { %3007 = vrot.lane.b32.xlu1 %v5259_v9, %s4024_s16 }
 0x915   : > { %v5350_v21 = vpop.permute.xlu1 %2520  ;;  %2799 = vrot.lane.b32.xlu0 %v5243_v19, %s5885_s15 }
 0x916   : > { %2795 = vrot.lane.b32.xlu2 %v5272_v58, %s5885_s15 }
 0x917   : > { %v2366_v0 = vpop.permute.xlu0 %2365 }
 0x918   : > { %v5358_v61 = vpop.permute.xlu2 %2512  ;;  %v2384_v54 = vsel %vm1006_vm0, %v2374_v10, %v2366_v0  ;;  %v2380_v59 = vsel %vm1006_vm0, %v2366_v0, %v2374_v10 }
 0x919   : > { %v2389_v28 = vmul.f32 %v2384_v54, %v4586_v46  ;;  %v2390_v52 = vmul.f32 %v2380_v59, %v5887_v26 }
 0x91b   : > { %3100 = vrot.lane.b32.xlu1 %v5238_v53, %s4023_s30  ;;  %v2400_v6 = vpack.c.bf16 %v2389_v28, %v2387_v35  ;;  %v2401_v41 = vpack.c.bf16 %v2390_v52, %v2388_v34  ;;  %v3649_v28 = vld [vmem:[#allocation7] sm:$0xff]  ;;  %v5890_v35 = vld [vmem:[#allocation18_spill] sm:$0xff] }
 0x91d   : > { %v2378_v13 = vpop.permute.xlu1 %2377  ;;  %2906 = vrot.lane.b32.xlu0 %v5247_v1, %s5886_s25 }
 0x91e   : > { %v2382_v47 = vsel %vm1006_vm0, %v2370_v18, %v2378_v13  ;;  %v2386_v22 = vsel %vm1006_vm0, %v2378_v13, %v2370_v18  ;;  %2999 = vrot.lane.b32.xlu2 %v5193_v57, %s4024_s16  ;;  %v3201_v13 = vld [vmem:[%s5812_s12] sm:$0xff] }
 0x91f   : > { %v2393_v60 = vmul.f32 %v2386_v22, %v4586_v46  ;;  %v2394_v12 = vmul.f32 %v2382_v47, %v5887_v26  ;;  %v2376_v31 = vpop.permute.xlu0 %2375 }
 0x920   : > { %v5374_v63 = vpop.permute.xlu2 %2522  ;;  %v2381_v50 = vsel %vm1006_vm0, %v2368_v7, %v2376_v31  ;;  %v2385_v36 = vsel %vm1006_vm0, %v2376_v31, %v2368_v7  ;;  %vm5894_vm0 = vcmp.lt.s32.totalorder %v4561_v33, 127 }
 0x921   : > { %v2391_v40 = vmul.f32 %v2385_v36, %v4586_v46  ;;  %v2392_v3 = vmul.f32 %v2381_v50, %v5887_v26  ;;  %vm5900_vm15 = vmmov %vm5894_vm0 }
 0x922   : > { %vm5901_vm9 = vmmov %vm5894_vm0 }
 0x923   : > { %2995 = vrot.lane.b32.xlu1 %v5169_v29, %s4024_s16  ;;  %v2402_v14 = vpack.c.bf16 %v2393_v60, %v2391_v40  ;;  %v2403_v5 = vpack.c.bf16 %v2394_v12, %v2392_v3  ;;  %v3202_v3 = vld [vmem:[%s5812_s12 + $0x8] sm:$0xff]  ;;  %vm5902_vm11 = vmmov %vm5894_vm0 }
 0x924   : > { %vm5903_vm12 = vmmov %vm5894_vm0 }
 0x925   : > { %v5384_v8 = vpop.permute.xlu1 %2325  ;;  %3110 = vrot.lane.b32.xlu0 %v5259_v9, %s4023_s30  ;;  %2426 = vmatpush.bf16.msrb.mxu2 %v2402_v14 }
 0x926   : > { %3106 = vrot.lane.b32.xlu2 %v5173_v20, %s4023_s30  ;;  %2445 = vmatpush.bf16.msrb.mxu3 %v2403_v5 }
 0x927   : > { %v5398_v11 = vpop.permute.xlu0 %2516 }
 0x928   : > { %v2332_v16 = vpop.permute.xlu2 %2331  ;;  %v2534_v14 = vsel %vm1158_vm2, %v5340_v45, %v5398_v11  ;;  %v2530_v5 = vsel %vm1158_vm2, %v5398_v11, %v5340_v45 }
 0x929   : > { %2427 = vmatpush.bf16.msrb.mxu2 %v2400_v6  ;;  %v2540_v34 = vmul.f32 %v2534_v14, %v5890_v35  ;;  %v3654_v14 = vld [vmem:[#allocation7 + $0x28] sm:$0xff] }
 0x92a   : > { %2446 = vmatpush.bf16.msrb.mxu3 %v2401_v41 }
 0x92b   : > { %3112 = vrot.lane.b32.xlu1 %v5247_v1, %s4023_s30 }
 0x92c   : > { %3524 = vmatmul.msk.bf16.vlgmr.msrb.gmra.mxu2 %vm554_vm1, %v3651_v25 }
 0x92d   : > { %v5402_v46 = vpop.permute.xlu1 %2619  ;;  %3098 = vrot.lane.b32.xlu0 %v5169_v29, %s4023_s30  ;;  %3526 = vmatmul.msk.bf16.vlgmr.msrb.gmra.mxu3 %vm554_vm1, %v3651_v25  ;;  %v5891_v25 = vld [vmem:[#allocation19_spill] sm:$0xff] }
 0x92e   : > { %3104 = vrot.lane.b32.xlu2 %v5272_v58, %s4023_s30 }
 0x92f   : > { %v2336_v32 = vpop.permute.xlu0 %2335 }
 0x930   : > { %v2330_v39 = vpop.permute.xlu2 %2329  ;;  %v2341_v43 = vsel %vm963_vm3, %v5342_v27, %v2336_v32  ;;  %v2345_v17 = vsel %vm963_vm3, %v2336_v32, %v5342_v27  ;;  %v2541_v32 = vmul.f32 %v2530_v5, %v5891_v25  ;;  %v3655_v5 = vld [vmem:[#allocation7 + $0x30] sm:$0xff] }
 0x931   : > { %v2351_v55 = vmul.f32 %v2345_v17, %v5888_v37  ;;  %v2352_v15 = vmul.f32 %v2341_v43, %v5889_v30  ;;  %v2528_v17 = vsel %vm1158_vm2, %v5358_v61, %v5350_v21 }
 0x933   : > { %3005 = vrot.lane.b32.xlu1 %v5243_v19, %s4024_s16 }
 0x935   : > { %v2519_v44 = vpop.permute.xlu1 %2518  ;;  %3108 = vrot.lane.b32.xlu0 %v5243_v19, %s4023_s30 }
 0x936   : > { %3009 = vrot.lane.b32.xlu2 %v5247_v1, %s4024_s16 }
 0x937   : > { %v2515_v23 = vpop.permute.xlu0 %2514 }
 0x938   : > { %v5425_v51 = vpop.permute.xlu2 %2615  ;;  %v2533_v6 = vsel %vm1158_vm2, %v5374_v63, %v2515_v23  ;;  %v2529_v45 = vsel %vm1158_vm2, %v2515_v23, %v5374_v63 }
 0x939   : > { %v2538_v63 = vmul.f32 %v2533_v6, %v5890_v35 }
 0x93b   : > { %3217 = vperm.xlu1 %3752, %v3203_v38  }
 0x93c   : > { %3525 = vmatmul.msk.bf16.gmra.mxu2 %vm554_vm1, %v3652_v24 }
 0x93d   : > { %v2338_v2 = vpop.permute.xlu1 %2337  ;;  %3001 = vrot.lane.b32.xlu0 %v5272_v58, %s4024_s16  ;;  %3527 = vmatmul.msk.bf16.gmra.mxu3 %vm554_vm1, %v3652_v24 }
 0x93e   : > { %v2342_v62 = vsel %vm963_vm3, %v2330_v39, %v2338_v2  ;;  %v2346_v48 = vsel %vm963_vm3, %v2338_v2, %v2330_v39  ;;  %2997 = vrot.lane.b32.xlu2 %v5238_v53, %s4024_s16  ;;  %v2539_v2 = vmul.f32 %v2529_v45, %v5891_v25 }
 0x93f   : > { %v2353_v42 = vmul.f32 %v2346_v48, %v5888_v37  ;;  %v2354_v56 = vmul.f32 %v2342_v62, %v5889_v30  ;;  %v2324_v27 = vpop.permute.xlu0 %2323  ;;  %v2537_v48 = vmul.f32 %v2528_v17, %v5891_v25  ;;  %v5899_v17 = vld [vmem:[#allocation27_spill] sm:$0xff] }
 0x940   : > { %v5441_v18 = vpop.permute.xlu2 %2625  ;;  %v2339_v47 = vsel %vm963_vm3, %v2324_v27, %v2332_v16  ;;  %v2343_v22 = vsel %vm963_vm3, %v2332_v16, %v2324_v27 }
 0x941   : > { %v2361_v10 = vpack.c.bf16 %v2353_v42, %v2351_v55  ;;  %v2362_v7 = vpack.c.bf16 %v2354_v56, %v2352_v15  ;;  %v2347_v54 = vmul.f32 %v2343_v22, %v5888_v37  ;;  %v2348_v50 = vmul.f32 %v2339_v47, %v5889_v30 }
 0x942   : > { %v2550_v15 = vpack.c.bf16 %v2539_v2, %v2537_v48  ;;  %v2726_v56 = vpack.c.bf16 %v5247_v1, %v5259_v9  ;;  %v2723_v1 = vpack.c.bf16 %v5238_v53, %v5169_v29 }
 0x943   : > { %2480 = vmatpush.bf16.msra.mxu0 %v2361_v10  ;;  %2499 = vmatpush.bf16.msra.mxu1 %v2362_v7 }
 0x945   : > { %v5443_v0 = vpop.permute.xlu1 %2623  ;;  %3003 = vrot.lane.b32.xlu0 %v5173_v20, %s4024_s16 }
 0x946   : > { %3207 = vperm.xlu2 %3750, %v3201_v13   ;;  %v5892_v13 = vld [vmem:[#allocation23_spill] sm:$0xff] }
 0x947   : > { %v2334_v60 = vpop.permute.xlu0 %2333 }
 0x948   : > { %v5454_v26 = vpop.permute.xlu2 %2904  ;;  %v2340_v12 = vsel %vm963_vm3, %v5384_v8, %v2334_v60  ;;  %v2344_v31 = vsel %vm963_vm3, %v2334_v60, %v5384_v8  ;;  %v3650_v60 = vld [vmem:[#allocation7 + $0x8] sm:$0xff]  ;;  %vm5896_vm3 = vmmov %vm5894_vm0 }
 0x949   : > { %v2349_v36 = vmul.f32 %v2344_v31, %v5888_v37  ;;  %v2350_v59 = vmul.f32 %v2340_v12, %v5889_v30  ;;  %v2635_v12 = vsel %vm1264_vm4, %v5443_v0, %v5425_v51  ;;  %v2724_v31 = vpack.c.bf16 %v5243_v19, %v5173_v20 }
 0x94b   : > { %v2359_v4 = vpack.c.bf16 %v2349_v36, %v2347_v54  ;;  %v2360_v8 = vpack.c.bf16 %v2350_v59, %v2348_v50  ;;  %v2631_v50 = vsel %vm1264_vm4, %v5425_v51, %v5443_v0 }
 0x94c   : > { %v2640_v19 = vmul.f32 %v2631_v50, %v5892_v13 }
 0x94d   : > { %v5466_v40 = vpop.permute.xlu1 %2793  ;;  %3212 = vperm.xlu0 %3751, %v3202_v3   ;;  %2481 = vmatpush.bf16.msra.mxu0 %v2359_v4 }
 0x94e   : > { %3222 = vperm.xlu2 %3750, %v3204_v49   ;;  %2500 = vmatpush.bf16.msra.mxu1 %v2360_v8 }
 0x94f   : > { %v2527_v52 = vpop.permute.xlu0 %2526 }
 0x950   : > { %v2531_v16 = vsel %vm1158_vm2, %v2519_v44, %v2527_v52  ;;  %v2535_v41 = vsel %vm1158_vm2, %v2527_v52, %v2519_v44  ;;  %3536 = vmatmul.msk.bf16.vlgmr.msra.gmra.mxu0 %vm554_vm1, %v3649_v28  ;;  %v2622_v11 = vpop.permute.xlu2 %2621  ;;  %v2532_v44 = vsel %vm1158_vm2, %v5350_v21, %v5358_v61  ;;  %v2725_v21 = vpack.c.bf16 %v5272_v58, %v5193_v57  ;;  %v3653_v61 = vld [vmem:[#allocation7 + $0x20] sm:$0xff]  ;;  %vm5895_vm2 = vmmov %vm5894_vm0 }
 0x951   : > { %v2542_v39 = vmul.f32 %v2535_v41, %v5890_v35  ;;  %v2543_v38 = vmul.f32 %v2531_v16, %v5891_v25  ;;  %3538 = vmatmul.msk.bf16.vlgmr.msra.gmra.mxu1 %vm554_vm1, %v3649_v28  ;;  %v2536_v62 = vmul.f32 %v2532_v44, %v5890_v35  ;;  %v3657_v25 = vld [vmem:[#allocation7 + $0x40] sm:$0xff] }
 0x953   : > { %v2551_v23 = vpack.c.bf16 %v2542_v39, %v2540_v34  ;;  %v2552_v24 = vpack.c.bf16 %v2543_v38, %v2541_v32  ;;  %v2549_v55 = vpack.c.bf16 %v2538_v63, %v2536_v62  ;;  %v5898_v38 = vld [vmem:[#allocation26_spill] sm:$0xff] }
 0x955   : > { %v5498_v43 = vpop.permute.xlu1 %2900  ;;  %2575 = vmatpush.bf16.msra.mxu2 %v2551_v23  ;;  %2594 = vmatpush.bf16.msra.mxu3 %v2552_v24 }
 0x957   : > { %v2628_v37 = vpop.permute.xlu0 %2627 }
 0x958   : > { %v2633_v30 = vsel %vm1264_vm4, %v5402_v46, %v2628_v37  ;;  %v2637_v42 = vsel %vm1264_vm4, %v2628_v37, %v5402_v46  ;;  %v5524_v27 = vpop.permute.xlu2 %2892  ;;  %v5893_v46 = vld [vmem:[#allocation22_spill] sm:$0xff] }
 0x959   : > { %2576 = vmatpush.bf16.msra.mxu2 %v2549_v55  ;;  %2595 = vmatpush.bf16.msra.mxu3 %v2550_v15  ;;  %v2644_v47 = vmul.f32 %v2633_v30, %v5892_v13  ;;  %v2643_v22 = vmul.f32 %v2637_v42, %v5893_v46  ;;  %v2639_v36 = vmul.f32 %v2635_v12, %v5893_v46 }
 0x95c   : > { %3548 = vmatmul.msk.bf16.vlgmr.msra.gmra.mxu2 %vm554_vm1, %v3653_v61  ;;  %3550 = vmatmul.msk.bf16.vlgmr.msra.gmra.mxu3 %vm554_vm1, %v3653_v61 }
 0x95d   : > { %v2630_v10 = vpop.permute.xlu1 %2629  ;;  %2749 = vmatpush.bf16.msrb.mxu2 %v2725_v21  ;;  %2768 = vmatpush.bf16.msrb.mxu3 %v2726_v56  ;;  %v3658_v56 = vld [vmem:[#allocation7 + $0x48] sm:$0xff] }
 0x95e   : > { %v2634_v7 = vsel %vm1264_vm4, %v2622_v11, %v2630_v10  ;;  %v2638_v57 = vsel %vm1264_vm4, %v2630_v10, %v2622_v11 }
 0x95f   : > { %v2646_v58 = vmul.f32 %v2634_v7, %v5892_v13  ;;  %v2645_v9 = vmul.f32 %v2638_v57, %v5893_v46  ;;  %v2618_v53 = vpop.permute.xlu0 %2617 }
 0x960   : > { %v2632_v59 = vsel %vm1264_vm4, %v2618_v53, %v5441_v18  ;;  %v2636_v20 = vsel %vm1264_vm4, %v5441_v18, %v2618_v53  ;;  %3537 = vmatmul.msk.bf16.gmra.mxu0 %vm554_vm1, %v3650_v60  ;;  %v2903_v8 = vpop.permute.xlu2 %2902  ;;  %vm5897_vm4 = vmmov %vm5894_vm0  ;;  %v5910_v53 = vld [vmem:[#allocation24_spill] sm:$0xff] }
 0x961   : > { %v2655_v54 = vpack.c.bf16 %v2646_v58, %v2644_v47  ;;  %2750 = vmatpush.bf16.msrb.mxu2 %v2723_v1  ;;  %v2654_v29 = vpack.c.bf16 %v2645_v9, %v2643_v22  ;;  %2769 = vmatpush.bf16.msrb.mxu3 %v2724_v31  ;;  %v2641_v51 = vmul.f32 %v2636_v20, %v5893_v46  ;;  %v3659_v22 = vld [vmem:[#allocation7 + $0x50] sm:$0xff] }
 0x962   : > { %v2642_v0 = vmul.f32 %v2632_v59, %v5892_v13  ;;  %3539 = vmatmul.msk.bf16.gmra.mxu1 %vm554_vm1, %v3650_v60 }
 0x963   : > { %2697 = vmatpush.bf16.msrb.mxu1 %v2655_v54  ;;  %2678 = vmatpush.bf16.msrb.mxu0 %v2654_v29  ;;  %v2652_v49 = vpack.c.bf16 %v2641_v51, %v2639_v36 }
 0x964   : > { %v2653_v4 = vpack.c.bf16 %v2642_v0, %v2640_v19  ;;  %v2908_v0 = vsel %vm5912_vm14, %v5524_v27, %v5498_v43 }
 0x965   : > { %v2792_v3 = vpop.permute.xlu1 %2791 }
 0x967   : > { %2679 = vmatpush.bf16.msrb.mxu0 %v2652_v49  ;;  %2698 = vmatpush.bf16.msrb.mxu1 %v2653_v4  ;;  %v2897_v28 = vpop.permute.xlu0 %2896 }
 0x968   : > { %v2798_v52 = vpop.permute.xlu2 %2797  ;;  %v2910_v1 = vsel %vm5904_vm7, %v2897_v28, %v5454_v26  ;;  %v2914_v9 = vsel %vm5905_vm13, %v5454_v26, %v2897_v28  ;;  %v5911_v26 = vld [vmem:[#allocation25_spill] sm:$0xff]  ;;  %vm5922_vm13 = vcmp.lt.s32.totalorder %v4561_v33, 112 }
 0x969   : > { %v2920_v36 = vmul.f32 %v2910_v1, %v5910_v53  ;;  %v2921_v59 = vmul.f32 %v2914_v9, %v5911_v26  ;;  %v5926_v1 = vld [vmem:[#allocation28_spill] sm:$0xff] }
 0x96c   : > { %3549 = vmatmul.msk.bf16.gmra.mxu2 %vm554_vm1, %v3654_v14  ;;  %3551 = vmatmul.msk.bf16.gmra.mxu3 %vm554_vm1, %v3654_v14  ;;  %v2916_v14 = vmul.f32 %v2908_v0, %v5910_v53 }
 0x96d   : > { %v5558_v18 = vpop.permute.xlu1 %3102 }
 0x96f   : > { %v2802_v35 = vpop.permute.xlu0 %2801 }
 0x970   : > { %3560 = vmatmul.msk.bf16.vlgmr.msrb.gmra.mxu0 %vm554_vm1, %v3655_v5  ;;  %v2807_v16 = vsel %vm5894_vm0, %v5466_v40, %v2802_v35  ;;  %v2811_v41 = vsel %vm5895_vm2, %v2802_v35, %v5466_v40  ;;  %v2796_v32 = vpop.permute.xlu2 %2795  ;;  %v3656_v40 = vld [vmem:[#allocation7 + $0x38] sm:$0xff]  ;;  %vm5913_vm0 = vmmov %vm5906_vm5  ;;  %vm5914_vm2 = vcmp.lt.s32.totalorder %v4561_v33, 111 }
 0x971   : > { %v2817_v44 = vmul.f32 %v2807_v16, %v5898_v38  ;;  %v2818_v63 = vmul.f32 %v2811_v41, %v5899_v17  ;;  %vm5921_vm7 = vmmov %vm5914_vm2 }
 0x972   : > { %3562 = vmatmul.msk.bf16.vlgmr.msrb.gmra.mxu1 %vm554_vm1, %v3655_v5 }
 0x975   : > { %v2899_v34 = vpop.permute.xlu1 %2898 }
 0x977   : > { %v2895_v6 = vpop.permute.xlu0 %2894 }
 0x978   : > { %v5584_v55 = vpop.permute.xlu2 %2999  ;;  %v2909_v31 = vsel %vm5906_vm5, %v2895_v6, %v2903_v8  ;;  %v2913_v54 = vsel %vm5907_vm6, %v2903_v8, %v2895_v6  ;;  %vm5923_vm5 = vmmov %vm5922_vm13 }
 0x979   : > { %v2918_v49 = vmul.f32 %v2909_v31, %v5910_v53  ;;  %v2919_v4 = vmul.f32 %v2913_v54, %v5911_v26  ;;  %vm5924_vm6 = vmmov %vm5923_vm5 }
 0x97a   : > { %vm5929_vm14 = vmmov %vm5923_vm5 }
 0x97b   : > { %v2929_v35 = vpack.c.bf16 %v2918_v49, %v2916_v14 }
 0x97c   : > { %3572 = vmatmul.msk.bf16.vlgmr.msrb.gmra.mxu2 %vm554_vm1, %v3657_v25  ;;  %3574 = vmatmul.msk.bf16.vlgmr.msrb.gmra.mxu3 %vm554_vm1, %v3657_v25 }
 0x97d   : > { %v2804_v45 = vpop.permute.xlu1 %2803 }
 0x97e   : > { %v2808_v11 = vsel %vm5896_vm3, %v2796_v32, %v2804_v45  ;;  %v2812_v39 = vsel %vm5897_vm4, %v2804_v45, %v2796_v32  ;;  %vm5915_vm3 = vmmov %vm5914_vm2  ;;  %v3837_v45 = vld [vmem:[%s5802_s2 + $0x10] ss:$0 sm:$0xff] }
 0x97f   : > { %v2819_v23 = vmul.f32 %v2808_v11, %v5898_v38  ;;  %v2820_v24 = vmul.f32 %v2812_v39, %v5899_v17  ;;  %v2790_v48 = vpop.permute.xlu0 %2789  ;;  %vm5916_vm4 = vmmov %vm5914_vm2 }
 0x980   : > { %3561 = vmatmul.msk.bf16.gmra.mxu0 %vm554_vm1, %v3656_v40  ;;  %v2805_v30 = vsel %vm5900_vm15, %v2790_v48, %v2798_v52  ;;  %v2809_v15 = vsel %vm5901_vm9, %v2798_v52, %v2790_v48  ;;  %v3107_v60 = vpop.permute.xlu2 %3106  ;;  %vm5917_vm15 = vmmov %vm5914_vm2 }
 0x981   : > { %v2828_v2 = vpack.c.bf16 %v2819_v23, %v2817_v44  ;;  %v2829_v62 = vpack.c.bf16 %v2820_v24, %v2818_v63  ;;  %v2813_v10 = vmul.f32 %v2805_v30, %v5898_v38  ;;  %v2814_v7 = vmul.f32 %v2809_v15, %v5899_v17  ;;  %vm5918_vm9 = vmmov %vm5914_vm2  ;;  %v3662_v15 = vld [vmem:[#allocation7 + $0x68] sm:$0xff] }
 0x982   : > { %3563 = vmatmul.msk.bf16.gmra.mxu1 %vm554_vm1, %v3656_v40 }
 0x983   : > { %2852 = vmatpush.bf16.msra.mxu0 %v2828_v2  ;;  %2871 = vmatpush.bf16.msra.mxu1 %v2829_v62 }
 0x985   : > { %v5582_v37 = vpop.permute.xlu1 %3007 }
 0x987   : > { %v2800_v21 = vpop.permute.xlu0 %2799 }
 0x988   : > { %v2806_v61 = vsel %vm5902_vm11, %v2792_v3, %v2800_v21  ;;  %v2810_v42 = vsel %vm5903_vm12, %v2800_v21, %v2792_v3  ;;  %v2912_v3 = vsel %vm5913_vm0, %v5498_v43, %v5524_v27  ;;  %v3661_v27 = vld [vmem:[#allocation7 + $0x60] sm:$0xff]  ;;  %v3105_v16 = vpop.permute.xlu2 %3104  ;;  %vm5919_vm11 = vmmov %vm5914_vm2 }
 0x989   : > { %v2815_v13 = vmul.f32 %v2806_v61, %v5898_v38  ;;  %v2816_v47 = vmul.f32 %v2810_v42, %v5899_v17  ;;  %v2917_v5 = vmul.f32 %v2912_v3, %v5911_v26  ;;  %v3660_v17 = vld [vmem:[#allocation7 + $0x58] sm:$0xff]  ;;  %vm5920_vm12 = vmmov %vm5914_vm2 }
 0x98a   : > { %vm5930_vm0 = vmmov %vm5923_vm5 }
 0x98b   : > { %v2826_v58 = vpack.c.bf16 %v2815_v13, %v2813_v10  ;;  %v2827_v46 = vpack.c.bf16 %v2816_v47, %v2814_v7  ;;  %v3013_v47 = vsel %vm5922_vm13, %v5584_v55, %v5582_v37 }
 0x98c   : > { %3573 = vmatmul.msk.bf16.gmra.mxu2 %vm554_vm1, %v3658_v56  ;;  %3575 = vmatmul.msk.bf16.gmra.mxu3 %vm554_vm1, %v3658_v56  ;;  %v3023_v9 = vmul.f32 %v3013_v47, %v5926_v1 }
 0x98d   : > { %v5598_v57 = vpop.permute.xlu1 %3100  ;;  %2853 = vmatpush.bf16.msra.mxu0 %v2826_v58  ;;  %2872 = vmatpush.bf16.msra.mxu1 %v2827_v46 }
 0x98f   : > { %v2907_v12 = vpop.permute.xlu0 %2906 }
 0x990   : > { %v2911_v50 = vsel %vm5908_vm8, %v2899_v34, %v2907_v12  ;;  %v2915_v29 = vsel %vm5909_vm10, %v2907_v12, %v2899_v34  ;;  %3584 = vmatmul.msk.bf16.vlgmr.msra.gmra.mxu0 %vm554_vm1, %v3659_v22  ;;  %v2930_v34 = vpack.c.bf16 %v2919_v4, %v2917_v5  ;;  %v3010_v10 = vpop.permute.xlu2 %3009  ;;  %vm5925_vm8 = vmmov %vm5923_vm5 }
 0x991   : > { %v2922_v20 = vmul.f32 %v2911_v50, %v5910_v53  ;;  %v2923_v19 = vmul.f32 %v2915_v29, %v5911_v26  ;;  %vm5928_vm10 = vmmov %vm5923_vm5 }
 0x992   : > { %3586 = vmatmul.msk.bf16.vlgmr.msra.gmra.mxu1 %vm554_vm1, %v3659_v22 }
 0x993   : > { %v2931_v8 = vpack.c.bf16 %v2922_v20, %v2920_v36  ;;  %v2932_v28 = vpack.c.bf16 %v2923_v19, %v2921_v59  ;;  %v3665_v19 = vld [vmem:[#allocation7 + $0x80] sm:$0xff] }
 0x995   : > { %v5622_v51 = vpop.permute.xlu1 %2995  ;;  %2955 = vmatpush.bf16.msra.mxu2 %v2931_v8  ;;  %2974 = vmatpush.bf16.msra.mxu3 %v2932_v28 }
 0x997   : > { %v3111_v52 = vpop.permute.xlu0 %3110 }
 0x998   : > { %v3116_v6 = vsel %vm5914_vm2, %v5558_v18, %v3111_v52  ;;  %v3120_v43 = vsel %vm5915_vm3, %v3111_v52, %v5558_v18  ;;  %v3838_v18 = vld [vmem:[%s5802_s2 + $0x18] ss:$0 sm:$0xff]  ;;  %vm5931_vm2 = vmmov %vm5930_vm0  ;;  %v3663_v52 = vld [vmem:[#allocation7 + $0x70] sm:$0xff] }
 0x999   : > { %2956 = vmatpush.bf16.msra.mxu2 %v2929_v35  ;;  %2975 = vmatpush.bf16.msra.mxu3 %v2930_v34  ;;  %v3126_v11 = vmul.f32 %v3837_v45, %v3116_v6  ;;  %v3127_v39 = vmul.f32 %v3838_v18, %v3120_v43  ;;  %v3666_v35 = vld [vmem:[#allocation7 + $0x88] sm:$0xff]  ;;  %v3664_v34 = vld [vmem:[#allocation7 + $0x78] sm:$0xff] }
 0x99c   : > { %3596 = vmatmul.msk.bf16.vlgmr.msra.gmra.mxu2 %vm554_vm1, %v3661_v27  ;;  %3598 = vmatmul.msk.bf16.vlgmr.msra.gmra.mxu3 %vm554_vm1, %v3661_v27 }
 0x99d   : > { %v3113_v41 = vpop.permute.xlu1 %3112 }
 0x99e   : > { %v3117_v25 = vsel %vm5916_vm4, %v3105_v16, %v3113_v41  ;;  %v3121_v32 = vsel %vm5917_vm15, %v3113_v41, %v3105_v16 }
 0x99f   : > { %v3128_v38 = vmul.f32 %v3837_v45, %v3117_v25  ;;  %v3129_v44 = vmul.f32 %v3838_v18, %v3121_v32  ;;  %v3099_v24 = vpop.permute.xlu0 %3098 }
 0x9a0   : > { %3585 = vmatmul.msk.bf16.gmra.mxu0 %vm554_vm1, %v3660_v17  ;;  %v3114_v40 = vsel %vm5918_vm9, %v3099_v24, %v3107_v60  ;;  %v3118_v2 = vsel %vm5919_vm11, %v3107_v60, %v3099_v24  ;;  %v5927_v60 = vld [vmem:[#allocation29_spill] sm:$0xff] }
 0x9a1   : > { %v3137_v63 = vpack.c.bf16 %v3128_v38, %v3126_v11  ;;  %v3138_v23 = vpack.c.bf16 %v3129_v44, %v3127_v39  ;;  %v3122_v21 = vmul.f32 %v3837_v45, %v3114_v40  ;;  %v3123_v61 = vmul.f32 %v3838_v18, %v3118_v2 }
 0x9a2   : > { %3587 = vmatmul.msk.bf16.gmra.mxu1 %vm554_vm1, %v3660_v17 }
 0x9a3   : > { %3161 = vmatpush.bf16.msrb.mxu2 %v3137_v63  ;;  %3180 = vmatpush.bf16.msrb.mxu3 %v3138_v23 }
 0x9a5   : > { %v3006_v50 = vpop.permute.xlu1 %3005 }
 0x9a7   : > { %v3109_v62 = vpop.permute.xlu0 %3108 }
 0x9a8   : > { %v3115_v48 = vsel %vm5920_vm12, %v5598_v57, %v3109_v62  ;;  %v3119_v30 = vsel %vm5921_vm7, %v3109_v62, %v5598_v57  ;;  %v3017_v57 = vsel %vm5923_vm5, %v5582_v37, %v5584_v55  ;;  %v2998_v37 = vpop.permute.xlu2 %2997 }
 0x9a9   : > { %v3124_v42 = vmul.f32 %v3837_v45, %v3115_v48  ;;  %v3125_v56 = vmul.f32 %v3838_v18, %v3119_v30  ;;  %v3024_v12 = vmul.f32 %v3017_v57, %v5927_v60  ;;  %v3012_v55 = vsel %vm5928_vm10, %v2998_v37, %v3006_v50 }
 0x9aa   : > { %v3016_v36 = vsel %vm5929_vm14, %v3006_v50, %v2998_v37  ;;  %v3021_v0 = vmul.f32 %v3012_v55, %v5926_v1 }
 0x9ab   : > { %v3135_v7 = vpack.c.bf16 %v3124_v42, %v3122_v21  ;;  %v3136_v13 = vpack.c.bf16 %v3125_v56, %v3123_v61  ;;  %v3022_v3 = vmul.f32 %v3016_v36, %v5927_v60 }
 0x9ac   : > { %3597 = vmatmul.msk.bf16.gmra.mxu2 %vm554_vm1, %v3662_v15  ;;  %3599 = vmatmul.msk.bf16.gmra.mxu3 %vm554_vm1, %v3662_v15 }
 0x9ad   : > { %3162 = vmatpush.bf16.msrb.mxu2 %v3135_v7  ;;  %3181 = vmatpush.bf16.msrb.mxu3 %v3136_v13 }
 0x9af   : > { %v3002_v58 = vpop.permute.xlu0 %3001  ;;  %v2429_v8 = vpop.f32.mrf.mxu2 }
 0x9b0   : > { %v3014_v46 = vsel %vm5924_vm6, %v3002_v58, %v3010_v10  ;;  %v3018_v22 = vsel %vm5925_vm8, %v3010_v10, %v3002_v58  ;;  %v2448_v28 = vpop.f32.mrf.mxu3 }
 0x9b1   : > { %v3025_v31 = vmul.f32 %v3014_v46, %v5926_v1  ;;  %v3026_v54 = vmul.f32 %v3018_v22, %v5927_v60 }
 0x9b3   : > { %v3034_v29 = vpack.c.bf16 %v3025_v31, %v3023_v9  ;;  %v3035_v53 = vpack.c.bf16 %v3026_v54, %v3024_v12 }
 0x9b5   : > { %3058 = vmatpush.bf16.msrb.mxu0 %v3034_v29  ;;  %3077 = vmatpush.bf16.msrb.mxu1 %v3035_v53 }
 0x9b7   : > { %v3004_v26 = vpop.permute.xlu0 %3003  ;;  %v2431_v33 = vpop.f32.mrf.mxu2 }
 0x9b8   : > { %v3011_v59 = vsel %vm5930_vm0, %v5622_v51, %v3004_v26  ;;  %v3015_v20 = vsel %vm5931_vm2, %v3004_v26, %v5622_v51  ;;  %v2450_v51 = vpop.f32.mrf.mxu3 }
 0x9b9   : > { %v3019_v49 = vmul.f32 %v3011_v59, %v5926_v1  ;;  %v3020_v4 = vmul.f32 %v3015_v20, %v5927_v60 }
 0x9bb   : > { %v3032_v14 = vpack.c.bf16 %v3021_v0, %v3019_v49  ;;  %v3033_v5 = vpack.c.bf16 %v3022_v3, %v3020_v4 }
 0x9bc   : > { %3620 = vmatmul.msk.bf16.vlgmr.msrb.gmra.mxu2 %vm554_vm1, %v3665_v19  ;;  %3622 = vmatmul.msk.bf16.vlgmr.msrb.gmra.mxu3 %vm554_vm1, %v3665_v19 }
 0x9bd   : > { %3059 = vmatpush.bf16.msrb.mxu0 %v3032_v14  ;;  %3078 = vmatpush.bf16.msrb.mxu1 %v3033_v5 }
 0x9bf   : > { %v2434_v43 = vpop.f32.mrf.mxu2 }
 0x9c0   : > { %3608 = vmatmul.msk.bf16.vlgmr.msrb.gmra.mxu0 %vm554_vm1, %v3663_v52  ;;  %3610 = vmatmul.msk.bf16.vlgmr.msrb.gmra.mxu1 %vm554_vm1, %v3663_v52  ;;  %v2453_v41 = vpop.f32.mrf.mxu3 }
 0x9c7   : > { %v2436_v39 = vpop.f32.mrf.mxu2 }
 0x9c8   : > { %v2455_v38 = vpop.f32.mrf.mxu3 }
 0x9cc   : > { %3621 = vmatmul.msk.bf16.gmra.mxu2 %vm554_vm1, %v3666_v35  ;;  %3623 = vmatmul.msk.bf16.gmra.mxu3 %vm554_vm1, %v3666_v35 }
 0x9cd   : > { %v2483_v6 = vpop.f32.mrf.mxu0 }
 0x9ce   : > { %v2484_v27 = vadd.f32 %v2483_v6, %v2429_v8  ;;  %v2502_v16 = vpop.f32.mrf.mxu1 }
 0x9cf   : > { %v2503_v25 = vadd.f32 %v2502_v16, %v2448_v28 }
 0x9d0   : > { %3609 = vmatmul.msk.bf16.gmra.mxu0 %vm554_vm1, %v3664_v34  ;;  %3611 = vmatmul.msk.bf16.gmra.mxu1 %vm554_vm1, %v3664_v34 }
 0x9d5   : > { %v2485_v32 = vpop.f32.mrf.mxu0 }
 0x9d6   : > { %v2486_v45 = vadd.f32 %v2485_v32, %v2431_v33  ;;  %v2504_v11 = vpop.f32.mrf.mxu1 }
 0x9d7   : > { %v2505_v18 = vadd.f32 %v2504_v11, %v2450_v51 }
 0x9dd   : > { %v2488_v44 = vpop.f32.mrf.mxu0 }
 0x9de   : > { %v2489_v17 = vadd.f32 %v2488_v44, %v2434_v43 }
 0x9df   : > { %v2507_v63 = vpop.f32.mrf.mxu1  ;;  %v2578_v24 = vpop.f32.mrf.mxu2 }
 0x9e0   : > { %v2508_v23 = vadd.f32 %v2507_v63, %v2453_v41  ;;  %v2607_v40 = vadd.f32 %v2578_v24, %v2484_v27  ;;  %v2597_v2 = vpop.f32.mrf.mxu3 }
 0x9e1   : > { %v2608_v62 = vadd.f32 %v2597_v2, %v2503_v25 }
 0x9e5   : > { %v2490_v48 = vpop.f32.mrf.mxu0 }
 0x9e6   : > { %v2491_v30 = vadd.f32 %v2490_v48, %v2436_v39 }
 0x9e7   : > { %v2509_v15 = vpop.f32.mrf.mxu1  ;;  %v2580_v61 = vpop.f32.mrf.mxu2 }
 0x9e8   : > { %v2510_v21 = vadd.f32 %v2509_v15, %v2455_v38  ;;  %v2609_v42 = vadd.f32 %v2580_v61, %v2486_v45  ;;  %v2599_v56 = vpop.f32.mrf.mxu3  ;;  %v3208_v15 = vpop.permute.xlu2 %3207 }
 0x9e9   : > { %v2610_v10 = vadd.f32 %v2599_v56, %v2505_v18 }
 0x9ed   : > { %v2681_v7 = vpop.f32.mrf.mxu0 }
 0x9ee   : > { %v2710_v43 = vadd.f32 %v2681_v7, %v2607_v40 }
 0x9ef   : > { %v2583_v13 = vpop.f32.mrf.mxu2  ;;  %v2700_v47 = vpop.f32.mrf.mxu1 }
 0x9f0   : > { %v5706_v57 = vadd.f32 %v2583_v13, %v2489_v17  ;;  %v2602_v58 = vpop.f32.mrf.mxu3  ;;  %v2711_v16 = vadd.f32 %v2700_v47, %v2608_v62 }
 0x9f1   : > { %v5708_v46 = vadd.f32 %v2602_v58, %v2508_v23 }
 0x9f5   : > { %v2683_v60 = vpop.f32.mrf.mxu0 }
 0x9f6   : > { %v2712_v17 = vadd.f32 %v2683_v60, %v2609_v42  ;;  %v3839_v42 = vld [vmem:[%s4198_s23] sm:$0xff]  ;;  %v3840_v60 = vld [vmem:[%s4198_s23 + $0x8] sm:$0xff] }
 0x9f7   : > { %v2585_v22 = vpop.f32.mrf.mxu2  ;;  %v2702_v31 = vpop.f32.mrf.mxu1 }
 0x9f8   : > { %v5710_v1 = vadd.f32 %v2585_v22, %v2491_v30  ;;  %v2604_v9 = vpop.f32.mrf.mxu3  ;;  %v2713_v24 = vadd.f32 %v2702_v31, %v2610_v10 }
 0x9f9   : > { %v5712_v12 = vadd.f32 %v2604_v9, %v2510_v21 }
 0x9fd   : > { %v2686_v29 = vpop.f32.mrf.mxu0 }
 0x9ff   : > { %v2752_v54 = vpop.f32.mrf.mxu2  ;;  %v2705_v53 = vpop.f32.mrf.mxu1 }
 0xa00   : > { %v2771_v50 = vpop.f32.mrf.mxu3  ;;  %v2781_v25 = vadd.f32 %v2752_v54, %v2710_v43  ;;  %v2714_v54 = vadd.f32 %v2686_v29, %v5706_v57  ;;  %v3213_v57 = vpop.permute.xlu0 %3212 }
 0xa01   : > { %v2782_v45 = vadd.f32 %v2771_v50, %v2711_v16 }
 0xa05   : > { %v5714_v36 = vpop.f32.mrf.mxu0 }
 0xa07   : > { %v2754_v37 = vpop.f32.mrf.mxu2  ;;  %v5716_v26 = vpop.f32.mrf.mxu1 }
 0xa08   : > { %v2773_v55 = vpop.f32.mrf.mxu3  ;;  %v2783_v62 = vadd.f32 %v2754_v37, %v2712_v17 }
 0xa09   : > { %v2784_v21 = vadd.f32 %v2773_v55, %v2713_v24  ;;  %v2715_v55 = vadd.f32 %v2705_v53, %v5708_v46 }
 0xa0d   : > { %v2855_v19 = vpop.f32.mrf.mxu0 }
 0xa0e   : > { %v2884_v11 = vadd.f32 %v2855_v19, %v2781_v25 }
 0xa0f   : > { %v2757_v59 = vpop.f32.mrf.mxu2  ;;  %v2874_v3 = vpop.f32.mrf.mxu1 }
 0xa10   : > { %v5718_v20 = vpop.f32.mrf.mxu3  ;;  %v2885_v18 = vadd.f32 %v2874_v3, %v2782_v45 }
 0xa11   : > { %v2786_v29 = vadd.f32 %v5718_v20, %v2715_v55 }
 0xa15   : > { %v2857_v28 = vpop.f32.mrf.mxu0 }
 0xa16   : > { %v2886_v56 = vadd.f32 %v2857_v28, %v2783_v62  ;;  %v2785_v28 = vadd.f32 %v2757_v59, %v2714_v54  ;;  %v3841_v59 = vld [vmem:[%s4198_s23 + $0x10] sm:$0xff]  ;;  %v3846_v54 = vld [vmem:[%s4198_s23 + $0x38] sm:$0xff] }
 0xa17   : > { %v5720_v0 = vpop.f32.mrf.mxu2  ;;  %v2876_v14 = vpop.f32.mrf.mxu1 }
 0xa18   : > { %v5722_v49 = vpop.f32.mrf.mxu3  ;;  %v2887_v13 = vadd.f32 %v2876_v14, %v2784_v21 }
 0xa1d   : > { %v2860_v33 = vpop.f32.mrf.mxu0 }
 0xa1e   : > { %v2888_v46 = vadd.f32 %v2860_v33, %v2785_v28  ;;  %v2717_v33 = vadd.f32 %v5716_v26, %v5712_v12 }
 0xa1f   : > { %v2958_v4 = vpop.f32.mrf.mxu2  ;;  %v2879_v51 = vpop.f32.mrf.mxu1 }
 0xa20   : > { %v2977_v8 = vpop.f32.mrf.mxu3  ;;  %v2987_v39 = vadd.f32 %v2958_v4, %v2884_v11  ;;  %v2889_v43 = vadd.f32 %v2879_v51, %v2786_v29  ;;  %v2788_v62 = vadd.f32 %v5722_v49, %v2717_v33 }
 0xa21   : > { %v2988_v38 = vadd.f32 %v2977_v8, %v2885_v18  ;;  %v3842_v18 = vld [vmem:[%s4198_s23 + $0x18] sm:$0xff] }
 0xa25   : > { %v5724_v6 = vpop.f32.mrf.mxu0 }
 0xa27   : > { %v2960_v5 = vpop.f32.mrf.mxu2  ;;  %v5726_v27 = vpop.f32.mrf.mxu1 }
 0xa28   : > { %v2979_v52 = vpop.f32.mrf.mxu3  ;;  %v2989_v58 = vadd.f32 %v2960_v5, %v2886_v56  ;;  %v2891_v12 = vadd.f32 %v5726_v27, %v2788_v62 }
 0xa29   : > { %v2990_v9 = vadd.f32 %v2979_v52, %v2887_v13 }
 0xa2f   : > { %v2963_v35 = vpop.f32.mrf.mxu2 }
 0xa30   : > { %v2982_v34 = vpop.f32.mrf.mxu3  ;;  %v2991_v25 = vadd.f32 %v2963_v35, %v2888_v46 }
 0xa31   : > { %v2992_v11 = vadd.f32 %v2982_v34, %v2889_v43 }
 0xa37   : > { %v5728_v41 = vpop.f32.mrf.mxu2 }
 0xa38   : > { %v5730_v32 = vpop.f32.mrf.mxu3 }
 0xa39   : > { %v2994_v21 = vadd.f32 %v5730_v32, %v2891_v12 }
 0xa3d   : > { %v3061_v44 = vpop.f32.mrf.mxu0  ;;  %v3080_v23 = vpop.f32.mrf.mxu1 }
 0xa3e   : > { %v3090_v63 = vadd.f32 %v3061_v44, %v2987_v39  ;;  %v3091_v40 = vadd.f32 %v3080_v23, %v2988_v38  ;;  %v2716_v44 = vadd.f32 %v5714_v36, %v5710_v1 }
 0xa3f   : > { %v3164_v2 = vpop.f32.mrf.mxu2 }
 0xa40   : > { %v3193_v48 = vadd.f32 %v3164_v2, %v3090_v63  ;;  %v3183_v30 = vpop.f32.mrf.mxu3  ;;  %v2787_v24 = vadd.f32 %v5720_v0, %v2716_v44  ;;  %v3218_v2 = vpop.permute.xlu1 %3217  ;;  %v3843_v0 = vld [vmem:[%s4198_s23 + $0x20] sm:$0xff] }
 0xa41   : > { %v3194_v61 = vadd.f32 %v3183_v30, %v3091_v40 }
 0xa42   : > { %v3225_v7 = vadd.f32 %v3208_v15, %v3193_v48  ;;  %v2890_v36 = vadd.f32 %v5724_v6, %v2787_v24 }
 0xa43   : > { %v3226_v47 = vadd.f32 %v3208_v15, %v3194_v61  ;;  %v3844_v61 = vld [vmem:[%s4198_s23 + $0x28] sm:$0xff] }
 0xa44   : > { %v3233_v22 = vadd.f32 %v3839_v42, %v3225_v7  ;;  %v2993_v30 = vadd.f32 %v5728_v41, %v2890_v36 }
 0xa45   : > { %v3234_v10 = vadd.f32 %v3840_v60, %v3226_v47  ;;  %v3063_v31 = vpop.f32.mrf.mxu0  ;;  %v3082_v19 = vpop.f32.mrf.mxu1 }
 0xa46   : > { %v3241_v50 = vmul.f32 0.70710677, %v3233_v22  ;;  %v3092_v37 = vadd.f32 %v3063_v31, %v2989_v58  ;;  %v3093_v4 = vadd.f32 %v3082_v19, %v2990_v9  ;;  %v3223_v22 = vpop.permute.xlu2 %3222 }
 0xa47   : > { %v3242_v3 = vmul.f32 0.70710677, %v3234_v10  ;;  %v3166_v8 = vpop.f32.mrf.mxu2  ;;  %v3845_v10 = vld [vmem:[%s4198_s23 + $0x30] sm:$0xff] }
 0xa48   : > { %3249 = vst [vmem:[%s5738_s14] sm:$0xff] %v3241_v50  ;;  %v3195_v14 = vadd.f32 %v3166_v8, %v3092_v37  ;;  %v3185_v5 = vpop.f32.mrf.mxu3 }
 0xa49   : > { %3250 = vst [vmem:[%s5738_s14 + $0x8] sm:$0xff] %v3242_v3  ;;  %v3196_v52 = vadd.f32 %v3185_v5, %v3093_v4 }
 0xa4a   : > { %v3227_v53 = vadd.f32 %v3213_v57, %v3195_v14 }
 0xa4b   : > { %v3228_v16 = vadd.f32 %v3213_v57, %v3196_v52 }
 0xa4c   : > { %v3235_v45 = vadd.f32 %v3841_v59, %v3227_v53 }
 0xa4d   : > { %v3236_v39 = vadd.f32 %v3842_v18, %v3228_v16  ;;  %v3066_v38 = vpop.f32.mrf.mxu0  ;;  %v3085_v63 = vpop.f32.mrf.mxu1 }
 0xa4e   : > { %v3243_v17 = vmul.f32 0.70710677, %v3235_v45  ;;  %v3094_v20 = vadd.f32 %v3066_v38, %v2991_v25  ;;  %v3095_v35 = vadd.f32 %v3085_v63, %v2992_v11 }
 0xa4f   : > { %v3244_v51 = vmul.f32 0.70710677, %v3236_v39  ;;  %v3169_v23 = vpop.f32.mrf.mxu2 }
 0xa50   : > { %3251 = vst [vmem:[%s5738_s14 + $0x10] sm:$0xff] %v3243_v17  ;;  %v3197_v34 = vadd.f32 %v3169_v23, %v3094_v20  ;;  %v3188_v40 = vpop.f32.mrf.mxu3 }
 0xa51   : > { %3252 = vst [vmem:[%s5738_s14 + $0x18] sm:$0xff] %v3244_v51  ;;  %v3198_v1 = vadd.f32 %v3188_v40, %v3095_v35 }
 0xa52   : > { %v3229_v48 = vadd.f32 %v3218_v2, %v3197_v34 }
 0xa53   : > { %v3230_v26 = vadd.f32 %v3218_v2, %v3198_v1 }
 0xa54   : > { %v3237_v15 = vadd.f32 %v3843_v0, %v3229_v48 }
 0xa55   : > { %v3238_v56 = vadd.f32 %v3844_v61, %v3230_v26  ;;  %v3068_v49 = vpop.f32.mrf.mxu0  ;;  %v3087_v6 = vpop.f32.mrf.mxu1 }
 0xa56   : > { %v3245_v7 = vmul.f32 0.70710677, %v3237_v15  ;;  %v3096_v13 = vadd.f32 %v3068_v49, %v2993_v30  ;;  %v3097_v27 = vadd.f32 %v3087_v6, %v2994_v21 }
 0xa57   : > { %v3246_v47 = vmul.f32 0.70710677, %v3238_v56  ;;  %v3171_v58 = vpop.f32.mrf.mxu2 }
 0xa58   : > { %3253 = vst [vmem:[%s5738_s14 + $0x20] sm:$0xff] %v3245_v7  ;;  %v3199_v41 = vadd.f32 %v3171_v58, %v3096_v13  ;;  %v3190_v42 = vpop.f32.mrf.mxu3 }
 0xa59   : > { %3254 = vst [vmem:[%s5738_s14 + $0x28] sm:$0xff] %v3246_v47  ;;  %v3200_v32 = vadd.f32 %v3190_v42, %v3097_v27 }
 0xa5a   : > { %v3231_v9 = vadd.f32 %v3223_v22, %v3199_v41 }
 0xa5b   : > { %v3232_v60 = vadd.f32 %v3223_v22, %v3200_v32 }
 0xa5c   : > { %v3239_v31 = vadd.f32 %v3845_v10, %v3231_v9 }
 0xa5d   : > { %v3240_v50 = vadd.f32 %v3846_v54, %v3232_v60 }
 0xa5e   : > { %v3247_v37 = vmul.f32 0.70710677, %v3239_v31 }
 0xa5f   : > { %v3248_v19 = vmul.f32 0.70710677, %v3240_v50 }
 0xa60   : > { %3255 = vst [vmem:[%s5738_s14 + $0x30] sm:$0xff] %v3247_v37 }
 0xa61   : > { %3256 = vst [vmem:[%s5738_s14 + $0x38] sm:$0xff] %v3248_v19 }
 0xa62   : > { %3964 = shalt.err (!%p3961_p12)
}
 0xa63   : > { %s4025_s24 = smov 256  }
 0xa64   : > { %3678 = dma.vmem_to_hbm [thread:$0]  (%p4162_p3), %s3271_s29, 1024, %s3273_s17, %s3258_s21, %s4025_s24, %s4025_s24, %s4017_s6  }
 0xa65 PF: > { %s5933_s14 = sld [smem:[#allocation12_spill]]  ;;  %p5935_p13 = scmp.ge.s32.totalorder %s4007_s28, 2 }
 0xa67   : > { %p3692_p0 = pnand %p5935_p13, %p4131_p6 }
 0xa69   : > { %p3693_p5 = pneg %p3692_p0 }
 0xa6b   : > { %s3287_s16 = sand.u32 1, %s5933_s14  }
 0xa6c   : > { %s3288_s27 = scalar_lea.sflag [#allocation4], %s3287_s16 }
 0xa6d   : > { %3990 = dma.done.wait (%p3693_p5), %s3288_s27, 1024  }
 0xa6e   : > { %3992 = vsyncadd (%p3693_p5), %s3288_s27, 4294966272  ;;  %s5936_s28 = sld [smem:[#allocation15_spill]]  ;;  %s5939_s25 = smov %s3999_s26 }
 0xa6f   : > { %s5937_s20 = sld [smem:[#allocation13_spill]] }
 0xa70   : > { %s5938_s27 = sld [smem:[#allocation16_spill]] }
 0xa74   : > { %p27_p7 = scmp.ge.s32.totalorder %s5936_s28, 4  }
 0xa75   : > { %s5940_s26 = smov %s5937_s20 }
 0xa76   :  { %29 = sbr.rel (!%p27_p7) target bundleno = 9 (0x9), region = 144 }
 0xa7b   :  { %3294 = vsyncpa [#allocation3], 1 }
 0xa7c   :  { %3296 = vsyncpa [#allocation3 + $0x1], 1 }
 0xa7d   :  { %3297 = vsyncpa [#allocation6], 1 }
 0xa7e   :  { %3298 = vsyncpa [#allocation4], 1 }
 0xa7f   :  { %3300 = vsyncpa [#allocation4 + $0x1], 1 }

</bundles_post_ra>
